<compile_context>
chip_gen: v6e
topology: v6e:2x2x1
jax: 0.10.0
libtpu: 0.0.40
codegen_flags: <defaults>
</compile_context>

<pallas_src>
import functools

import jax
import jax.numpy as jnp
from jax.experimental import pallas as pl
from jax.experimental.pallas import tpu as pltpu

KSIZE = 7
PAD = 3


# --------------------------------------------------------------------------- #
# XLU lane-rotate availability probe (one-time).  Falls back to slice+concat
# shifts if pltpu.roll is unavailable or its compiled semantics don't match
# jnp.roll on this jax/libtpu version -- the kernel stays correct either way.
# --------------------------------------------------------------------------- #
_XLU_ROLL_OK = None


def _xlu_roll_ok():
    global _XLU_ROLL_OK
    if _XLU_ROLL_OK is None:
        try:
            x = jnp.arange(8 * 256, dtype=jnp.float32).reshape(8, 256)

            def probe(x_ref, o_ref):
                o_ref[...] = pltpu.roll(pltpu.roll(x_ref[...], 3, axis=1), 130, axis=1)

            y = pl.pallas_call(
                probe, out_shape=jax.ShapeDtypeStruct((8, 256), jnp.float32))(x)
            ref = jnp.roll(jnp.roll(x, 3, axis=1), 130, axis=1)
            _XLU_ROLL_OK = bool(jnp.array_equal(y, ref))
        except Exception:
            _XLU_ROLL_OK = False
    return _XLU_ROLL_OK


def _lane_shift(v, delta, hw, use_xlu_roll):
    """out[..., p] = v[..., p + delta] with lane wrap-around (caller masks the wrap)."""
    s = (-delta) % hw
    if s == 0:
        return v
    if use_xlu_roll and hw % 128 == 0:
        # Single XLU lane rotation (jnp.roll semantics); the XLU slot is
        # otherwise idle while the VPU does the 98 conv FMAs.
        return pltpu.roll(v, s, axis=v.ndim - 1)
    return jnp.concatenate([v[..., hw - s:], v[..., :hw - s]], axis=-1)


# --------------------------------------------------------------------------- #
# Kernel
# --------------------------------------------------------------------------- #
def spatial_attention_kernel(w_ref, mask_ref, x_ref, o_ref, sum_ref, max_ref,
                             *, H, W, C, use_xlu_roll):
    # w_ref:    SMEM (2*49,) f32   -- avg-channel 7x7 weights (row-major), then max-channel
    # mask_ref: VMEM (14, HW) f32  -- rows 0..6 row-validity, 7..13 col-validity
    # x_ref:    VMEM (Bb, Cb, HW)  -- input dtype
    # o_ref:    VMEM (Bb, HW)      -- input dtype (sublane-dense store)
    # sum_ref / max_ref: VMEM (Bb, HW) f32 running channel sum / max
    HW = H * W
    c_step = pl.program_id(1)

    # ---- channel mean + max over this C tile: one full-tile load, one pass ----
    xt = x_ref[...]                                       # (Bb, Cb, HW)
    part_sum = xt.astype(jnp.float32).sum(axis=1)         # f32 accumulation
    part_max = xt.max(axis=1).astype(jnp.float32)         # max exact in input dtype

    @pl.when(c_step == 0)
    def _():
        sum_ref[...] = part_sum
        max_ref[...] = part_max

    @pl.when(c_step > 0)
    def _():
        sum_ref[...] = sum_ref[...] + part_sum
        max_ref[...] = jnp.maximum(max_ref[...], part_max)

    # ---- last C step: 7x7 "same" conv on [avg, max] + sigmoid -----------------
    @pl.when(c_step == pl.num_programs(1) - 1)
    def _():
        avg = sum_ref[...] * (1.0 / C)
        mx = max_ref[...]

        # Host-precomputed zero-padding masks (loaded once, compared once per tap row).
        row_ok = [mask_ref[kh:kh + 1, :] != 0.0 for kh in range(KSIZE)]           # (1, HW)
        col_ok = [mask_ref[KSIZE + kw:KSIZE + kw + 1, :] != 0.0 for kw in range(KSIZE)]

        def row_shift(img, kh):
            d = kh - PAD            # img[b, (i+d)*W + j]; zero when i+d outside [0, H)
            t = _lane_shift(img, d * W, HW, use_xlu_roll)
            return t if d == 0 else jnp.where(row_ok[kh], t, 0.0)   # center tap: no select

        def col_shift(t, kw):
            d = kw - PAD            # t[b, i*W + (j+d)]; zero when j+d outside [0, W)
            u = _lane_shift(t, d, HW, use_xlu_roll)
            return u if d == 0 else jnp.where(col_ok[kw], u, 0.0)

        acc = jnp.zeros(avg.shape, jnp.float32)
        for ch, img in ((0, avg), (1, mx)):               # weight layout: avg block, max block
            shifted = [row_shift(img, kh) for kh in range(KSIZE)]
            for kw in range(KSIZE):
                base = ch * KSIZE * KSIZE + kw
                t = shifted[0] * w_ref[base]
                for kh in range(1, KSIZE):
                    t = t + shifted[kh] * w_ref[base + kh * KSIZE]
                acc = acc + col_shift(t, kw)

        o_ref[...] = jax.nn.sigmoid(acc).astype(o_ref.dtype)


# --------------------------------------------------------------------------- #
# Block-size / VMEM-budget selection (generation-aware)
# --------------------------------------------------------------------------- #
def _tpu_vmem_env():
    """Returns (vmem_limit_bytes, block_budget_bytes, two_tensorcore_chip)."""
    try:
        cap = int(pltpu.get_tpu_info().vmem_capacity_bytes)
    except Exception:
        cap = 64 * 1024 * 1024                       # conservative (v7x-sized)
    two_tc = cap <= 64 * 1024 * 1024                 # v7x-like: 64 MiB/TC, 2 TCs per chip
    if cap >= 100 * 1024 * 1024:                     # v5e / v6e: 128 MiB physical
        vmem_limit = 96 * 1024 * 1024
    else:                                            # v7x: keep 32 MiB scoped limit
        vmem_limit = 32 * 1024 * 1024
    return vmem_limit, int(vmem_limit * 0.8), two_tc


def _pick_blocks(N, C, HW, in_item, out_item, budget, two_tc):
    def divisors_desc(n):
        return [d for d in range(n, 0, -1) if n % d == 0]

    # Output block (bb, HW): sublane dim must be 8-aligned or the full batch dim.
    def ok_b(bb):
        return bb % 8 == 0 or bb == N

    # Input block (bb, cb, HW): cb is its sublane dim.
    def ok_c(cb):
        return cb % 8 == 0 or cb == C

    def block_bytes(bb, cb):
        return (2 * bb * cb * HW * in_item           # input block, double-buffered
                + 2 * bb * HW * out_item             # output block, double-buffered
                + 2 * bb * HW * 4                    # sum / max scratch
                + 28 * bb * HW * 4                   # conv-phase live temporaries (generous)
                + 14 * HW * 4)                       # boundary masks

    best_key, best = None, None
    for cb in divisors_desc(C):
        if not ok_c(cb):
            continue
        for bb in divisors_desc(N):
            if not ok_b(bb):
                continue
            if block_bytes(bb, cb) > budget:
                continue
            key = (bb >= 8 or bb == N, bb * cb, cb)   # sublane-dense out, then biggest block
            if best_key is None or key > best_key:
                best_key, best = key, (bb, cb)
            break                                     # largest feasible bb for this cb
    if best is None:                                  # nothing fits: smallest legal blocks
        best = (min(d for d in divisors_desc(N) if ok_b(d)),
                min(d for d in divisors_desc(C) if ok_c(d)))
    bb, cb = best

    # v7x only: keep >= 2 batch grid steps so the "parallel" axis shards across
    # both TensorCores (single-TC chips keep the biggest block instead).
    if two_tc and N // bb < 2:
        for b2 in divisors_desc(N):
            if b2 <= N // 2 and ok_b(b2) and block_bytes(b2, cb) <= budget:
                bb = b2
                break
    return bb, cb


# --------------------------------------------------------------------------- #
# Wrapper
# --------------------------------------------------------------------------- #
def spatial_attention(x, conv_w):
    """x: (N, C, H, W); conv_w: (1, 2, 7, 7) -> sigmoid(conv2d([mean_c, max_c], W)), (N,1,H,W)."""
    N, C, H, W = x.shape
    HW = H * W
    out_dtype = x.dtype

    x_flat = x.reshape(N, C, HW)                       # lane axis = H*W (lane-dense)
    w_flat = conv_w.reshape(-1).astype(jnp.float32)    # (98,): avg weights then max weights

    # Host-precomputed boundary masks standing in for the conv's zero padding.
    pos = jnp.arange(HW, dtype=jnp.int32)
    row, col = pos // W, pos % W
    row_m = jnp.stack([(row + (k - PAD) >= 0) & (row + (k - PAD) < H)
                       for k in range(KSIZE)]).astype(jnp.float32)
    col_m = jnp.stack([(col + (k - PAD) >= 0) & (col + (k - PAD) < W)
                       for k in range(KSIZE)]).astype(jnp.float32)
    masks = jnp.concatenate([row_m, col_m], axis=0)    # (14, HW) f32

    vmem_limit, budget, two_tc = _tpu_vmem_env()
    bb, cb = _pick_blocks(N, C, HW, x_flat.dtype.itemsize, jnp.dtype(out_dtype).itemsize,
                          budget, two_tc)
    use_xlu_roll = (HW % 128 == 0) and _xlu_roll_ok()

    kernel = functools.partial(spatial_attention_kernel, H=H, W=W, C=C,
                               use_xlu_roll=use_xlu_roll)
    flops = N * HW * (2 * C + 4 * KSIZE * KSIZE)       # channel reduce + 2-ch conv MACs
    bytes_accessed = (N * C * HW * x_flat.dtype.itemsize
                      + N * HW * jnp.dtype(out_dtype).itemsize
                      + masks.size * 4 + w_flat.size * 4)

    out = pl.pallas_call(
        kernel,
        out_shape=jax.ShapeDtypeStruct((N, HW), out_dtype),
        grid=(N // bb, C // cb),
        in_specs=[
            pl.BlockSpec(memory_space=pltpu.MemorySpace.SMEM),      # conv weights (98,)
            pl.BlockSpec((2 * KSIZE, HW), lambda n, c: (0, 0)),     # boundary masks (const)
            pl.BlockSpec((bb, cb, HW), lambda n, c: (n, c, 0)),     # input tile
        ],
        out_specs=pl.BlockSpec((bb, HW), lambda n, c: (n, 0)),
        scratch_shapes=[pltpu.VMEM((bb, HW), jnp.float32),          # running channel sum
                        pltpu.VMEM((bb, HW), jnp.float32)],         # running channel max
        compiler_params=pltpu.CompilerParams(
            dimension_semantics=("parallel", "arbitrary"),
            vmem_limit_bytes=vmem_limit),
        cost_estimate=pl.CostEstimate(flops=flops, transcendentals=N * HW,
                                      bytes_accessed=bytes_accessed),
    )(w_flat, masks, x_flat)
    return out.reshape(N, 1, H, W)


# --------------------------------------------------------------------------- #
# Pure-JAX reference (mirrors the PyTorch forward) + self-test
# --------------------------------------------------------------------------- #
def _reference(x, conv_w):
    avg = jnp.mean(x, axis=1, keepdims=True)
    mx = jnp.max(x, axis=1, keepdims=True)
    cat = jnp.concatenate([avg, mx], axis=1)           # (N, 2, H, W)
    y = jax.lax.conv_general_dilated(
        cat, conv_w, window_strides=(1, 1), padding=((PAD, PAD), (PAD, PAD)),
        dimension_numbers=("NCHW", "OIHW", "NCHW"))
    return jax.nn.sigmoid(y)


if __name__ == "__main__":
    key = jax.random.PRNGKey(0)
    kx, kw = jax.random.split(key)

    N, C, H, W = 2, 4, 16, 16
    x = jax.random.normal(kx, (N, C, H, W), dtype=jnp.float32)

    # Deterministic synthetic conv weight (nn.Conv2d(2, 1, 7, bias=False) shape).
    fan_in = 2 * KSIZE * KSIZE
    bound = 1.0 / (fan_in ** 0.5)
    conv_w = jax.random.uniform(kw, (1, 2, KSIZE, KSIZE), jnp.float32,
                                minval=-bound, maxval=bound)

    out = jax.block_until_ready(spatial_attention(x, conv_w))

    ref = _reference(x, conv_w)
    assert out.shape == (N, 1, H, W)
    assert out.dtype == x.dtype
    assert jnp.allclose(out, ref.astype(out.dtype), atol=1e-5, rtol=1e-5), "mismatch vs reference"

    print("KERNEL_OK")
</pallas_src>

<mosaic_0001>
module attributes {stable_mosaic.version = 11 : i64} {
  func.func @probe(%arg0: memref<8x256xf32, #tpu.memory_space<vmem>>, %arg1: memref<8x256xf32, #tpu.memory_space<vmem>>) attributes {dimension_semantics = [], scalar_prefetch = 0 : i64, scratch_operands = 0 : i64, tpu.core_type = #tpu.core_type<tc>} {
    %c0 = arith.constant 0 : index
    %c0_0 = arith.constant 0 : index
    %0 = vector.load %arg0[%c0, %c0_0] : memref<8x256xf32, #tpu.memory_space<vmem>>, vector<8x256xf32>
    %c3_i32 = arith.constant 3 : i32
    %1 = tpu.dynamic_rotate %0 by %c3_i32 dim 1 : vector<8x256xf32>, i32 -> vector<8x256xf32>
    %c130_i32 = arith.constant 130 : i32
    %2 = tpu.dynamic_rotate %1 by %c130_i32 dim 1 : vector<8x256xf32>, i32 -> vector<8x256xf32>
    %c0_1 = arith.constant 0 : index
    %c0_2 = arith.constant 0 : index
    %3 = vector.load %arg1[%c0_1, %c0_2] : memref<8x256xf32, #tpu.memory_space<vmem>>, vector<8x256xf32>
    tpu.vector_store %arg1[%c0_1, %c0_2], %2 {strides = array<i32>} : memref<8x256xf32, #tpu.memory_space<vmem>>, vector<8x256xf32>,
    return
  }
}

module attributes {stable_mosaic.version = 11 : i64} {
  func.func @spatial_attention_kernel(%arg0: i32, %arg1: i32, %arg2: memref<98xf32, #tpu.memory_space<smem>>, %arg3: memref<14x256xf32, #tpu.memory_space<vmem>>, %arg4: memref<2x4x256xf32, #tpu.memory_space<vmem>>, %arg5: memref<2x256xf32, #tpu.memory_space<vmem>>, %arg6: memref<2x256xf32, #tpu.memory_space<vmem>>, %arg7: memref<2x256xf32, #tpu.memory_space<vmem>>) attributes {dimension_semantics = [#tpu.dimension_semantics<parallel>, #tpu.dimension_semantics<arbitrary>], iteration_bounds = array<i64: 1, 1>, scalar_prefetch = 0 : i64, scratch_operands = 2 : i64, tpu.core_type = #tpu.core_type<tc>, window_params = [{transform_indices = @transform_0, window_bounds = array<i64: 98>}, {pipeline_mode = #tpu.pipeline_mode<synchronous>, transform_indices = @transform_1, window_bounds = array<i64: 14, 256>}, {transform_indices = @transform_2, window_bounds = array<i64: 2, 4, 256>}, {transform_indices = @transform_3, window_bounds = array<i64: 2, 256>}]} {
    %c0 = arith.constant 0 : index
    %c0_0 = arith.constant 0 : index
    %c0_1 = arith.constant 0 : index
    %0 = vector.load %arg4[%c0, %c0_0, %c0_1] : memref<2x4x256xf32, #tpu.memory_space<vmem>>, vector<2x4x256xf32>
    %cst = arith.constant dense<0.000000e+00> : vector<2x256xf32>
    %1 = vector.multi_reduction <add>, %0, %cst [1] : vector<2x4x256xf32> to vector<2x256xf32>
    %cst_2 = arith.constant dense<0xFF800000> : vector<2x256xf32>
    %2 = vector.multi_reduction <maximumf>, %0, %cst_2 [1] : vector<2x4x256xf32> to vector<2x256xf32>
    %c0_i32 = arith.constant 0 : i32
    %3 = arith.cmpi eq, %arg1, %c0_i32 : i32
    %4 = arith.extui %3 : i1 to i32
    %c0_i32_3 = arith.constant 0 : i32
    %5 = arith.cmpi ne, %4, %c0_i32_3 : i32
    scf.if %5 {
      %c0_8 = arith.constant 0 : index
      %c0_9 = arith.constant 0 : index
      %12 = vector.load %arg6[%c0_8, %c0_9] : memref<2x256xf32, #tpu.memory_space<vmem>>, vector<2x256xf32>
      tpu.vector_store %arg6[%c0_8, %c0_9], %1 {strides = array<i32>} : memref<2x256xf32, #tpu.memory_space<vmem>>, vector<2x256xf32>,
      %c0_10 = arith.constant 0 : index
      %c0_11 = arith.constant 0 : index
      %13 = vector.load %arg7[%c0_10, %c0_11] : memref<2x256xf32, #tpu.memory_space<vmem>>, vector<2x256xf32>
      tpu.vector_store %arg7[%c0_10, %c0_11], %2 {strides = array<i32>} : memref<2x256xf32, #tpu.memory_space<vmem>>, vector<2x256xf32>,
    } else {
    }
    %c0_i32_4 = arith.constant 0 : i32
    %6 = arith.cmpi sgt, %arg1, %c0_i32_4 : i32
    %7 = arith.extui %6 : i1 to i32
    %c0_i32_5 = arith.constant 0 : i32
    %8 = arith.cmpi ne, %7, %c0_i32_5 : i32
    scf.if %8 {
      %c0_8 = arith.constant 0 : index
      %c0_9 = arith.constant 0 : index
      %12 = vector.load %arg6[%c0_8, %c0_9] : memref<2x256xf32, #tpu.memory_space<vmem>>, vector<2x256xf32>
      %13 = arith.addf %12, %1 : vector<2x256xf32>
      %c0_10 = arith.constant 0 : index
      %c0_11 = arith.constant 0 : index
      %14 = vector.load %arg6[%c0_10, %c0_11] : memref<2x256xf32, #tpu.memory_space<vmem>>, vector<2x256xf32>
      tpu.vector_store %arg6[%c0_10, %c0_11], %13 {strides = array<i32>} : memref<2x256xf32, #tpu.memory_space<vmem>>, vector<2x256xf32>,
      %c0_12 = arith.constant 0 : index
      %c0_13 = arith.constant 0 : index
      %15 = vector.load %arg7[%c0_12, %c0_13] : memref<2x256xf32, #tpu.memory_space<vmem>>, vector<2x256xf32>
      %16 = arith.maximumf %15, %2 : vector<2x256xf32>
      %c0_14 = arith.constant 0 : index
      %c0_15 = arith.constant 0 : index
      %17 = vector.load %arg7[%c0_14, %c0_15] : memref<2x256xf32, #tpu.memory_space<vmem>>, vector<2x256xf32>
      tpu.vector_store %arg7[%c0_14, %c0_15], %16 {strides = array<i32>} : memref<2x256xf32, #tpu.memory_space<vmem>>, vector<2x256xf32>,
    } else {
    }
    %c0_i32_6 = arith.constant 0 : i32
    %9 = arith.cmpi eq, %arg1, %c0_i32_6 : i32
    %10 = arith.extui %9 : i1 to i32
    %c0_i32_7 = arith.constant 0 : i32
    %11 = arith.cmpi ne, %10, %c0_i32_7 : i32
    scf.if %11 {
      %c0_8 = arith.constant 0 : index
      %c0_9 = arith.constant 0 : index
      %12 = vector.load %arg6[%c0_8, %c0_9] : memref<2x256xf32, #tpu.memory_space<vmem>>, vector<2x256xf32>
      %cst_10 = arith.constant 2.500000e-01 : f32
      %13 = vector.broadcast %cst_10 : f32 to vector<2x256xf32>
      %14 = arith.mulf %12, %13 : vector<2x256xf32>
      %c0_11 = arith.constant 0 : index
      %c0_12 = arith.constant 0 : index
      %15 = vector.load %arg7[%c0_11, %c0_12] : memref<2x256xf32, #tpu.memory_space<vmem>>, vector<2x256xf32>
      %c0_13 = arith.constant 0 : index
      %c0_14 = arith.constant 0 : index
      %16 = vector.load %arg3[%c0_13, %c0_14] : memref<14x256xf32, #tpu.memory_space<vmem>>, vector<1x256xf32>
      %cst_15 = arith.constant 0.000000e+00 : f32
      %17 = vector.broadcast %cst_15 : f32 to vector<1x256xf32>
      %18 = arith.cmpf one, %16, %17 : vector<1x256xf32>
      %c1 = arith.constant 1 : index
      %c0_16 = arith.constant 0 : index
      %19 = vector.load %arg3[%c1, %c0_16] : memref<14x256xf32, #tpu.memory_space<vmem>>, vector<1x256xf32>
      %cst_17 = arith.constant 0.000000e+00 : f32
      %20 = vector.broadcast %cst_17 : f32 to vector<1x256xf32>
      %21 = arith.cmpf one, %19, %20 : vector<1x256xf32>
      %c2 = arith.constant 2 : index
      %c0_18 = arith.constant 0 : index
      %22 = vector.load %arg3[%c2, %c0_18] : memref<14x256xf32, #tpu.memory_space<vmem>>, vector<1x256xf32>
      %cst_19 = arith.constant 0.000000e+00 : f32
      %23 = vector.broadcast %cst_19 : f32 to vector<1x256xf32>
      %24 = arith.cmpf one, %22, %23 : vector<1x256xf32>
      %c4 = arith.constant 4 : index
      %c0_20 = arith.constant 0 : index
      %25 = vector.load %arg3[%c4, %c0_20] : memref<14x256xf32, #tpu.memory_space<vmem>>, vector<1x256xf32>
      %cst_21 = arith.constant 0.000000e+00 : f32
      %26 = vector.broadcast %cst_21 : f32 to vector<1x256xf32>
      %27 = arith.cmpf one, %25, %26 : vector<1x256xf32>
      %c5 = arith.constant 5 : index
      %c0_22 = arith.constant 0 : index
      %28 = vector.load %arg3[%c5, %c0_22] : memref<14x256xf32, #tpu.memory_space<vmem>>, vector<1x256xf32>
      %cst_23 = arith.constant 0.000000e+00 : f32
      %29 = vector.broadcast %cst_23 : f32 to vector<1x256xf32>
      %30 = arith.cmpf one, %28, %29 : vector<1x256xf32>
      %c6 = arith.constant 6 : index
      %c0_24 = arith.constant 0 : index
      %31 = vector.load %arg3[%c6, %c0_24] : memref<14x256xf32, #tpu.memory_space<vmem>>, vector<1x256xf32>
      %cst_25 = arith.constant 0.000000e+00 : f32
      %32 = vector.broadcast %cst_25 : f32 to vector<1x256xf32>
      %33 = arith.cmpf one, %31, %32 : vector<1x256xf32>
      %c7 = arith.constant 7 : index
      %c0_26 = arith.constant 0 : index
      %34 = vector.load %arg3[%c7, %c0_26] : memref<14x256xf32, #tpu.memory_space<vmem>>, vector<1x256xf32>
      %cst_27 = arith.constant 0.000000e+00 : f32
      %35 = vector.broadcast %cst_27 : f32 to vector<1x256xf32>
      %36 = arith.cmpf one, %34, %35 : vector<1x256xf32>
      %c8 = arith.constant 8 : index
      %c0_28 = arith.constant 0 : index
      %37 = vector.load %arg3[%c8, %c0_28] : memref<14x256xf32, #tpu.memory_space<vmem>>, vector<1x256xf32>
      %cst_29 = arith.constant 0.000000e+00 : f32
      %38 = vector.broadcast %cst_29 : f32 to vector<1x256xf32>
      %39 = arith.cmpf one, %37, %38 : vector<1x256xf32>
      %c9 = arith.constant 9 : index
      %c0_30 = arith.constant 0 : index
      %40 = vector.load %arg3[%c9, %c0_30] : memref<14x256xf32, #tpu.memory_space<vmem>>, vector<1x256xf32>
      %cst_31 = arith.constant 0.000000e+00 : f32
      %41 = vector.broadcast %cst_31 : f32 to vector<1x256xf32>
      %42 = arith.cmpf one, %40, %41 : vector<1x256xf32>
      %c11 = arith.constant 11 : index
      %c0_32 = arith.constant 0 : index
      %43 = vector.load %arg3[%c11, %c0_32] : memref<14x256xf32, #tpu.memory_space<vmem>>, vector<1x256xf32>
      %cst_33 = arith.constant 0.000000e+00 : f32
      %44 = vector.broadcast %cst_33 : f32 to vector<1x256xf32>
      %45 = arith.cmpf one, %43, %44 : vector<1x256xf32>
      %c12 = arith.constant 12 : index
      %c0_34 = arith.constant 0 : index
      %46 = vector.load %arg3[%c12, %c0_34] : memref<14x256xf32, #tpu.memory_space<vmem>>, vector<1x256xf32>
      %cst_35 = arith.constant 0.000000e+00 : f32
      %47 = vector.broadcast %cst_35 : f32 to vector<1x256xf32>
      %48 = arith.cmpf one, %46, %47 : vector<1x256xf32>
      %c13 = arith.constant 13 : index
      %c0_36 = arith.constant 0 : index
      %49 = vector.load %arg3[%c13, %c0_36] : memref<14x256xf32, #tpu.memory_space<vmem>>, vector<1x256xf32>
      %cst_37 = arith.constant 0.000000e+00 : f32
      %50 = vector.broadcast %cst_37 : f32 to vector<1x256xf32>
      %51 = arith.cmpf one, %49, %50 : vector<1x256xf32>
      %cst_38 = arith.constant 0.000000e+00 : f32
      %52 = vector.broadcast %cst_38 : f32 to vector<2x256xf32>
      %53 = vector.extract_strided_slice %14 {offsets = [0, 208], sizes = [2, 48], strides = [1, 1]} : vector<2x256xf32> to vector<2x48xf32>
      %54 = vector.extract_strided_slice %14 {offsets = [0, 0], sizes = [2, 208], strides = [1, 1]} : vector<2x256xf32> to vector<2x208xf32>
      %55 = tpu.concatenate %53, %54 in 1 : vector<2x48xf32>, vector<2x208xf32> -> vector<2x256xf32>
      %cst_39 = arith.constant 0.000000e+00 : f32
      %56 = vector.shape_cast %18 : vector<1x256xi1> to vector<1x256xi1>
      %57 = vector.broadcast %56 : vector<1x256xi1> to vector<2x256xi1>
      %58 = vector.broadcast %cst_39 : f32 to vector<2x256xf32>
      %59 = arith.select %57, %55, %58 : vector<2x256xi1>, vector<2x256xf32>
      %60 = vector.extract_strided_slice %14 {offsets = [0, 224], sizes = [2, 32], strides = [1, 1]} : vector<2x256xf32> to vector<2x32xf32>
      %61 = vector.extract_strided_slice %14 {offsets = [0, 0], sizes = [2, 224], strides = [1, 1]} : vector<2x256xf32> to vector<2x224xf32>
      %62 = tpu.concatenate %60, %61 in 1 : vector<2x32xf32>, vector<2x224xf32> -> vector<2x256xf32>
      %cst_40 = arith.constant 0.000000e+00 : f32
      %63 = vector.shape_cast %21 : vector<1x256xi1> to vector<1x256xi1>
      %64 = vector.broadcast %63 : vector<1x256xi1> to vector<2x256xi1>
      %65 = vector.broadcast %cst_40 : f32 to vector<2x256xf32>
      %66 = arith.select %64, %62, %65 : vector<2x256xi1>, vector<2x256xf32>
      %67 = vector.extract_strided_slice %14 {offsets = [0, 240], sizes = [2, 16], strides = [1, 1]} : vector<2x256xf32> to vector<2x16xf32>
      %68 = vector.extract_strided_slice %14 {offsets = [0, 0], sizes = [2, 240], strides = [1, 1]} : vector<2x256xf32> to vector<2x240xf32>
      %69 = tpu.concatenate %67, %68 in 1 : vector<2x16xf32>, vector<2x240xf32> -> vector<2x256xf32>
      %cst_41 = arith.constant 0.000000e+00 : f32
      %70 = vector.shape_cast %24 : vector<1x256xi1> to vector<1x256xi1>
      %71 = vector.broadcast %70 : vector<1x256xi1> to vector<2x256xi1>
      %72 = vector.broadcast %cst_41 : f32 to vector<2x256xf32>
      %73 = arith.select %71, %69, %72 : vector<2x256xi1>, vector<2x256xf32>
      %74 = vector.extract_strided_slice %14 {offsets = [0, 16], sizes = [2, 240], strides = [1, 1]} : vector<2x256xf32> to vector<2x240xf32>
      %75 = vector.extract_strided_slice %14 {offsets = [0, 0], sizes = [2, 16], strides = [1, 1]} : vector<2x256xf32> to vector<2x16xf32>
      %76 = tpu.concatenate %74, %75 in 1 : vector<2x240xf32>, vector<2x16xf32> -> vector<2x256xf32>
      %cst_42 = arith.constant 0.000000e+00 : f32
      %77 = vector.shape_cast %27 : vector<1x256xi1> to vector<1x256xi1>
      %78 = vector.broadcast %77 : vector<1x256xi1> to vector<2x256xi1>
      %79 = vector.broadcast %cst_42 : f32 to vector<2x256xf32>
      %80 = arith.select %78, %76, %79 : vector<2x256xi1>, vector<2x256xf32>
      %81 = vector.extract_strided_slice %14 {offsets = [0, 32], sizes = [2, 224], strides = [1, 1]} : vector<2x256xf32> to vector<2x224xf32>
      %82 = vector.extract_strided_slice %14 {offsets = [0, 0], sizes = [2, 32], strides = [1, 1]} : vector<2x256xf32> to vector<2x32xf32>
      %83 = tpu.concatenate %81, %82 in 1 : vector<2x224xf32>, vector<2x32xf32> -> vector<2x256xf32>
      %cst_43 = arith.constant 0.000000e+00 : f32
      %84 = vector.shape_cast %30 : vector<1x256xi1> to vector<1x256xi1>
      %85 = vector.broadcast %84 : vector<1x256xi1> to vector<2x256xi1>
      %86 = vector.broadcast %cst_43 : f32 to vector<2x256xf32>
      %87 = arith.select %85, %83, %86 : vector<2x256xi1>, vector<2x256xf32>
      %88 = vector.extract_strided_slice %14 {offsets = [0, 48], sizes = [2, 208], strides = [1, 1]} : vector<2x256xf32> to vector<2x208xf32>
      %89 = vector.extract_strided_slice %14 {offsets = [0, 0], sizes = [2, 48], strides = [1, 1]} : vector<2x256xf32> to vector<2x48xf32>
      %90 = tpu.concatenate %88, %89 in 1 : vector<2x208xf32>, vector<2x48xf32> -> vector<2x256xf32>
      %cst_44 = arith.constant 0.000000e+00 : f32
      %91 = vector.shape_cast %33 : vector<1x256xi1> to vector<1x256xi1>
      %92 = vector.broadcast %91 : vector<1x256xi1> to vector<2x256xi1>
      %93 = vector.broadcast %cst_44 : f32 to vector<2x256xf32>
      %94 = arith.select %92, %90, %93 : vector<2x256xi1>, vector<2x256xf32>
      %c0_45 = arith.constant 0 : index
      %95 = memref.load %arg2[%c0_45] : memref<98xf32, #tpu.memory_space<smem>>
      %96 = vector.broadcast %95 : f32 to vector<2x256xf32>
      %97 = arith.mulf %59, %96 : vector<2x256xf32>
      %c7_46 = arith.constant 7 : index
      %98 = memref.load %arg2[%c7_46] : memref<98xf32, #tpu.memory_space<smem>>
      %99 = vector.broadcast %98 : f32 to vector<2x256xf32>
      %100 = arith.mulf %66, %99 : vector<2x256xf32>
      %101 = arith.addf %97, %100 : vector<2x256xf32>
      %c14 = arith.constant 14 : index
      %102 = memref.load %arg2[%c14] : memref<98xf32, #tpu.memory_space<smem>>
      %103 = vector.broadcast %102 : f32 to vector<2x256xf32>
      %104 = arith.mulf %73, %103 : vector<2x256xf32>
      %105 = arith.addf %101, %104 : vector<2x256xf32>
      %c21 = arith.constant 21 : index
      %106 = memref.load %arg2[%c21] : memref<98xf32, #tpu.memory_space<smem>>
      %107 = vector.broadcast %106 : f32 to vector<2x256xf32>
      %108 = arith.mulf %14, %107 : vector<2x256xf32>
      %109 = arith.addf %105, %108 : vector<2x256xf32>
      %c28 = arith.constant 28 : index
      %110 = memref.load %arg2[%c28] : memref<98xf32, #tpu.memory_space<smem>>
      %111 = vector.broadcast %110 : f32 to vector<2x256xf32>
      %112 = arith.mulf %80, %111 : vector<2x256xf32>
      %113 = arith.addf %109, %112 : vector<2x256xf32>
      %c35 = arith.constant 35 : index
      %114 = memref.load %arg2[%c35] : memref<98xf32, #tpu.memory_space<smem>>
      %115 = vector.broadcast %114 : f32 to vector<2x256xf32>
      %116 = arith.mulf %87, %115 : vector<2x256xf32>
      %117 = arith.addf %113, %116 : vector<2x256xf32>
      %c42 = arith.constant 42 : index
      %118 = memref.load %arg2[%c42] : memref<98xf32, #tpu.memory_space<smem>>
      %119 = vector.broadcast %118 : f32 to vector<2x256xf32>
      %120 = arith.mulf %94, %119 : vector<2x256xf32>
      %121 = arith.addf %117, %120 : vector<2x256xf32>
      %122 = vector.extract_strided_slice %121 {offsets = [0, 253], sizes = [2, 3], strides = [1, 1]} : vector<2x256xf32> to vector<2x3xf32>
      %123 = vector.extract_strided_slice %121 {offsets = [0, 0], sizes = [2, 253], strides = [1, 1]} : vector<2x256xf32> to vector<2x253xf32>
      %124 = tpu.concatenate %122, %123 in 1 : vector<2x3xf32>, vector<2x253xf32> -> vector<2x256xf32>
      %cst_47 = arith.constant 0.000000e+00 : f32
      %125 = vector.shape_cast %36 : vector<1x256xi1> to vector<1x256xi1>
      %126 = vector.broadcast %125 : vector<1x256xi1> to vector<2x256xi1>
      %127 = vector.broadcast %cst_47 : f32 to vector<2x256xf32>
      %128 = arith.select %126, %124, %127 : vector<2x256xi1>, vector<2x256xf32>
      %129 = arith.addf %52, %128 : vector<2x256xf32>
      %c1_48 = arith.constant 1 : index
      %130 = memref.load %arg2[%c1_48] : memref<98xf32, #tpu.memory_space<smem>>
      %131 = vector.broadcast %130 : f32 to vector<2x256xf32>
      %132 = arith.mulf %59, %131 : vector<2x256xf32>
      %c8_49 = arith.constant 8 : index
      %133 = memref.load %arg2[%c8_49] : memref<98xf32, #tpu.memory_space<smem>>
      %134 = vector.broadcast %133 : f32 to vector<2x256xf32>
      %135 = arith.mulf %66, %134 : vector<2x256xf32>
      %136 = arith.addf %132, %135 : vector<2x256xf32>
      %c15 = arith.constant 15 : index
      %137 = memref.load %arg2[%c15] : memref<98xf32, #tpu.memory_space<smem>>
      %138 = vector.broadcast %137 : f32 to vector<2x256xf32>
      %139 = arith.mulf %73, %138 : vector<2x256xf32>
      %140 = arith.addf %136, %139 : vector<2x256xf32>
      %c22 = arith.constant 22 : index
      %141 = memref.load %arg2[%c22] : memref<98xf32, #tpu.memory_space<smem>>
      %142 = vector.broadcast %141 : f32 to vector<2x256xf32>
      %143 = arith.mulf %14, %142 : vector<2x256xf32>
      %144 = arith.addf %140, %143 : vector<2x256xf32>
      %c29 = arith.constant 29 : index
      %145 = memref.load %arg2[%c29] : memref<98xf32, #tpu.memory_space<smem>>
      %146 = vector.broadcast %145 : f32 to vector<2x256xf32>
      %147 = arith.mulf %80, %146 : vector<2x256xf32>
      %148 = arith.addf %144, %147 : vector<2x256xf32>
      %c36 = arith.constant 36 : index
      %149 = memref.load %arg2[%c36] : memref<98xf32, #tpu.memory_space<smem>>
      %150 = vector.broadcast %149 : f32 to vector<2x256xf32>
      %151 = arith.mulf %87, %150 : vector<2x256xf32>
      %152 = arith.addf %148, %151 : vector<2x256xf32>
      %c43 = arith.constant 43 : index
      %153 = memref.load %arg2[%c43] : memref<98xf32, #tpu.memory_space<smem>>
      %154 = vector.broadcast %153 : f32 to vector<2x256xf32>
      %155 = arith.mulf %94, %154 : vector<2x256xf32>
      %156 = arith.addf %152, %155 : vector<2x256xf32>
      %157 = vector.extract_strided_slice %156 {offsets = [0, 254], sizes = [2, 2], strides = [1, 1]} : vector<2x256xf32> to vector<2x2xf32>
      %158 = vector.extract_strided_slice %156 {offsets = [0, 0], sizes = [2, 254], strides = [1, 1]} : vector<2x256xf32> to vector<2x254xf32>
      %159 = tpu.concatenate %157, %158 in 1 : vector<2x2xf32>, vector<2x254xf32> -> vector<2x256xf32>
      %cst_50 = arith.constant 0.000000e+00 : f32
      %160 = vector.shape_cast %39 : vector<1x256xi1> to vector<1x256xi1>
      %161 = vector.broadcast %160 : vector<1x256xi1> to vector<2x256xi1>
      %162 = vector.broadcast %cst_50 : f32 to vector<2x256xf32>
      %163 = arith.select %161, %159, %162 : vector<2x256xi1>, vector<2x256xf32>
      %164 = arith.addf %129, %163 : vector<2x256xf32>
      %c2_51 = arith.constant 2 : index
      %165 = memref.load %arg2[%c2_51] : memref<98xf32, #tpu.memory_space<smem>>
      %166 = vector.broadcast %165 : f32 to vector<2x256xf32>
      %167 = arith.mulf %59, %166 : vector<2x256xf32>
      %c9_52 = arith.constant 9 : index
      %168 = memref.load %arg2[%c9_52] : memref<98xf32, #tpu.memory_space<smem>>
      %169 = vector.broadcast %168 : f32 to vector<2x256xf32>
      %170 = arith.mulf %66, %169 : vector<2x256xf32>
      %171 = arith.addf %167, %170 : vector<2x256xf32>
      %c16 = arith.constant 16 : index
      %172 = memref.load %arg2[%c16] : memref<98xf32, #tpu.memory_space<smem>>
      %173 = vector.broadcast %172 : f32 to vector<2x256xf32>
      %174 = arith.mulf %73, %173 : vector<2x256xf32>
      %175 = arith.addf %171, %174 : vector<2x256xf32>
      %c23 = arith.constant 23 : index
      %176 = memref.load %arg2[%c23] : memref<98xf32, #tpu.memory_space<smem>>
      %177 = vector.broadcast %176 : f32 to vector<2x256xf32>
      %178 = arith.mulf %14, %177 : vector<2x256xf32>
      %179 = arith.addf %175, %178 : vector<2x256xf32>
      %c30 = arith.constant 30 : index
      %180 = memref.load %arg2[%c30] : memref<98xf32, #tpu.memory_space<smem>>
      %181 = vector.broadcast %180 : f32 to vector<2x256xf32>
      %182 = arith.mulf %80, %181 : vector<2x256xf32>
      %183 = arith.addf %179, %182 : vector<2x256xf32>
      %c37 = arith.constant 37 : index
      %184 = memref.load %arg2[%c37] : memref<98xf32, #tpu.memory_space<smem>>
      %185 = vector.broadcast %184 : f32 to vector<2x256xf32>
      %186 = arith.mulf %87, %185 : vector<2x256xf32>
      %187 = arith.addf %183, %186 : vector<2x256xf32>
      %c44 = arith.constant 44 : index
      %188 = memref.load %arg2[%c44] : memref<98xf32, #tpu.memory_space<smem>>
      %189 = vector.broadcast %188 : f32 to vector<2x256xf32>
      %190 = arith.mulf %94, %189 : vector<2x256xf32>
      %191 = arith.addf %187, %190 : vector<2x256xf32>
      %192 = vector.extract_strided_slice %191 {offsets = [0, 255], sizes = [2, 1], strides = [1, 1]} : vector<2x256xf32> to vector<2x1xf32>
      %193 = vector.extract_strided_slice %191 {offsets = [0, 0], sizes = [2, 255], strides = [1, 1]} : vector<2x256xf32> to vector<2x255xf32>
      %194 = tpu.concatenate %192, %193 in 1 : vector<2x1xf32>, vector<2x255xf32> -> vector<2x256xf32>
      %cst_53 = arith.constant 0.000000e+00 : f32
      %195 = vector.shape_cast %42 : vector<1x256xi1> to vector<1x256xi1>
      %196 = vector.broadcast %195 : vector<1x256xi1> to vector<2x256xi1>
      %197 = vector.broadcast %cst_53 : f32 to vector<2x256xf32>
      %198 = arith.select %196, %194, %197 : vector<2x256xi1>, vector<2x256xf32>
      %199 = arith.addf %164, %198 : vector<2x256xf32>
      %c3 = arith.constant 3 : index
      %200 = memref.load %arg2[%c3] : memref<98xf32, #tpu.memory_space<smem>>
      %201 = vector.broadcast %200 : f32 to vector<2x256xf32>
      %202 = arith.mulf %59, %201 : vector<2x256xf32>
      %c10 = arith.constant 10 : index
      %203 = memref.load %arg2[%c10] : memref<98xf32, #tpu.memory_space<smem>>
      %204 = vector.broadcast %203 : f32 to vector<2x256xf32>
      %205 = arith.mulf %66, %204 : vector<2x256xf32>
      %206 = arith.addf %202, %205 : vector<2x256xf32>
      %c17 = arith.constant 17 : index
      %207 = memref.load %arg2[%c17] : memref<98xf32, #tpu.memory_space<smem>>
      %208 = vector.broadcast %207 : f32 to vector<2x256xf32>
      %209 = arith.mulf %73, %208 : vector<2x256xf32>
      %210 = arith.addf %206, %209 : vector<2x256xf32>
      %c24 = arith.constant 24 : index
      %211 = memref.load %arg2[%c24] : memref<98xf32, #tpu.memory_space<smem>>
      %212 = vector.broadcast %211 : f32 to vector<2x256xf32>
      %213 = arith.mulf %14, %212 : vector<2x256xf32>
      %214 = arith.addf %210, %213 : vector<2x256xf32>
      %c31 = arith.constant 31 : index
      %215 = memref.load %arg2[%c31] : memref<98xf32, #tpu.memory_space<smem>>
      %216 = vector.broadcast %215 : f32 to vector<2x256xf32>
      %217 = arith.mulf %80, %216 : vector<2x256xf32>
      %218 = arith.addf %214, %217 : vector<2x256xf32>
      %c38 = arith.constant 38 : index
      %219 = memref.load %arg2[%c38] : memref<98xf32, #tpu.memory_space<smem>>
      %220 = vector.broadcast %219 : f32 to vector<2x256xf32>
      %221 = arith.mulf %87, %220 : vector<2x256xf32>
      %222 = arith.addf %218, %221 : vector<2x256xf32>
      %c45 = arith.constant 45 : index
      %223 = memref.load %arg2[%c45] : memref<98xf32, #tpu.memory_space<smem>>
      %224 = vector.broadcast %223 : f32 to vector<2x256xf32>
      %225 = arith.mulf %94, %224 : vector<2x256xf32>
      %226 = arith.addf %222, %225 : vector<2x256xf32>
      %227 = arith.addf %199, %226 : vector<2x256xf32>
      %c4_54 = arith.constant 4 : index
      %228 = memref.load %arg2[%c4_54] : memref<98xf32, #tpu.memory_space<smem>>
      %229 = vector.broadcast %228 : f32 to vector<2x256xf32>
      %230 = arith.mulf %59, %229 : vector<2x256xf32>
      %c11_55 = arith.constant 11 : index
      %231 = memref.load %arg2[%c11_55] : memref<98xf32, #tpu.memory_space<smem>>
      %232 = vector.broadcast %231 : f32 to vector<2x256xf32>
      %233 = arith.mulf %66, %232 : vector<2x256xf32>
      %234 = arith.addf %230, %233 : vector<2x256xf32>
      %c18 = arith.constant 18 : index
      %235 = memref.load %arg2[%c18] : memref<98xf32, #tpu.memory_space<smem>>
      %236 = vector.broadcast %235 : f32 to vector<2x256xf32>
      %237 = arith.mulf %73, %236 : vector<2x256xf32>
      %238 = arith.addf %234, %237 : vector<2x256xf32>
      %c25 = arith.constant 25 : index
      %239 = memref.load %arg2[%c25] : memref<98xf32, #tpu.memory_space<smem>>
      %240 = vector.broadcast %239 : f32 to vector<2x256xf32>
      %241 = arith.mulf %14, %240 : vector<2x256xf32>
      %242 = arith.addf %238, %241 : vector<2x256xf32>
      %c32 = arith.constant 32 : index
      %243 = memref.load %arg2[%c32] : memref<98xf32, #tpu.memory_space<smem>>
      %244 = vector.broadcast %243 : f32 to vector<2x256xf32>
      %245 = arith.mulf %80, %244 : vector<2x256xf32>
      %246 = arith.addf %242, %245 : vector<2x256xf32>
      %c39 = arith.constant 39 : index
      %247 = memref.load %arg2[%c39] : memref<98xf32, #tpu.memory_space<smem>>
      %248 = vector.broadcast %247 : f32 to vector<2x256xf32>
      %249 = arith.mulf %87, %248 : vector<2x256xf32>
      %250 = arith.addf %246, %249 : vector<2x256xf32>
      %c46 = arith.constant 46 : index
      %251 = memref.load %arg2[%c46] : memref<98xf32, #tpu.memory_space<smem>>
      %252 = vector.broadcast %251 : f32 to vector<2x256xf32>
      %253 = arith.mulf %94, %252 : vector<2x256xf32>
      %254 = arith.addf %250, %253 : vector<2x256xf32>
      %255 = vector.extract_strided_slice %254 {offsets = [0, 1], sizes = [2, 255], strides = [1, 1]} : vector<2x256xf32> to vector<2x255xf32>
      %256 = vector.extract_strided_slice %254 {offsets = [0, 0], sizes = [2, 1], strides = [1, 1]} : vector<2x256xf32> to vector<2x1xf32>
      %257 = tpu.concatenate %255, %256 in 1 : vector<2x255xf32>, vector<2x1xf32> -> vector<2x256xf32>
      %cst_56 = arith.constant 0.000000e+00 : f32
      %258 = vector.shape_cast %45 : vector<1x256xi1> to vector<1x256xi1>
      %259 = vector.broadcast %258 : vector<1x256xi1> to vector<2x256xi1>
      %260 = vector.broadcast %cst_56 : f32 to vector<2x256xf32>
      %261 = arith.select %259, %257, %260 : vector<2x256xi1>, vector<2x256xf32>
      %262 = arith.addf %227, %261 : vector<2x256xf32>
      %c5_57 = arith.constant 5 : index
      %263 = memref.load %arg2[%c5_57] : memref<98xf32, #tpu.memory_space<smem>>
      %264 = vector.broadcast %263 : f32 to vector<2x256xf32>
      %265 = arith.mulf %59, %264 : vector<2x256xf32>
      %c12_58 = arith.constant 12 : index
      %266 = memref.load %arg2[%c12_58] : memref<98xf32, #tpu.memory_space<smem>>
      %267 = vector.broadcast %266 : f32 to vector<2x256xf32>
      %268 = arith.mulf %66, %267 : vector<2x256xf32>
      %269 = arith.addf %265, %268 : vector<2x256xf32>
      %c19 = arith.constant 19 : index
      %270 = memref.load %arg2[%c19] : memref<98xf32, #tpu.memory_space<smem>>
      %271 = vector.broadcast %270 : f32 to vector<2x256xf32>
      %272 = arith.mulf %73, %271 : vector<2x256xf32>
      %273 = arith.addf %269, %272 : vector<2x256xf32>
      %c26 = arith.constant 26 : index
      %274 = memref.load %arg2[%c26] : memref<98xf32, #tpu.memory_space<smem>>
      %275 = vector.broadcast %274 : f32 to vector<2x256xf32>
      %276 = arith.mulf %14, %275 : vector<2x256xf32>
      %277 = arith.addf %273, %276 : vector<2x256xf32>
      %c33 = arith.constant 33 : index
      %278 = memref.load %arg2[%c33] : memref<98xf32, #tpu.memory_space<smem>>
      %279 = vector.broadcast %278 : f32 to vector<2x256xf32>
      %280 = arith.mulf %80, %279 : vector<2x256xf32>
      %281 = arith.addf %277, %280 : vector<2x256xf32>
      %c40 = arith.constant 40 : index
      %282 = memref.load %arg2[%c40] : memref<98xf32, #tpu.memory_space<smem>>
      %283 = vector.broadcast %282 : f32 to vector<2x256xf32>
      %284 = arith.mulf %87, %283 : vector<2x256xf32>
      %285 = arith.addf %281, %284 : vector<2x256xf32>
      %c47 = arith.constant 47 : index
      %286 = memref.load %arg2[%c47] : memref<98xf32, #tpu.memory_space<smem>>
      %287 = vector.broadcast %286 : f32 to vector<2x256xf32>
      %288 = arith.mulf %94, %287 : vector<2x256xf32>
      %289 = arith.addf %285, %288 : vector<2x256xf32>
      %290 = vector.extract_strided_slice %289 {offsets = [0, 2], sizes = [2, 254], strides = [1, 1]} : vector<2x256xf32> to vector<2x254xf32>
      %291 = vector.extract_strided_slice %289 {offsets = [0, 0], sizes = [2, 2], strides = [1, 1]} : vector<2x256xf32> to vector<2x2xf32>
      %292 = tpu.concatenate %290, %291 in 1 : vector<2x254xf32>, vector<2x2xf32> -> vector<2x256xf32>
      %cst_59 = arith.constant 0.000000e+00 : f32
      %293 = vector.shape_cast %48 : vector<1x256xi1> to vector<1x256xi1>
      %294 = vector.broadcast %293 : vector<1x256xi1> to vector<2x256xi1>
      %295 = vector.broadcast %cst_59 : f32 to vector<2x256xf32>
      %296 = arith.select %294, %292, %295 : vector<2x256xi1>, vector<2x256xf32>
      %297 = arith.addf %262, %296 : vector<2x256xf32>
      %c6_60 = arith.constant 6 : index
      %298 = memref.load %arg2[%c6_60] : memref<98xf32, #tpu.memory_space<smem>>
      %299 = vector.broadcast %298 : f32 to vector<2x256xf32>
      %300 = arith.mulf %59, %299 : vector<2x256xf32>
      %c13_61 = arith.constant 13 : index
      %301 = memref.load %arg2[%c13_61] : memref<98xf32, #tpu.memory_space<smem>>
      %302 = vector.broadcast %301 : f32 to vector<2x256xf32>
      %303 = arith.mulf %66, %302 : vector<2x256xf32>
      %304 = arith.addf %300, %303 : vector<2x256xf32>
      %c20 = arith.constant 20 : index
      %305 = memref.load %arg2[%c20] : memref<98xf32, #tpu.memory_space<smem>>
      %306 = vector.broadcast %305 : f32 to vector<2x256xf32>
      %307 = arith.mulf %73, %306 : vector<2x256xf32>
      %308 = arith.addf %304, %307 : vector<2x256xf32>
      %c27 = arith.constant 27 : index
      %309 = memref.load %arg2[%c27] : memref<98xf32, #tpu.memory_space<smem>>
      %310 = vector.broadcast %309 : f32 to vector<2x256xf32>
      %311 = arith.mulf %14, %310 : vector<2x256xf32>
      %312 = arith.addf %308, %311 : vector<2x256xf32>
      %c34 = arith.constant 34 : index
      %313 = memref.load %arg2[%c34] : memref<98xf32, #tpu.memory_space<smem>>
      %314 = vector.broadcast %313 : f32 to vector<2x256xf32>
      %315 = arith.mulf %80, %314 : vector<2x256xf32>
      %316 = arith.addf %312, %315 : vector<2x256xf32>
      %c41 = arith.constant 41 : index
      %317 = memref.load %arg2[%c41] : memref<98xf32, #tpu.memory_space<smem>>
      %318 = vector.broadcast %317 : f32 to vector<2x256xf32>
      %319 = arith.mulf %87, %318 : vector<2x256xf32>
      %320 = arith.addf %316, %319 : vector<2x256xf32>
      %c48 = arith.constant 48 : index
      %321 = memref.load %arg2[%c48] : memref<98xf32, #tpu.memory_space<smem>>
      %322 = vector.broadcast %321 : f32 to vector<2x256xf32>
      %323 = arith.mulf %94, %322 : vector<2x256xf32>
      %324 = arith.addf %320, %323 : vector<2x256xf32>
      %325 = vector.extract_strided_slice %324 {offsets = [0, 3], sizes = [2, 253], strides = [1, 1]} : vector<2x256xf32> to vector<2x253xf32>
      %326 = vector.extract_strided_slice %324 {offsets = [0, 0], sizes = [2, 3], strides = [1, 1]} : vector<2x256xf32> to vector<2x3xf32>
      %327 = tpu.concatenate %325, %326 in 1 : vector<2x253xf32>, vector<2x3xf32> -> vector<2x256xf32>
      %cst_62 = arith.constant 0.000000e+00 : f32
      %328 = vector.shape_cast %51 : vector<1x256xi1> to vector<1x256xi1>
      %329 = vector.broadcast %328 : vector<1x256xi1> to vector<2x256xi1>
      %330 = vector.broadcast %cst_62 : f32 to vector<2x256xf32>
      %331 = arith.select %329, %327, %330 : vector<2x256xi1>, vector<2x256xf32>
      %332 = arith.addf %297, %331 : vector<2x256xf32>
      %333 = vector.extract_strided_slice %15 {offsets = [0, 208], sizes = [2, 48], strides = [1, 1]} : vector<2x256xf32> to vector<2x48xf32>
      %334 = vector.extract_strided_slice %15 {offsets = [0, 0], sizes = [2, 208], strides = [1, 1]} : vector<2x256xf32> to vector<2x208xf32>
      %335 = tpu.concatenate %333, %334 in 1 : vector<2x48xf32>, vector<2x208xf32> -> vector<2x256xf32>
      %cst_63 = arith.constant 0.000000e+00 : f32
      %336 = vector.shape_cast %18 : vector<1x256xi1> to vector<1x256xi1>
      %337 = vector.broadcast %336 : vector<1x256xi1> to vector<2x256xi1>
      %338 = vector.broadcast %cst_63 : f32 to vector<2x256xf32>
      %339 = arith.select %337, %335, %338 : vector<2x256xi1>, vector<2x256xf32>
      %340 = vector.extract_strided_slice %15 {offsets = [0, 224], sizes = [2, 32], strides = [1, 1]} : vector<2x256xf32> to vector<2x32xf32>
      %341 = vector.extract_strided_slice %15 {offsets = [0, 0], sizes = [2, 224], strides = [1, 1]} : vector<2x256xf32> to vector<2x224xf32>
      %342 = tpu.concatenate %340, %341 in 1 : vector<2x32xf32>, vector<2x224xf32> -> vector<2x256xf32>
      %cst_64 = arith.constant 0.000000e+00 : f32
      %343 = vector.shape_cast %21 : vector<1x256xi1> to vector<1x256xi1>
      %344 = vector.broadcast %343 : vector<1x256xi1> to vector<2x256xi1>
      %345 = vector.broadcast %cst_64 : f32 to vector<2x256xf32>
      %346 = arith.select %344, %342, %345 : vector<2x256xi1>, vector<2x256xf32>
      %347 = vector.extract_strided_slice %15 {offsets = [0, 240], sizes = [2, 16], strides = [1, 1]} : vector<2x256xf32> to vector<2x16xf32>
      %348 = vector.extract_strided_slice %15 {offsets = [0, 0], sizes = [2, 240], strides = [1, 1]} : vector<2x256xf32> to vector<2x240xf32>
      %349 = tpu.concatenate %347, %348 in 1 : vector<2x16xf32>, vector<2x240xf32> -> vector<2x256xf32>
      %cst_65 = arith.constant 0.000000e+00 : f32
      %350 = vector.shape_cast %24 : vector<1x256xi1> to vector<1x256xi1>
      %351 = vector.broadcast %350 : vector<1x256xi1> to vector<2x256xi1>
      %352 = vector.broadcast %cst_65 : f32 to vector<2x256xf32>
      %353 = arith.select %351, %349, %352 : vector<2x256xi1>, vector<2x256xf32>
      %354 = vector.extract_strided_slice %15 {offsets = [0, 16], sizes = [2, 240], strides = [1, 1]} : vector<2x256xf32> to vector<2x240xf32>
      %355 = vector.extract_strided_slice %15 {offsets = [0, 0], sizes = [2, 16], strides = [1, 1]} : vector<2x256xf32> to vector<2x16xf32>
      %356 = tpu.concatenate %354, %355 in 1 : vector<2x240xf32>, vector<2x16xf32> -> vector<2x256xf32>
      %cst_66 = arith.constant 0.000000e+00 : f32
      %357 = vector.shape_cast %27 : vector<1x256xi1> to vector<1x256xi1>
      %358 = vector.broadcast %357 : vector<1x256xi1> to vector<2x256xi1>
      %359 = vector.broadcast %cst_66 : f32 to vector<2x256xf32>
      %360 = arith.select %358, %356, %359 : vector<2x256xi1>, vector<2x256xf32>
      %361 = vector.extract_strided_slice %15 {offsets = [0, 32], sizes = [2, 224], strides = [1, 1]} : vector<2x256xf32> to vector<2x224xf32>
      %362 = vector.extract_strided_slice %15 {offsets = [0, 0], sizes = [2, 32], strides = [1, 1]} : vector<2x256xf32> to vector<2x32xf32>
      %363 = tpu.concatenate %361, %362 in 1 : vector<2x224xf32>, vector<2x32xf32> -> vector<2x256xf32>
      %cst_67 = arith.constant 0.000000e+00 : f32
      %364 = vector.shape_cast %30 : vector<1x256xi1> to vector<1x256xi1>
      %365 = vector.broadcast %364 : vector<1x256xi1> to vector<2x256xi1>
      %366 = vector.broadcast %cst_67 : f32 to vector<2x256xf32>
      %367 = arith.select %365, %363, %366 : vector<2x256xi1>, vector<2x256xf32>
      %368 = vector.extract_strided_slice %15 {offsets = [0, 48], sizes = [2, 208], strides = [1, 1]} : vector<2x256xf32> to vector<2x208xf32>
      %369 = vector.extract_strided_slice %15 {offsets = [0, 0], sizes = [2, 48], strides = [1, 1]} : vector<2x256xf32> to vector<2x48xf32>
      %370 = tpu.concatenate %368, %369 in 1 : vector<2x208xf32>, vector<2x48xf32> -> vector<2x256xf32>
      %cst_68 = arith.constant 0.000000e+00 : f32
      %371 = vector.shape_cast %33 : vector<1x256xi1> to vector<1x256xi1>
      %372 = vector.broadcast %371 : vector<1x256xi1> to vector<2x256xi1>
      %373 = vector.broadcast %cst_68 : f32 to vector<2x256xf32>
      %374 = arith.select %372, %370, %373 : vector<2x256xi1>, vector<2x256xf32>
      %c49 = arith.constant 49 : index
      %375 = memref.load %arg2[%c49] : memref<98xf32, #tpu.memory_space<smem>>
      %376 = vector.broadcast %375 : f32 to vector<2x256xf32>
      %377 = arith.mulf %339, %376 : vector<2x256xf32>
      %c56 = arith.constant 56 : index
      %378 = memref.load %arg2[%c56] : memref<98xf32, #tpu.memory_space<smem>>
      %379 = vector.broadcast %378 : f32 to vector<2x256xf32>
      %380 = arith.mulf %346, %379 : vector<2x256xf32>
      %381 = arith.addf %377, %380 : vector<2x256xf32>
      %c63 = arith.constant 63 : index
      %382 = memref.load %arg2[%c63] : memref<98xf32, #tpu.memory_space<smem>>
      %383 = vector.broadcast %382 : f32 to vector<2x256xf32>
      %384 = arith.mulf %353, %383 : vector<2x256xf32>
      %385 = arith.addf %381, %384 : vector<2x256xf32>
      %c70 = arith.constant 70 : index
      %386 = memref.load %arg2[%c70] : memref<98xf32, #tpu.memory_space<smem>>
      %387 = vector.broadcast %386 : f32 to vector<2x256xf32>
      %388 = arith.mulf %15, %387 : vector<2x256xf32>
      %389 = arith.addf %385, %388 : vector<2x256xf32>
      %c77 = arith.constant 77 : index
      %390 = memref.load %arg2[%c77] : memref<98xf32, #tpu.memory_space<smem>>
      %391 = vector.broadcast %390 : f32 to vector<2x256xf32>
      %392 = arith.mulf %360, %391 : vector<2x256xf32>
      %393 = arith.addf %389, %392 : vector<2x256xf32>
      %c84 = arith.constant 84 : index
      %394 = memref.load %arg2[%c84] : memref<98xf32, #tpu.memory_space<smem>>
      %395 = vector.broadcast %394 : f32 to vector<2x256xf32>
      %396 = arith.mulf %367, %395 : vector<2x256xf32>
      %397 = arith.addf %393, %396 : vector<2x256xf32>
      %c91 = arith.constant 91 : index
      %398 = memref.load %arg2[%c91] : memref<98xf32, #tpu.memory_space<smem>>
      %399 = vector.broadcast %398 : f32 to vector<2x256xf32>
      %400 = arith.mulf %374, %399 : vector<2x256xf32>
      %401 = arith.addf %397, %400 : vector<2x256xf32>
      %402 = vector.extract_strided_slice %401 {offsets = [0, 253], sizes = [2, 3], strides = [1, 1]} : vector<2x256xf32> to vector<2x3xf32>
      %403 = vector.extract_strided_slice %401 {offsets = [0, 0], sizes = [2, 253], strides = [1, 1]} : vector<2x256xf32> to vector<2x253xf32>
      %404 = tpu.concatenate %402, %403 in 1 : vector<2x3xf32>, vector<2x253xf32> -> vector<2x256xf32>
      %cst_69 = arith.constant 0.000000e+00 : f32
      %405 = vector.shape_cast %36 : vector<1x256xi1> to vector<1x256xi1>
      %406 = vector.broadcast %405 : vector<1x256xi1> to vector<2x256xi1>
      %407 = vector.broadcast %cst_69 : f32 to vector<2x256xf32>
      %408 = arith.select %406, %404, %407 : vector<2x256xi1>, vector<2x256xf32>
      %409 = arith.addf %332, %408 : vector<2x256xf32>
      %c50 = arith.constant 50 : index
      %410 = memref.load %arg2[%c50] : memref<98xf32, #tpu.memory_space<smem>>
      %411 = vector.broadcast %410 : f32 to vector<2x256xf32>
      %412 = arith.mulf %339, %411 : vector<2x256xf32>
      %c57 = arith.constant 57 : index
      %413 = memref.load %arg2[%c57] : memref<98xf32, #tpu.memory_space<smem>>
      %414 = vector.broadcast %413 : f32 to vector<2x256xf32>
      %415 = arith.mulf %346, %414 : vector<2x256xf32>
      %416 = arith.addf %412, %415 : vector<2x256xf32>
      %c64 = arith.constant 64 : index
      %417 = memref.load %arg2[%c64] : memref<98xf32, #tpu.memory_space<smem>>
      %418 = vector.broadcast %417 : f32 to vector<2x256xf32>
      %419 = arith.mulf %353, %418 : vector<2x256xf32>
      %420 = arith.addf %416, %419 : vector<2x256xf32>
      %c71 = arith.constant 71 : index
      %421 = memref.load %arg2[%c71] : memref<98xf32, #tpu.memory_space<smem>>
      %422 = vector.broadcast %421 : f32 to vector<2x256xf32>
      %423 = arith.mulf %15, %422 : vector<2x256xf32>
      %424 = arith.addf %420, %423 : vector<2x256xf32>
      %c78 = arith.constant 78 : index
      %425 = memref.load %arg2[%c78] : memref<98xf32, #tpu.memory_space<smem>>
      %426 = vector.broadcast %425 : f32 to vector<2x256xf32>
      %427 = arith.mulf %360, %426 : vector<2x256xf32>
      %428 = arith.addf %424, %427 : vector<2x256xf32>
      %c85 = arith.constant 85 : index
      %429 = memref.load %arg2[%c85] : memref<98xf32, #tpu.memory_space<smem>>
      %430 = vector.broadcast %429 : f32 to vector<2x256xf32>
      %431 = arith.mulf %367, %430 : vector<2x256xf32>
      %432 = arith.addf %428, %431 : vector<2x256xf32>
      %c92 = arith.constant 92 : index
      %433 = memref.load %arg2[%c92] : memref<98xf32, #tpu.memory_space<smem>>
      %434 = vector.broadcast %433 : f32 to vector<2x256xf32>
      %435 = arith.mulf %374, %434 : vector<2x256xf32>
      %436 = arith.addf %432, %435 : vector<2x256xf32>
      %437 = vector.extract_strided_slice %436 {offsets = [0, 254], sizes = [2, 2], strides = [1, 1]} : vector<2x256xf32> to vector<2x2xf32>
      %438 = vector.extract_strided_slice %436 {offsets = [0, 0], sizes = [2, 254], strides = [1, 1]} : vector<2x256xf32> to vector<2x254xf32>
      %439 = tpu.concatenate %437, %438 in 1 : vector<2x2xf32>, vector<2x254xf32> -> vector<2x256xf32>
      %cst_70 = arith.constant 0.000000e+00 : f32
      %440 = vector.shape_cast %39 : vector<1x256xi1> to vector<1x256xi1>
      %441 = vector.broadcast %440 : vector<1x256xi1> to vector<2x256xi1>
      %442 = vector.broadcast %cst_70 : f32 to vector<2x256xf32>
      %443 = arith.select %441, %439, %442 : vector<2x256xi1>, vector<2x256xf32>
      %444 = arith.addf %409, %443 : vector<2x256xf32>
      %c51 = arith.constant 51 : index
      %445 = memref.load %arg2[%c51] : memref<98xf32, #tpu.memory_space<smem>>
      %446 = vector.broadcast %445 : f32 to vector<2x256xf32>
      %447 = arith.mulf %339, %446 : vector<2x256xf32>
      %c58 = arith.constant 58 : index
      %448 = memref.load %arg2[%c58] : memref<98xf32, #tpu.memory_space<smem>>
      %449 = vector.broadcast %448 : f32 to vector<2x256xf32>
      %450 = arith.mulf %346, %449 : vector<2x256xf32>
      %451 = arith.addf %447, %450 : vector<2x256xf32>
      %c65 = arith.constant 65 : index
      %452 = memref.load %arg2[%c65] : memref<98xf32, #tpu.memory_space<smem>>
      %453 = vector.broadcast %452 : f32 to vector<2x256xf32>
      %454 = arith.mulf %353, %453 : vector<2x256xf32>
      %455 = arith.addf %451, %454 : vector<2x256xf32>
      %c72 = arith.constant 72 : index
      %456 = memref.load %arg2[%c72] : memref<98xf32, #tpu.memory_space<smem>>
      %457 = vector.broadcast %456 : f32 to vector<2x256xf32>
      %458 = arith.mulf %15, %457 : vector<2x256xf32>
      %459 = arith.addf %455, %458 : vector<2x256xf32>
      %c79 = arith.constant 79 : index
      %460 = memref.load %arg2[%c79] : memref<98xf32, #tpu.memory_space<smem>>
      %461 = vector.broadcast %460 : f32 to vector<2x256xf32>
      %462 = arith.mulf %360, %461 : vector<2x256xf32>
      %463 = arith.addf %459, %462 : vector<2x256xf32>
      %c86 = arith.constant 86 : index
      %464 = memref.load %arg2[%c86] : memref<98xf32, #tpu.memory_space<smem>>
      %465 = vector.broadcast %464 : f32 to vector<2x256xf32>
      %466 = arith.mulf %367, %465 : vector<2x256xf32>
      %467 = arith.addf %463, %466 : vector<2x256xf32>
      %c93 = arith.constant 93 : index
      %468 = memref.load %arg2[%c93] : memref<98xf32, #tpu.memory_space<smem>>
      %469 = vector.broadcast %468 : f32 to vector<2x256xf32>
      %470 = arith.mulf %374, %469 : vector<2x256xf32>
      %471 = arith.addf %467, %470 : vector<2x256xf32>
      %472 = vector.extract_strided_slice %471 {offsets = [0, 255], sizes = [2, 1], strides = [1, 1]} : vector<2x256xf32> to vector<2x1xf32>
      %473 = vector.extract_strided_slice %471 {offsets = [0, 0], sizes = [2, 255], strides = [1, 1]} : vector<2x256xf32> to vector<2x255xf32>
      %474 = tpu.concatenate %472, %473 in 1 : vector<2x1xf32>, vector<2x255xf32> -> vector<2x256xf32>
      %cst_71 = arith.constant 0.000000e+00 : f32
      %475 = vector.shape_cast %42 : vector<1x256xi1> to vector<1x256xi1>
      %476 = vector.broadcast %475 : vector<1x256xi1> to vector<2x256xi1>
      %477 = vector.broadcast %cst_71 : f32 to vector<2x256xf32>
      %478 = arith.select %476, %474, %477 : vector<2x256xi1>, vector<2x256xf32>
      %479 = arith.addf %444, %478 : vector<2x256xf32>
      %c52 = arith.constant 52 : index
      %480 = memref.load %arg2[%c52] : memref<98xf32, #tpu.memory_space<smem>>
      %481 = vector.broadcast %480 : f32 to vector<2x256xf32>
      %482 = arith.mulf %339, %481 : vector<2x256xf32>
      %c59 = arith.constant 59 : index
      %483 = memref.load %arg2[%c59] : memref<98xf32, #tpu.memory_space<smem>>
      %484 = vector.broadcast %483 : f32 to vector<2x256xf32>
      %485 = arith.mulf %346, %484 : vector<2x256xf32>
      %486 = arith.addf %482, %485 : vector<2x256xf32>
      %c66 = arith.constant 66 : index
      %487 = memref.load %arg2[%c66] : memref<98xf32, #tpu.memory_space<smem>>
      %488 = vector.broadcast %487 : f32 to vector<2x256xf32>
      %489 = arith.mulf %353, %488 : vector<2x256xf32>
      %490 = arith.addf %486, %489 : vector<2x256xf32>
      %c73 = arith.constant 73 : index
      %491 = memref.load %arg2[%c73] : memref<98xf32, #tpu.memory_space<smem>>
      %492 = vector.broadcast %491 : f32 to vector<2x256xf32>
      %493 = arith.mulf %15, %492 : vector<2x256xf32>
      %494 = arith.addf %490, %493 : vector<2x256xf32>
      %c80 = arith.constant 80 : index
      %495 = memref.load %arg2[%c80] : memref<98xf32, #tpu.memory_space<smem>>
      %496 = vector.broadcast %495 : f32 to vector<2x256xf32>
      %497 = arith.mulf %360, %496 : vector<2x256xf32>
      %498 = arith.addf %494, %497 : vector<2x256xf32>
      %c87 = arith.constant 87 : index
      %499 = memref.load %arg2[%c87] : memref<98xf32, #tpu.memory_space<smem>>
      %500 = vector.broadcast %499 : f32 to vector<2x256xf32>
      %501 = arith.mulf %367, %500 : vector<2x256xf32>
      %502 = arith.addf %498, %501 : vector<2x256xf32>
      %c94 = arith.constant 94 : index
      %503 = memref.load %arg2[%c94] : memref<98xf32, #tpu.memory_space<smem>>
      %504 = vector.broadcast %503 : f32 to vector<2x256xf32>
      %505 = arith.mulf %374, %504 : vector<2x256xf32>
      %506 = arith.addf %502, %505 : vector<2x256xf32>
      %507 = arith.addf %479, %506 : vector<2x256xf32>
      %c53 = arith.constant 53 : index
      %508 = memref.load %arg2[%c53] : memref<98xf32, #tpu.memory_space<smem>>
      %509 = vector.broadcast %508 : f32 to vector<2x256xf32>
      %510 = arith.mulf %339, %509 : vector<2x256xf32>
      %c60 = arith.constant 60 : index
      %511 = memref.load %arg2[%c60] : memref<98xf32, #tpu.memory_space<smem>>
      %512 = vector.broadcast %511 : f32 to vector<2x256xf32>
      %513 = arith.mulf %346, %512 : vector<2x256xf32>
      %514 = arith.addf %510, %513 : vector<2x256xf32>
      %c67 = arith.constant 67 : index
      %515 = memref.load %arg2[%c67] : memref<98xf32, #tpu.memory_space<smem>>
      %516 = vector.broadcast %515 : f32 to vector<2x256xf32>
      %517 = arith.mulf %353, %516 : vector<2x256xf32>
      %518 = arith.addf %514, %517 : vector<2x256xf32>
      %c74 = arith.constant 74 : index
      %519 = memref.load %arg2[%c74] : memref<98xf32, #tpu.memory_space<smem>>
      %520 = vector.broadcast %519 : f32 to vector<2x256xf32>
      %521 = arith.mulf %15, %520 : vector<2x256xf32>
      %522 = arith.addf %518, %521 : vector<2x256xf32>
      %c81 = arith.constant 81 : index
      %523 = memref.load %arg2[%c81] : memref<98xf32, #tpu.memory_space<smem>>
      %524 = vector.broadcast %523 : f32 to vector<2x256xf32>
      %525 = arith.mulf %360, %524 : vector<2x256xf32>
      %526 = arith.addf %522, %525 : vector<2x256xf32>
      %c88 = arith.constant 88 : index
      %527 = memref.load %arg2[%c88] : memref<98xf32, #tpu.memory_space<smem>>
      %528 = vector.broadcast %527 : f32 to vector<2x256xf32>
      %529 = arith.mulf %367, %528 : vector<2x256xf32>
      %530 = arith.addf %526, %529 : vector<2x256xf32>
      %c95 = arith.constant 95 : index
      %531 = memref.load %arg2[%c95] : memref<98xf32, #tpu.memory_space<smem>>
      %532 = vector.broadcast %531 : f32 to vector<2x256xf32>
      %533 = arith.mulf %374, %532 : vector<2x256xf32>
      %534 = arith.addf %530, %533 : vector<2x256xf32>
      %535 = vector.extract_strided_slice %534 {offsets = [0, 1], sizes = [2, 255], strides = [1, 1]} : vector<2x256xf32> to vector<2x255xf32>
      %536 = vector.extract_strided_slice %534 {offsets = [0, 0], sizes = [2, 1], strides = [1, 1]} : vector<2x256xf32> to vector<2x1xf32>
      %537 = tpu.concatenate %535, %536 in 1 : vector<2x255xf32>, vector<2x1xf32> -> vector<2x256xf32>
      %cst_72 = arith.constant 0.000000e+00 : f32
      %538 = vector.shape_cast %45 : vector<1x256xi1> to vector<1x256xi1>
      %539 = vector.broadcast %538 : vector<1x256xi1> to vector<2x256xi1>
      %540 = vector.broadcast %cst_72 : f32 to vector<2x256xf32>
      %541 = arith.select %539, %537, %540 : vector<2x256xi1>, vector<2x256xf32>
      %542 = arith.addf %507, %541 : vector<2x256xf32>
      %c54 = arith.constant 54 : index
      %543 = memref.load %arg2[%c54] : memref<98xf32, #tpu.memory_space<smem>>
      %544 = vector.broadcast %543 : f32 to vector<2x256xf32>
      %545 = arith.mulf %339, %544 : vector<2x256xf32>
      %c61 = arith.constant 61 : index
      %546 = memref.load %arg2[%c61] : memref<98xf32, #tpu.memory_space<smem>>
      %547 = vector.broadcast %546 : f32 to vector<2x256xf32>
      %548 = arith.mulf %346, %547 : vector<2x256xf32>
      %549 = arith.addf %545, %548 : vector<2x256xf32>
      %c68 = arith.constant 68 : index
      %550 = memref.load %arg2[%c68] : memref<98xf32, #tpu.memory_space<smem>>
      %551 = vector.broadcast %550 : f32 to vector<2x256xf32>
      %552 = arith.mulf %353, %551 : vector<2x256xf32>
      %553 = arith.addf %549, %552 : vector<2x256xf32>
      %c75 = arith.constant 75 : index
      %554 = memref.load %arg2[%c75] : memref<98xf32, #tpu.memory_space<smem>>
      %555 = vector.broadcast %554 : f32 to vector<2x256xf32>
      %556 = arith.mulf %15, %555 : vector<2x256xf32>
      %557 = arith.addf %553, %556 : vector<2x256xf32>
      %c82 = arith.constant 82 : index
      %558 = memref.load %arg2[%c82] : memref<98xf32, #tpu.memory_space<smem>>
      %559 = vector.broadcast %558 : f32 to vector<2x256xf32>
      %560 = arith.mulf %360, %559 : vector<2x256xf32>
      %561 = arith.addf %557, %560 : vector<2x256xf32>
      %c89 = arith.constant 89 : index
      %562 = memref.load %arg2[%c89] : memref<98xf32, #tpu.memory_space<smem>>
      %563 = vector.broadcast %562 : f32 to vector<2x256xf32>
      %564 = arith.mulf %367, %563 : vector<2x256xf32>
      %565 = arith.addf %561, %564 : vector<2x256xf32>
      %c96 = arith.constant 96 : index
      %566 = memref.load %arg2[%c96] : memref<98xf32, #tpu.memory_space<smem>>
      %567 = vector.broadcast %566 : f32 to vector<2x256xf32>
      %568 = arith.mulf %374, %567 : vector<2x256xf32>
      %569 = arith.addf %565, %568 : vector<2x256xf32>
      %570 = vector.extract_strided_slice %569 {offsets = [0, 2], sizes = [2, 254], strides = [1, 1]} : vector<2x256xf32> to vector<2x254xf32>
      %571 = vector.extract_strided_slice %569 {offsets = [0, 0], sizes = [2, 2], strides = [1, 1]} : vector<2x256xf32> to vector<2x2xf32>
      %572 = tpu.concatenate %570, %571 in 1 : vector<2x254xf32>, vector<2x2xf32> -> vector<2x256xf32>
      %cst_73 = arith.constant 0.000000e+00 : f32
      %573 = vector.shape_cast %48 : vector<1x256xi1> to vector<1x256xi1>
      %574 = vector.broadcast %573 : vector<1x256xi1> to vector<2x256xi1>
      %575 = vector.broadcast %cst_73 : f32 to vector<2x256xf32>
      %576 = arith.select %574, %572, %575 : vector<2x256xi1>, vector<2x256xf32>
      %577 = arith.addf %542, %576 : vector<2x256xf32>
      %c55 = arith.constant 55 : index
      %578 = memref.load %arg2[%c55] : memref<98xf32, #tpu.memory_space<smem>>
      %579 = vector.broadcast %578 : f32 to vector<2x256xf32>
      %580 = arith.mulf %339, %579 : vector<2x256xf32>
      %c62 = arith.constant 62 : index
      %581 = memref.load %arg2[%c62] : memref<98xf32, #tpu.memory_space<smem>>
      %582 = vector.broadcast %581 : f32 to vector<2x256xf32>
      %583 = arith.mulf %346, %582 : vector<2x256xf32>
      %584 = arith.addf %580, %583 : vector<2x256xf32>
      %c69 = arith.constant 69 : index
      %585 = memref.load %arg2[%c69] : memref<98xf32, #tpu.memory_space<smem>>
      %586 = vector.broadcast %585 : f32 to vector<2x256xf32>
      %587 = arith.mulf %353, %586 : vector<2x256xf32>
      %588 = arith.addf %584, %587 : vector<2x256xf32>
      %c76 = arith.constant 76 : index
      %589 = memref.load %arg2[%c76] : memref<98xf32, #tpu.memory_space<smem>>
      %590 = vector.broadcast %589 : f32 to vector<2x256xf32>
      %591 = arith.mulf %15, %590 : vector<2x256xf32>
      %592 = arith.addf %588, %591 : vector<2x256xf32>
      %c83 = arith.constant 83 : index
      %593 = memref.load %arg2[%c83] : memref<98xf32, #tpu.memory_space<smem>>
      %594 = vector.broadcast %593 : f32 to vector<2x256xf32>
      %595 = arith.mulf %360, %594 : vector<2x256xf32>
      %596 = arith.addf %592, %595 : vector<2x256xf32>
      %c90 = arith.constant 90 : index
      %597 = memref.load %arg2[%c90] : memref<98xf32, #tpu.memory_space<smem>>
      %598 = vector.broadcast %597 : f32 to vector<2x256xf32>
      %599 = arith.mulf %367, %598 : vector<2x256xf32>
      %600 = arith.addf %596, %599 : vector<2x256xf32>
      %c97 = arith.constant 97 : index
      %601 = memref.load %arg2[%c97] : memref<98xf32, #tpu.memory_space<smem>>
      %602 = vector.broadcast %601 : f32 to vector<2x256xf32>
      %603 = arith.mulf %374, %602 : vector<2x256xf32>
      %604 = arith.addf %600, %603 : vector<2x256xf32>
      %605 = vector.extract_strided_slice %604 {offsets = [0, 3], sizes = [2, 253], strides = [1, 1]} : vector<2x256xf32> to vector<2x253xf32>
      %606 = vector.extract_strided_slice %604 {offsets = [0, 0], sizes = [2, 3], strides = [1, 1]} : vector<2x256xf32> to vector<2x3xf32>
      %607 = tpu.concatenate %605, %606 in 1 : vector<2x253xf32>, vector<2x3xf32> -> vector<2x256xf32>
      %cst_74 = arith.constant 0.000000e+00 : f32
      %608 = vector.shape_cast %51 : vector<1x256xi1> to vector<1x256xi1>
      %609 = vector.broadcast %608 : vector<1x256xi1> to vector<2x256xi1>
      %610 = vector.broadcast %cst_74 : f32 to vector<2x256xf32>
      %611 = arith.select %609, %607, %610 : vector<2x256xi1>, vector<2x256xf32>
      %612 = arith.addf %577, %611 : vector<2x256xf32>
      %613 = arith.negf %612 : vector<2x256xf32>
      %614 = math.exp %613 : vector<2x256xf32>
      %cst_75 = arith.constant 1.000000e+00 : f32
      %615 = vector.broadcast %cst_75 : f32 to vector<2x256xf32>
      %616 = arith.addf %615, %614 : vector<2x256xf32>
      %617 = arith.divf %615, %616 : vector<2x256xf32>
      %c0_76 = arith.constant 0 : index
      %c0_77 = arith.constant 0 : index
      %618 = vector.load %arg5[%c0_76, %c0_77] : memref<2x256xf32, #tpu.memory_space<vmem>>, vector<2x256xf32>
      tpu.vector_store %arg5[%c0_76, %c0_77], %617 {strides = array<i32>} : memref<2x256xf32, #tpu.memory_space<vmem>>, vector<2x256xf32>,
    } else {
    }
    return
  }
  func.func @transform_0(%arg0: i32, %arg1: i32) -> i32 {
    %c0_i32 = arith.constant 0 : i32
    %c0_i32_0 = arith.constant 0 : i32
    return %c0_i32 : i32
  }
  func.func @transform_1(%arg0: i32, %arg1: i32) -> (i32, i32) {
    %c0_i32 = arith.constant 0 : i32
    %c0_i32_0 = arith.constant 0 : i32
    %c0_i32_1 = arith.constant 0 : i32
    return %c0_i32, %c0_i32_0 : i32, i32
  }
  func.func @transform_2(%arg0: i32, %arg1: i32) -> (i32, i32, i32) {
    %c0_i32 = arith.constant 0 : i32
    %c0_i32_0 = arith.constant 0 : i32
    return %arg0, %arg1, %c0_i32 : i32, i32, i32
  }
  func.func @transform_3(%arg0: i32, %arg1: i32) -> (i32, i32) {
    %c0_i32 = arith.constant 0 : i32
    %c0_i32_0 = arith.constant 0 : i32
    return %arg0, %c0_i32 : i32, i32
  }
}

</mosaic_0001>

<bundles_post_ra>
// kernel: tpu_custom_call.1
= control target key start
LH: loop header
LB: loop body
LE: loop exit
PB: predicated region body
PF: predicated region fallthrough
CT: control target
= control target key end

     0   :  { %6 = vsyncpa [#allocation3], 0  ;;  %s124_s0 = inlined_call_operand.hbm [shape: f32[8,256], index: 0, kind: input, shape index: {}]   ;;  %s125_s1 = inlined_call_operand.hbm [shape: f32[8,256], index: 1, kind: output, shape index: {}]  }
   0x1   :  { %7 = vsyncpa [#allocation4], 0  ;;  %s104_s6 = smov [#allocation2]  }
   0x2   :  { %s14_s7 = sshll.u32 %s104_s6, 4  ;;  %s15_s7 = int_to_ptr.vmem [resolvable:$true] %s14_s7 }
   0x3   :  { %s68_s8 = scalar_lea.vmem %s15_s7, 256  ;;  %p73_p1 = scmp.lt.s32.totalorder %s15_s7, %s15_s7 }
   0x4   :  { %p69_p0 = scmp.ne.s32.totalorder %s15_s7, %s68_s8  ;;  %p74_p2 = scmp.lt.s32.totalorder %s68_s8, %s68_s8 }
   0x6   :  { %p75_p3 = por %p74_p2, %p73_p1 }
   0x8   :  { %p76_p4 = pnand %p75_p3, %p69_p0 }
   0xa   :  { %79 = shalt.err (!%p76_p4)
}
   0xb   :  { %17 = dma.hbm_to_vmem [thread:$0]  %s124_s0, 256, %s15_s7, [#allocation3]  }
   0xc   :  { %100 = dma.done.wait [#allocation3], 256  }
   0xd   :  { %101 = vsyncadd [#allocation3], 4294967040  ;;  %v21_v0 = vld [vmem:[#allocation2] sm:$0xff]  ;;  %s105_s11 = smov 3   ;;  %v22_v1 = vld [vmem:[#allocation2 + $0x8] sm:$0xff]  ;;  %v27_v2 = vlaneseq  ;;  %s106_s12 = smov 2  }
   0xe   :  { %23 = vrot.lane.b32.xlu0 %v21_v0, %s105_s11  ;;  %s107_s13 = smov [#allocation5]  }
   0xf   :  { %v28_v3 = vand.u32 127, %v27_v2  ;;  %s47_s0 = sshll.u32 %s107_s13, 4  ;;  %s48_s0 = int_to_ptr.vmem [resolvable:$true] %s47_s0 }
  0x10   :  { %s80_s14 = scalar_lea.vmem %s48_s0, 256  ;;  %p85_p6 = scmp.lt.s32.totalorder %s48_s0, %s48_s0 }
  0x11   :  { %vm29_vm0 = vcmp.lt.s32.totalorder %v28_v3, 3  ;;  %vm36_vm1 = vcmp.lt.s32.totalorder %v28_v3, 2  ;;  %p81_p5 = scmp.ne.s32.totalorder %s48_s0, %s80_s14  ;;  %p86_p7 = scmp.lt.s32.totalorder %s80_s14, %s80_s14 }
  0x12   :  { %25 = vrot.lane.b32.xlu0 %v22_v1, %s105_s11 }
  0x13   :  { %p87_p8 = por %p86_p7, %p85_p6 }
  0x15   :  { %p88_p9 = pnand %p87_p8, %p81_p5 }
  0x80   :  { %v24_v4 = vpop.permute.xlu0 %23 }
  0x84   :  { %v26_v5 = vpop.permute.xlu0 %25 }
  0x85   :  { %v31_v6 = vsel %vm29_vm0, %v26_v5, %v24_v4  ;;  %v30_v7 = vsel %vm29_vm0, %v24_v4, %v26_v5 }
  0x86   :  { %32 = vrot.lane.b32.xlu1 %v31_v6, %s106_s12 }
  0x8a   :  { %34 = vrot.lane.b32.xlu1 %v30_v7, %s106_s12 }
  0xf8   :  { %v33_v8 = vpop.permute.xlu1 %32 }
  0xfc   :  { %v35_v9 = vpop.permute.xlu1 %34 }
  0xfd   :  { %v37_v10 = vsel %vm36_vm1, %v33_v8, %v35_v9  ;;  %v38_v11 = vsel %vm36_vm1, %v35_v9, %v33_v8 }
  0xfe   :  { %39 = vst [vmem:[#allocation5] sm:$0xff] %v37_v10  ;;  %40 = vst [vmem:[#allocation5 + $0x8] sm:$0xff] %v38_v11 }
  0xff   :  { %91 = shalt.err (!%p88_p9)
}
 0x100   :  { %50 = dma.vmem_to_hbm [thread:$0]  %s48_s0, 256, %s125_s1, [#allocation4]  }
 0x101   :  { %102 = dma.done.wait [#allocation4], 256  }
 0x102   :  { %103 = vsyncadd [#allocation4], 4294967040 }
 0x103   :  { %54 = vsyncpa [#allocation3], 1 }
 0x104   :  { %55 = vsyncpa [#allocation4], 1 }

// kernel: tpu_custom_call.1
= control target key start
LH: loop header
LB: loop body
LE: loop exit
PB: predicated region body
PF: predicated region fallthrough
CT: control target
= control target key end

     0   :  { %s3276_s0 = inlined_call_operand.hbm [shape: f32[98], index: 0, kind: input, shape index: {}]   ;;  %s3277_s1 = inlined_call_operand.hbm [shape: f32[14,256], index: 1, kind: input, shape index: {}]   ;;  %s3278_s2 = inlined_call_operand.hbm [shape: f32[2,4,256], index: 2, kind: input, shape index: {}]   ;;  %s3279_s3 = inlined_call_operand.hbm [shape: f32[2,256], index: 3, kind: output, shape index: {}]  }
   0x1   :  { %3401 = sst [smem:[#allocation107_spill]] %s3279_s3 }
   0x2   :  { %8 = vsyncpa [#allocation7], 0 }
   0x3   :  { %9 = vsyncpa [#allocation5], 0 }
   0x4   :  { %10 = vsyncpa [#allocation10], 0 }
   0x5   :  { %11 = vsyncpa [#allocation6], 0  ;;  %s1727_s12 = smov [#allocation4]   ;;  %s1728_s15 = smov [#allocation8]  }
   0x6   :  { %19 = dma.hbm_to_smem %s3276_s0, 16, %s1727_s12, [#allocation7]  }
   0x7   :  { %s25_s16 = sshll.u32 %s1728_s15, 4  ;;  %s26_s16 = int_to_ptr.vmem [resolvable:$true] %s25_s16 }
   0x8   :  { %s1667_s17 = scalar_lea.vmem %s26_s16, 512  ;;  %p1672_p1 = scmp.lt.s32.totalorder %s26_s16, %s26_s16 }
   0x9   :  { %p1668_p0 = scmp.ne.s32.totalorder %s26_s16, %s1667_s17  ;;  %p1673_p2 = scmp.lt.s32.totalorder %s1667_s17, %s1667_s17 }
   0xb   :  { %p1674_p3 = por %p1673_p2, %p1672_p1 }
   0xd   :  { %p1675_p4 = pnand %p1674_p3, %p1668_p0 }
   0xf   :  { %1678 = shalt.err (!%p1675_p4)
}
  0x10   :  { %s1729_s18 = smov 256   ;;  %s1730_s19 = smov 16  }
  0x11   :  { %31 = dma.hbm_to_vmem [thread:$0]  %s3277_s1, 512, %s26_s16, [#allocation5], %s1729_s18, %s1729_s18, %s1730_s19  }
  0x12   :  { %s1731_s22 = smov [#allocation9]  }
  0x13   :  { %s37_s23 = sshll.u32 %s1731_s22, 4  ;;  %s38_s23 = int_to_ptr.vmem [resolvable:$true] %s37_s23 }
  0x14   :  { %s1687_s0 = scalar_lea.vmem %s38_s23, 256  ;;  %p1692_p6 = scmp.lt.s32.totalorder %s38_s23, %s38_s23 }
  0x15   :  { %p1688_p5 = scmp.ne.s32.totalorder %s38_s23, %s1687_s0  ;;  %p1693_p7 = scmp.lt.s32.totalorder %s1687_s0, %s1687_s0 }
  0x17   :  { %p1694_p8 = por %p1693_p7, %p1692_p6 }
  0x19   :  { %p1695_p9 = pnand %p1694_p8, %p1688_p5 }
  0x1b   :  { %1698 = shalt.err (!%p1695_p9)
}
  0x1c   :  { %s1732_s24 = smov 128   ;;  %s1733_s25 = smov 8  }
  0x1d   :  { %43 = dma.hbm_to_vmem [thread:$0]  %s3278_s2, 256, %s38_s23, [#allocation10], %s1732_s24, %s1732_s24, %s1733_s25  }
  0x1e   :  { %1719 = dma.done.wait [#allocation7], 16  }
  0x1f   :  { %1720 = vsyncadd [#allocation7], 4294967280 }
  0x20   :  { %1721 = dma.done.wait [#allocation5], 512  }
  0x21   :  { %1722 = vsyncadd [#allocation5], 4294966784 }
  0x22   :  { %1723 = dma.done.wait [#allocation10], 256  }
  0x23   :  { %1724 = vsyncadd [#allocation10], 4294967040 }
  0x24   :  { %53 = sfence }
  0x25   :  { %v54_v0 = vld [vmem:[#allocation9] sm:$0xff]  ;;  %v55_v1 = vld [vmem:[#allocation9 + $0x8] sm:$0xff]  ;;  %vm62_vm0 = vcmask 1043456   ;;  %v131_v26 = vlaneseq  ;;  %v1734_v34 = vmov 1983009808   ;;  %vm148_vm1 = vcmask 1041409  }
  0x26   :  { %v58_v2 = vcombine.high %v54_v0, %v54_v0  ;;  %v59_v3 = vcombine.high %v55_v1, %v55_v1  ;;  %v63_v4 = vsel %vm62_vm0, %v54_v0, 0.0  ;;  %v77_v5 = vsel %vm62_vm0, %v55_v1, 0.0  ;;  %s1735_s1 = smov 48   ;;  %s1736_s2 = smov 32  }
  0x27   :  { %v78_v6 = vrot.slane %v77_v5, 4  ;;  %v91_v7 = vsel %vm62_vm0, %v54_v0, -inf  ;;  %v105_v8 = vsel %vm62_vm0, %v55_v1, -inf  ;;  %v64_v13 = vrot.slane %v63_v4, 4  ;;  %s1737_s28 = smov 112   ;;  %s1738_s29 = smov 96  }
  0x28   :  { %v84_v9 = vsel %vm62_vm0, %v59_v3, 0.0  ;;  %v92_v10 = vrot.slane %v91_v7, 4  ;;  %v98_v11 = vsel %vm62_vm0, %v58_v2, -inf  ;;  %v106_v12 = vrot.slane %v105_v8, 4  ;;  %s1739_s30 = smov 80   ;;  %s1811_s4 = sld [smem:[#allocation4 + $0x7]] }
  0x29   :  { %v79_v14 = vadd.f32 %v78_v6, %v77_v5  ;;  %v85_v15 = vrot.slane %v84_v9, 4  ;;  %v99_v16 = vrot.slane %v98_v11, 4  ;;  %v112_v19 = vsel %vm62_vm0, %v59_v3, -inf  ;;  %s1813_s5 = sld [smem:[#allocation4 + $0x8]] }
  0x2a   :  { %v93_v17 = vmax.f32 %v91_v7, %v92_v10  ;;  %v107_v18 = vmax.f32 %v105_v8, %v106_v12  ;;  %v113_v25 = vrot.slane %v112_v19, 4  ;;  %v65_v27 = vadd.f32 %v64_v13, %v63_v4  ;;  %s1815_s6 = sld [smem:[#allocation4 + $0x9]] }
  0x2b   :  { %v80_v20 = vrot.slane %v79_v14, 2  ;;  %v86_v21 = vadd.f32 %v85_v15, %v84_v9  ;;  %v100_v22 = vmax.f32 %v98_v11, %v99_v16  ;;  %v129_v35 = vunpack.c.l.s4 %v1734_v34  ;;  %s1817_s7 = sld [smem:[#allocation4 + $0xa]]  ;;  %v271_v34 = vld [vmem:[#allocation8 + $0x2] ss:$8 sm:$0x3] }
  0x2c   :  { %v94_v23 = vrot.slane %v93_v17, 2  ;;  %v108_v24 = vrot.slane %v107_v18, 2  ;;  %v114_v33 = vmax.f32 %v112_v19, %v113_v25  ;;  %v66_v41 = vrot.slane %v65_v27, 2  ;;  %s1819_s8 = sld [smem:[#allocation4 + $0xb]] }
  0x2d   :  { %v81_v28 = vadd.f32 %v80_v20, %v79_v14  ;;  %v87_v29 = vrot.slane %v86_v21, 2  ;;  %v101_v30 = vrot.slane %v100_v22, 2  ;;  %v130_v47 = vunpack.c.0.s8 %v129_v35  ;;  %s1821_s9 = sld [smem:[#allocation4 + $0xc]] }
  0x2e   :  { %v95_v31 = vmax.f32 %v93_v17, %v94_v23  ;;  %v109_v32 = vmax.f32 %v107_v18, %v108_v24  ;;  %v115_v40 = vrot.slane %v114_v33, 2  ;;  %v1785_v48 = vshrl.u32 %v131_v26, 7  ;;  %3403 = sst [smem:[#allocation17_spill]] %s1811_s4 }
  0x2f   :  { %v88_v36 = vadd.f32 %v87_v29, %v86_v21  ;;  %v102_v37 = vmax.f32 %v100_v22, %v101_v30  ;;  %v82_v42 = vrot.slane %v81_v28, 1  ;;  %v70_v52 = vsel %vm62_vm0, %v58_v2, 0.0  ;;  %3404 = sst [smem:[#allocation18_spill]] %s1813_s5 }
  0x30   :  { %v96_v38 = vrot.slane %v95_v31, 1  ;;  %v110_v39 = vrot.slane %v109_v32, 1  ;;  %v116_v46 = vmax.f32 %v114_v33, %v115_v40  ;;  %v67_v53 = vadd.f32 %v66_v41, %v65_v27  ;;  %3405 = sst [smem:[#allocation19_spill]] %s1815_s6  ;;  %v268_v27 = vld [vmem:[#allocation8 + $0x1] ss:$8 sm:$0x3] }
  0x31   :  { %v89_v43 = vrot.slane %v88_v36, 1  ;;  %v103_v44 = vrot.slane %v102_v37, 1  ;;  %v83_v54 = vadd.f32 %v82_v42, %v81_v28  ;;  %v71_v56 = vrot.slane %v70_v52, 4  ;;  %3406 = sst [smem:[#allocation20_spill]] %s1817_s7 }
  0x32   :  { %v97_v45 = vmax.f32 %v95_v31, %v96_v38  ;;  %v111_v50 = vmax.f32 %v109_v32, %v110_v39  ;;  %v117_v51 = vrot.slane %v116_v46, 1  ;;  %v1789_v58 = vsub.s32 %v130_v47, %v1785_v48  ;;  %3407 = sst [smem:[#allocation21_spill]] %s1819_s8  ;;  %v265_v28 = vld [vmem:[#allocation8] ss:$8 sm:$0x3] }
  0x33   :  { %v104_v49 = vmax.f32 %v102_v37, %v103_v44  ;;  %v90_v55 = vadd.f32 %v89_v43, %v88_v36  ;;  %v72_v60 = vadd.f32 %v71_v56, %v70_v52  ;;  %v68_v62 = vrot.slane %v67_v53, 1  ;;  %3408 = sst [smem:[#allocation22_spill]] %s1821_s9  ;;  %v274_v33 = vld [vmem:[#allocation8 + $0x4] ss:$8 sm:$0x3] }
  0x34   :  { %v118_v57 = vmax.f32 %v116_v46, %v117_v51  ;;  %3402 = vst [vmem:[#allocation16_spill] sm:$0xff] %v1789_v58  ;;  %vm150_vm2 = vcmask 1043459   ;;  %vm152_vm3 = vcmask 1045509   ;;  %vm154_vm4 = vcmask 1047559   ;;  %s1823_s10 = sld [smem:[#allocation4 + $0xd]] }
  0x35   :  { %v162_v59 = vcombine.low %v97_v45, %v104_v49  ;;  %v135_v63 = vcombine.low %v83_v54, %v90_v55  ;;  %v73_v0 = vrot.slane %v72_v60, 2  ;;  %v69_v5 = vadd.f32 %v68_v62, %v67_v53  ;;  %s1825_s11 = sld [smem:[#allocation4 + $0x31]]  ;;  %v277_v42 = vld [vmem:[#allocation8 + $0x5] ss:$8 sm:$0x3] }
  0x36   :  { %v170_v61 = vcombine.low %v111_v50, %v118_v57  ;;  %s1827_s12 = sld [smem:[#allocation4 + $0x32]]  ;;  %vm269_vm5 = vcmp.ne.f32.partialorder %v268_v27, 0.0  ;;  %v1922_v29 = vsub.s32 0, %v1785_v48  ;;  %v1925_v30 = vsub.s32 1, %v1785_v48 }
  0x37   :  { %v169_v1 = vrot.slane %v162_v59, %v1789_v58  ;;  %v74_v2 = vadd.f32 %v73_v0, %v72_v60  ;;  %v142_v6 = vrot.slane %v135_v63, %v1789_v58  ;;  %s1829_s13 = sld [smem:[#allocation4 + $0x33]]  ;;  %vm266_vm6 = vcmp.ne.f32.partialorder %v265_v28, 0.0  ;;  %v280_v51 = vld [vmem:[#allocation8 + $0x6] ss:$8 sm:$0x3] }
  0x38   :  { %v177_v3 = vrot.slane %v170_v61, %v1789_v58  ;;  %s1831_s14 = sld [smem:[#allocation4 + $0x34]]  ;;  %3451 = vst [vmem:[#allocation65_spill] sm:$0xff] %v1922_v29  ;;  %3452 = vst [vmem:[#allocation66_spill] sm:$0xff] %v1925_v30  ;;  %v3348_v31 = vmov 0   ;;  %v452_v38 = vstv %s1811_s4  ;;  %vm275_vm7 = vcmp.ne.f32.partialorder %v274_v33, 0.0 }
  0x39   :  { %v75_v7 = vrot.slane %v74_v2, 1  ;;  %v147_v12 = vrot.slane %v142_v6, 7  ;;  %s1833_s15 = sld [smem:[#allocation4 + $0x35]]  ;;  %v1930_v32 = vsel %vm269_vm5, 1, %v3348_v31  ;;  %v1937_v35 = vsel %vm266_vm6, 1, %v3348_v31 }
  0x3a   :  { %v180_v4 = vrot.slane %v177_v3, 7  ;;  %3409 = sst [smem:[#allocation23_spill]] %s1823_s10  ;;  %v346_v36 = vrot.slane %v1930_v32, %v1922_v29  ;;  %v350_v37 = vrot.slane %v1930_v32, %v1925_v30  ;;  %v529_v39 = vstv %s1813_s5 }
  0x3b   :  { %v76_v10 = vadd.f32 %v75_v7, %v74_v2  ;;  %3410 = sst [smem:[#allocation24_spill]] %s1825_s11  ;;  %v606_v40 = vstv %s1815_s6  ;;  %v683_v41 = vstv %s1817_s7  ;;  %vm272_vm8 = vcmp.ne.f32.partialorder %v271_v34, 0.0 }
  0x3c   :  { %v181_v8 = vsel %vm148_vm1, %v180_v4, %v169_v1  ;;  %3411 = sst [smem:[#allocation25_spill]] %s1827_s12  ;;  %v735_v43 = vstv %s1819_s8  ;;  %v812_v44 = vstv %s1821_s9  ;;  %v323_v45 = vrot.slane %v1937_v35, %v1922_v29 }
  0x3d   :  { %v182_v9 = vsel %vm150_vm2, %v180_v4, %v181_v8  ;;  %v127_v14 = vcombine.low %v69_v5, %v76_v10  ;;  %3412 = sst [smem:[#allocation26_spill]] %s1829_s13  ;;  %v327_v46 = vrot.slane %v1937_v35, %v1925_v30  ;;  %v889_v47 = vstv %s1823_s10 }
  0x3e   :  { %v183_v11 = vsel %vm152_vm3, %v180_v4, %v182_v9  ;;  %3413 = sst [smem:[#allocation27_spill]] %s1831_s14  ;;  %v1037_v48 = vstv %s1825_s11  ;;  %v1102_v49 = vstv %s1827_s12  ;;  %v1966_v50 = vsel %vm275_vm7, 1, %v3348_v31 }
  0x3f   :  { %v184_v13 = vsel %vm154_vm4, %v180_v4, %v183_v11  ;;  %v134_v15 = vrot.slane %v127_v14, %v1789_v58  ;;  %3414 = sst [smem:[#allocation28_spill]] %s1833_s15  ;;  %v1167_v52 = vstv %s1829_s13  ;;  %v1974_v54 = vsel %vm272_vm8, 1, %v3348_v31 }
  0x40   :  { %186 = vst [vmem:[#allocation3] sm:$0xf] %v184_v13  ;;  %s1835_s16 = sld [smem:[#allocation4 + $0x36]]  ;;  %vm278_vm9 = vcmp.ne.f32.partialorder %v277_v42, 0.0  ;;  %v392_v60 = vrot.slane %v1966_v50, %v1922_v29  ;;  %v396_v61 = vrot.slane %v1966_v50, %v1925_v30  ;;  %vm281_vm10 = vcmp.ne.f32.partialorder %v280_v51, 0.0 }
  0x41   :  { %v149_v16 = vsel %vm148_vm1, %v147_v12, %v134_v15  ;;  %s1837_s17 = sld [smem:[#allocation4 + $0x37]]  ;;  %v369_v1 = vrot.slane %v1974_v54, %v1922_v29  ;;  %v1996_v3 = vsel %vm278_vm9, 1, %v3348_v31  ;;  %v373_v4 = vrot.slane %v1974_v54, %v1925_v30 }
  0x42   :  { %v151_v17 = vsel %vm150_vm2, %v147_v12, %v149_v16  ;;  %s1839_s18 = sld [smem:[#allocation4]]  ;;  %v2010_v9 = vsel %vm281_vm10, 1, %v3348_v31  ;;  %v415_v13 = vrot.slane %v1996_v3, %v1922_v29  ;;  %v419_v14 = vrot.slane %v1996_v3, %v1925_v30 }
  0x43   :  { %v153_v18 = vsel %vm152_vm3, %v147_v12, %v151_v17  ;;  %s1843_s20 = sld [smem:[#allocation4 + $0x2]]  ;;  %vm337_vm11 = vcmask 261120   ;;  %vm2118_vm12 = vcmp.eq.s32.totalorder %v346_v36, 1  ;;  %vm2125_vm13 = vcmp.eq.s32.totalorder %v350_v37, 1 }
  0x44   :  { %v155_v19 = vsel %vm154_vm4, %v147_v12, %v153_v18  ;;  %s1845_s21 = sld [smem:[#allocation4 + $0x3]]  ;;  %vm314_vm14 = vcmask 392192   ;;  %vm2174_vm15 = vcmp.eq.s32.totalorder %v323_v45, 1  ;;  %vm2181_vm0 = vcmp.eq.s32.totalorder %v327_v46, 1 }
  0x45   :  { %157 = vst [vmem:[#allocation2] sm:$0xf] %v155_v19  ;;  %s1847_s22 = sld [smem:[#allocation4 + $0x4]]  ;;  %vm382_vm1 = vcmask 916480   ;;  %vm360_vm2 = vcmask 130048   ;;  %vm2302_vm3 = vcmp.eq.s32.totalorder %v392_v60, 1  ;;  %v3554_v54 = vrot.slane %v2010_v9, %v1922_v29 }
  0x46   :  { %3415 = sst [smem:[#allocation29_spill]] %s1835_s16  ;;  %vm405_vm4 = vcmask 785408   ;;  %vm2343_vm6 = vcmp.eq.s32.totalorder %v396_v61, 1  ;;  %vm2350_vm7 = vcmp.eq.s32.totalorder %v369_v1, 1  ;;  %vm2370_vm8 = vcmp.eq.s32.totalorder %v373_v4, 1 }
  0x47   :  { %v1799_v20 = vld [vmem:[#allocation3] sm:$0xf]  ;;  %3416 = sst [smem:[#allocation30_spill]] %s1837_s17  ;;  %vm2377_vm9 = vcmp.eq.s32.totalorder %v415_v13, 1  ;;  %vm2384_vm10 = vcmp.eq.s32.totalorder %v419_v14, 1 }
  0x48   :  { %v968_v21 = vrot.slane %v1799_v20, %v1789_v58  ;;  %3417 = sst [smem:[#allocation31_spill]] %s1839_s18 }
  0x49   :  { %3419 = sst [smem:[#allocation33_spill]] %s1843_s20 }
  0x4a   :  { %973 = vrot.lane.b32.xlu1 %v968_v21, %s1735_s1  ;;  %v969_v26 = vcombine.high %v968_v21, %v968_v21  ;;  %3420 = sst [smem:[#allocation34_spill]] %s1845_s21 }
  0x4b   :  { %3421 = sst [smem:[#allocation35_spill]] %s1847_s22 }
  0x4c   :  { %v262_v22 = vld [vmem:[#allocation2] sm:$0xf]  ;;  %s1849_s23 = sld [smem:[#allocation4 + $0x5]] }
  0x4d   :  { %v1803_v23 = vmul.f32 0.25, %v262_v22  ;;  %s1851_s0 = sld [smem:[#allocation4 + $0x6]] }
  0x4e   :  { %s1853_s24 = sld [smem:[#allocation4 + $0x11]] }
  0x4f   :  { %v307_v24 = vrot.slane %v1803_v23, %v1789_v58  ;;  %s1855_s25 = sld [smem:[#allocation4 + $0x38]] }
  0x50   :  { %s1857_s26 = sld [smem:[#allocation4 + $0x39]] }
  0x51   :  { %312 = vrot.lane.b32.xlu0 %v307_v24, %s1735_s1  ;;  %335 = vrot.lane.b32.xlu1 %v307_v24, %s1736_s2  ;;  %v308_v25 = vcombine.high %v307_v24, %v307_v24  ;;  %s1859_s27 = sld [smem:[#allocation4 + $0x3a]] }
  0x52   :  { %3422 = sst [smem:[#allocation36_spill]] %s1849_s23 }
  0x53   :  { %3423 = sst [smem:[#allocation37_spill]] %s1851_s0 }
  0x54   :  { %3424 = sst [smem:[#allocation38_spill]] %s1853_s24 }
  0x55   :  { %378 = vrot.lane.b32.xlu0 %v307_v24, %s1737_s28  ;;  %358 = vrot.lane.b32.xlu1 %v307_v24, %s1730_s19  ;;  %3425 = sst [smem:[#allocation39_spill]] %s1855_s25 }
  0x56   :  { %3426 = sst [smem:[#allocation40_spill]] %s1857_s26 }
  0x57   :  { %3427 = sst [smem:[#allocation41_spill]] %s1859_s27 }
  0x58   :  { %s1871_s3 = sld [smem:[#allocation4 + $0x46]] }
  0x59   :  { %401 = vrot.lane.b32.xlu0 %v307_v24, %s1738_s29  ;;  %332 = vrot.lane.b32.xlu1 %v308_v25, %s1736_s2  ;;  %s1873_s0 = sld [smem:[#allocation4 + $0x4d]] }
  0x5a   :  { %s1875_s24 = sld [smem:[#allocation4 + $0x40]] }
  0x5b   :  { %s1877_s25 = sld [smem:[#allocation4 + $0x47]] }
  0x5c   :  { %s1879_s26 = sld [smem:[#allocation4 + $0x4e]] }
  0x5d   :  { %424 = vrot.lane.b32.xlu0 %v307_v24, %s1739_s30  ;;  %984 = vrot.lane.b32.xlu1 %v968_v21, %s1736_s2  ;;  %s1881_s27 = sld [smem:[#allocation4 + $0x54]] }
  0x5e   :  { %s1893_s23 = sld [smem:[#allocation4 + $0x5c]]  ;;  %v1053_v59 = vstv %s1871_s3 }
  0x5f   :  { %3433 = sst [smem:[#allocation47_spill]] %s1873_s0  ;;  %v1054_v5 = vmul.f32 %v1053_v59, %v1799_v20 }
  0x60   :  { %3434 = sst [smem:[#allocation48_spill]] %s1875_s24 }
  0x61   :  { %970 = vrot.lane.b32.xlu0 %v969_v26, %s1735_s1  ;;  %995 = vrot.lane.b32.xlu1 %v968_v21, %s1730_s19  ;;  %s1895_s0 = sld [smem:[#allocation4 + $0x23]]  ;;  %v1118_v62 = vstv %s1877_s25  ;;  %v2035_v24 = vrot.slane %v1054_v5, %v1789_v58 }
  0x62   :  { %3435 = sst [smem:[#allocation49_spill]] %s1879_s26  ;;  %v1119_v10 = vmul.f32 %v1118_v62, %v1799_v20 }
  0x63   :  { %3436 = sst [smem:[#allocation50_spill]] %s1881_s27 }
  0x64   :  { %3440 = sst [smem:[#allocation54_spill]] %s1893_s23  ;;  %v2043_v28 = vrot.slane %v1119_v10, %v1789_v58 }
  0x65   :  { %309 = vrot.lane.b32.xlu0 %v308_v25, %s1735_s1  ;;  %380 = vrot.lane.b32.xlu1 %v308_v25, %s1737_s28  ;;  %s1861_s1 = sld [smem:[#allocation4 + $0x3b]] }
  0x66   :  { %s1897_s24 = sld [smem:[#allocation4 + $0xf]] }
  0x67   :  { %3441 = sst [smem:[#allocation55_spill]] %s1895_s0 }
  0x68   :  { %s1899_s22 = sld [smem:[#allocation4 + $0x16]] }
  0x69   :  { %355 = vrot.lane.b32.xlu0 %v308_v25, %s1730_s19  ;;  %403 = vrot.lane.b32.xlu1 %v308_v25, %s1738_s29  ;;  %s1901_s26 = sld [smem:[#allocation4 + $0x2a]] }
  0x6a   :  { %s1903_s27 = sld [smem:[#allocation4 + $0x1d]] }
  0x6b   :  { %3428 = sst [smem:[#allocation42_spill]] %s1861_s1 }
  0x6c   :  { %s1883_s1 = sld [smem:[#allocation4 + $0x15]] }
  0x6d   :  { %981 = vrot.lane.b32.xlu0 %v969_v26, %s1736_s2  ;;  %426 = vrot.lane.b32.xlu1 %v308_v25, %s1739_s30  ;;  %s1863_s2 = sld [smem:[#allocation4 + $0x3c]] }
  0x6e   :  { %3442 = sst [smem:[#allocation56_spill]] %s1897_s24  ;;  %v541_v18 = vstv %s1899_s22 }
  0x6f   :  { %3443 = sst [smem:[#allocation57_spill]] %s1901_s26  ;;  %v542_v42 = vmul.f32 %v541_v18, %v1803_v23 }
  0x70   :  { %3444 = sst [smem:[#allocation58_spill]] %s1903_s27 }
  0x71   :  { %992 = vrot.lane.b32.xlu0 %v969_v26, %s1730_s19  ;;  %1005 = vrot.lane.b32.xlu1 %v969_v26, %s1737_s28  ;;  %s1841_s19 = sld [smem:[#allocation4 + $0x1]]  ;;  %v2080_v15 = vrot.slane %v542_v42, %v1789_v58 }
  0x72   :  { %s1905_s21 = sld [smem:[#allocation4 + $0x24]]  ;;  %v464_v6 = vstv %s1883_s1 }
  0x73   :  { %3429 = sst [smem:[#allocation43_spill]] %s1863_s2  ;;  %v465_v17 = vmul.f32 %v464_v6, %v1803_v23 }
  0x74   :  { %s1885_s2 = sld [smem:[#allocation4 + $0x55]] }
  0x75   :  { %1003 = vrot.lane.b32.xlu0 %v968_v21, %s1737_s28  ;;  %1016 = vrot.lane.b32.xlu1 %v969_v26, %s1738_s29  ;;  %s1865_s28 = sld [smem:[#allocation4 + $0x3d]]  ;;  %v2059_v10 = vrot.slane %v465_v17, %v1789_v58 }
  0x76   :  { %s1913_s23 = sld [smem:[#allocation4 + $0x1e]] }
  0x77   :  { %3418 = sst [smem:[#allocation32_spill]] %s1841_s19 }
  0x78   :  { %3445 = sst [smem:[#allocation59_spill]] %s1905_s21 }
  0x79   :  { %1014 = vrot.lane.b32.xlu0 %v968_v21, %s1738_s29  ;;  %1027 = vrot.lane.b32.xlu1 %v969_v26, %s1739_s30  ;;  %s1867_s29 = sld [smem:[#allocation4 + $0x3e]] }
  0x7a   :  { %3437 = sst [smem:[#allocation51_spill]] %s1885_s2 }
  0x7b   :  { %3430 = sst [smem:[#allocation44_spill]] %s1865_s28 }
  0x7c   :  { %s1887_s28 = sld [smem:[#allocation4 + $0xe]] }
  0x7d   :  { %1025 = vrot.lane.b32.xlu0 %v968_v21, %s1739_s30  ;;  %s1869_s30 = sld [smem:[#allocation4 + $0x3f]] }
  0x7e   :  { %s1907_s2 = sld [smem:[#allocation4 + $0x10]] }
  0x7f   :  { %3431 = sst [smem:[#allocation45_spill]] %s1867_s29 }
  0x80   :  { %s1889_s29 = sld [smem:[#allocation4 + $0x5b]] }
  0x81   :  { %s1915_s0 = sld [smem:[#allocation4 + $0x25]] }
  0x82   :  { %3438 = sst [smem:[#allocation52_spill]] %s1887_s28 }
  0x83   :  { %3432 = sst [smem:[#allocation46_spill]] %s1869_s30 }
  0x84   :  { %s1891_s30 = sld [smem:[#allocation4 + $0x1c]] }
  0x85   :  { %3446 = sst [smem:[#allocation60_spill]] %s1907_s2 }
  0x86   :  { %s1909_s28 = sld [smem:[#allocation4 + $0x2b]] }
  0x87   :  { %3448 = sst [smem:[#allocation62_spill]] %s1915_s0 }
  0x88   :  { %s1917_s24 = sld [smem:[#allocation4 + $0x2c]] }
  0x89   :  { %s1919_s26 = sld [smem:[#allocation4 + $0x12]] }
  0x8a   :  { %3439 = sst [smem:[#allocation53_spill]] %s1891_s30 }
  0x8b   :  { %s1911_s30 = sld [smem:[#allocation4 + $0x17]] }
  0x8c   :  { %3447 = sst [smem:[#allocation61_spill]] %s1909_s28 }
  0x8d   :  { %s1927_s28 = sld [smem:[#allocation4 + $0x19]] }
  0x8e   :  { %3449 = sst [smem:[#allocation63_spill]] %s1917_s24 }
  0x8f   :  { %3450 = sst [smem:[#allocation64_spill]] %s1919_s26 }
  0x90   :  { %s1932_s24 = sld [smem:[#allocation4 + $0x20]] }
  0x91   :  { %s1934_s26 = sld [smem:[#allocation4 + $0x27]]  ;;  %v618_v51 = vstv %s1911_s30 }
  0x92   :  { %s1939_s0 = sld [smem:[#allocation4 + $0x2e]]  ;;  %v619_v62 = vmul.f32 %v618_v51, %v1803_v23 }
  0x93   :  { %s1959_s6 = sld [smem:[#allocation4 + $0x21]]  ;;  %v747_v34 = vstv %s1927_s28 }
  0x94   :  { %s1968_s9 = sld [smem:[#allocation4 + $0x28]]  ;;  %v748_v6 = vmul.f32 %v747_v34, %v1803_v23  ;;  %v2101_v17 = vrot.slane %v619_v62, %v1789_v58 }
  0x95   :  { %s1976_s10 = sld [smem:[#allocation4 + $0x14]] }
  0x96   :  { %3453 = sst [smem:[#allocation67_spill]] %s1932_s24  ;;  %v2132_v27 = vrot.slane %v748_v6, %v1789_v58 }
  0x97   :  { %3454 = sst [smem:[#allocation68_spill]] %s1934_s26 }
  0x98   :  { %3455 = sst [smem:[#allocation69_spill]] %s1939_s0  ;;  %3499 = vst [vmem:[#allocation76_spill] sm:$0xff] %v2132_v27 }
  0x99   :  { %s1946_s24 = sld [smem:[#allocation4 + $0x13]] }
  0x9a   :  { %s1951_s0 = sld [smem:[#allocation4 + $0x1a]] }
  0x9b   :  { %3456 = sst [smem:[#allocation70_spill]] %s1959_s6 }
  0x9c   :  { %3457 = sst [smem:[#allocation71_spill]] %s1968_s9 }
  0x9d   :  { %3458 = sst [smem:[#allocation72_spill]] %s1976_s10 }
  0x9e   :  { %s1982_s12 = sld [smem:[#allocation4 + $0x2f]] }
  0x9f   :  { %s1989_s11 = sld [smem:[#allocation4 + $0x1b]] }
  0xa0   :  { %s1998_s3 = sld [smem:[#allocation4 + $0x22]]  ;;  %v824_v33 = vstv %s1951_s0 }
  0xa1   :  { %s2005_s25 = sld [smem:[#allocation4 + $0x29]]  ;;  %v825_v34 = vmul.f32 %v824_v33, %v1803_v23 }
  0xa2   :  { %s2013_s18 = sld [smem:[#allocation4 + $0x30]] }
  0xa3   :  { %s3470_s7 = sld [smem:[#allocation42_spill]]  ;;  %v2151_v18 = vrot.slane %v825_v34, %v1789_v58 }
  0xa4   :  { %s2021_s1 = sld [smem:[#allocation4 + $0x48]] }
  0xa5   :  { %s2027_s8 = sld [smem:[#allocation4 + $0x4a]]  ;;  %v901_v51 = vstv %s1989_s11  ;;  %3501 = vst [vmem:[#allocation77_spill] sm:$0xff] %v2151_v18 }
  0xa6   :  { %3463 = sst [smem:[#allocation73_spill]] %s1998_s3  ;;  %v902_v26 = vmul.f32 %v901_v51, %v1803_v23 }
  0xa7   :  { %3466 = sst [smem:[#allocation74_spill]] %s2005_s25 }
  0xa8   :  { %3468 = sst [smem:[#allocation75_spill]] %s2013_s18  ;;  %v2159_v11 = vrot.slane %v902_v26, %v1789_v58 }
  0xa9   :  { %s2037_s17 = sld [smem:[#allocation4 + $0x41]] }
  0xaa   :  { %s3477_s22 = sld [smem:[#allocation50_spill]]  ;;  %v1183_v19 = vstv %s2021_s1  ;;  %3503 = vst [vmem:[#allocation78_spill] sm:$0xff] %v2159_v11 }
  0xab   :  { %s3478_s19 = sld [smem:[#allocation49_spill]]  ;;  %v1300_v31 = vstv %s2027_s8  ;;  %v1184_v12 = vmul.f32 %v1183_v19, %v1799_v20 }
  0xac   :  { %s2045_s15 = sld [smem:[#allocation4 + $0x43]]  ;;  %v1301_v32 = vmul.f32 %v1300_v31, %v1799_v20 }
  0xad   :  { %s3480_s25 = sld [smem:[#allocation51_spill]]  ;;  %v2187_v2 = vrot.slane %v1184_v12, %v1789_v58 }
  0xae   :  { %s2051_s10 = sld [smem:[#allocation4 + $0x4b]]  ;;  %v2190_v42 = vrot.slane %v1301_v32, %v1789_v58 }
  0xaf   :  { %s2061_s14 = sld [smem:[#allocation4 + $0x4f]]  ;;  %3513 = vst [vmem:[#allocation79_spill] sm:$0xff] %v2187_v2 }
  0xb0   :  { %s2068_s30 = sld [smem:[#allocation4 + $0x51]]  ;;  %3514 = vst [vmem:[#allocation80_spill] sm:$0xff] %v2190_v42 }
  0xb1   :  { %s3486_s18 = sld [smem:[#allocation55_spill]] }
  0xb2   :  { %3479 = sst [smem:[#allocation42_spill]] %s2045_s15 }
  0xb3   :  { %s2075_s20 = sld [smem:[#allocation4 + $0x4c]] }
  0xb4   :  { %s2083_s28 = sld [smem:[#allocation4 + $0x44]]  ;;  %v1365_v36 = vstv %s2051_s10 }
  0xb5   :  { %3483 = sst [smem:[#allocation50_spill]] %s2061_s14  ;;  %v1366_v8 = vmul.f32 %v1365_v36, %v1799_v20 }
  0xb6   :  { %3485 = sst [smem:[#allocation49_spill]] %s2068_s30 }
  0xb7   :  { %s2090_s3 = sld [smem:[#allocation4 + $0x56]] }
  0xb8   :  { %s3490_s0 = sld [smem:[#allocation61_spill]] }
  0xb9   :  { %s2096_s5 = sld [smem:[#allocation4 + $0x5d]]  ;;  %v1430_v19 = vstv %s2075_s20 }
  0xba   :  { %3489 = sst [smem:[#allocation51_spill]] %s2083_s28  ;;  %v1431_v45 = vmul.f32 %v1430_v19, %v1799_v20  ;;  %v2209_v19 = vrot.slane %v1366_v8, %v1789_v58 }
  0xbb   :  { %s2106_s4 = sld [smem:[#allocation4 + $0x58]] }
  0xbc   :  { %v2053_v59 = vpop.permute.xlu1 %973  ;;  %s2113_s27 = sld [smem:[#allocation4 + $0x52]]  ;;  %3517 = vst [vmem:[#allocation81_spill] sm:$0xff] %v2209_v19  ;;  %v2221_v8 = vrot.slane %v1431_v45, %v1789_v58 }
  0xbd   :  { %s2134_s1 = sld [smem:[#allocation4 + $0x5f]] }
  0xbe   :  { %s3500_s2 = sld [smem:[#allocation69_spill]]  ;;  %3518 = vst [vmem:[#allocation82_spill] sm:$0xff] %v2221_v8 }
  0xbf   :  { %s2141_s21 = sld [smem:[#allocation4 + $0x59]] }
  0xc0   :  { %s2153_s10 = sld [smem:[#allocation4 + $0x45]] }
  0xc1   :  { %s2162_s13 = sld [smem:[#allocation4 + $0x18]] }
  0xc2   :  { %s3504_s16 = sld [smem:[#allocation72_spill]] }
  0xc3   :  { %v2098_v5 = vpop.permute.xlu0 %312  ;;  %v336_v25 = vpop.permute.xlu1 %335  ;;  %s3505_s11 = sld [smem:[#allocation73_spill]] }
  0xc4   :  { %s3506_s20 = sld [smem:[#allocation74_spill]] }
  0xc5   :  { %s2169_s8 = sld [smem:[#allocation4 + $0x53]] }
  0xc6   :  { %3502 = sst [smem:[#allocation55_spill]] %s2153_s10 }
  0xc7   :  { %v2143_v37 = vpop.permute.xlu0 %378  ;;  %v2145_v51 = vpop.permute.xlu1 %358  ;;  %s3508_s26 = sld [smem:[#allocation75_spill]]  ;;  %v695_v63 = vstv %s2162_s13 }
  0xc8   :  { %s2192_s6 = sld [smem:[#allocation4 + $0x60]]  ;;  %v2259_v31 = vmul.f32 %v695_v63, %v1803_v23 }
  0xc9   :  { %s2202_s9 = sld [smem:[#allocation4 + $0x5a]] }
  0xca   :  { %3524 = vst [vmem:[#allocation83_spill] sm:$0xff] %v2259_v31  ;;  %s3537_s28 = sld [smem:[#allocation27_spill]] }
  0xcb   :  { %3507 = sst [smem:[#allocation61_spill]] %s2169_s8  ;;  %v2195_v6 = vpop.permute.xlu0 %401  ;;  %v333_v35 = vpop.permute.xlu1 %332 }
  0xcc   :  { %v338_v46 = vsel %vm337_vm11, %v336_v25, %v333_v35  ;;  %v341_v34 = vsel %vm337_vm11, %v333_v35, %v336_v25  ;;  %s3538_s8 = sld [smem:[#allocation28_spill]] }
  0xcd   :  { %v353_v20 = vsel %vm2118_vm12, %v341_v34, 0.0  ;;  %v354_v45 = vsel %vm2125_vm13, %v338_v46, 0.0  ;;  %s3546_s13 = sld [smem:[#allocation30_spill]] }
  0xce   :  { %3515 = sst [smem:[#allocation69_spill]] %s2192_s6  ;;  %v2249_v56 = vmul.f32 %v452_v38, %v353_v20  ;;  %v2253_v12 = vmul.f32 %v452_v38, %v354_v45  ;;  %v2263_v46 = vmul.f32 %v529_v39, %v353_v20  ;;  %v2267_v34 = vmul.f32 %v529_v39, %v354_v45 }
  0xcf   :  { %3516 = sst [smem:[#allocation72_spill]] %s2202_s9  ;;  %v2223_v0 = vpop.permute.xlu0 %424  ;;  %v2225_v25 = vpop.permute.xlu1 %984  ;;  %v2275_v32 = vmul.f32 %v606_v40, %v353_v20  ;;  %v2279_v23 = vmul.f32 %v606_v40, %v354_v45  ;;  %v684_v35 = vmul.f32 %v683_v41, %v353_v20  ;;  %v2297_v40 = vmul.f32 %v735_v43, %v354_v45 }
  0xd0   :  { %v2316_v55 = vmul.f32 %v889_v47, %v353_v20  ;;  %s3543_s9 = sld [smem:[#allocation29_spill]] }
  0xd1   :  { %s3549_s15 = sld [smem:[#allocation34_spill]] }
  0xd2   :  { %3535 = vst [vmem:[#allocation87_spill] sm:$0xff] %v2316_v55  ;;  %s3558_s14 = sld [smem:[#allocation31_spill]] }
  0xd3   :  { %v971_v16 = vpop.permute.xlu0 %970  ;;  %v2255_v7 = vpop.permute.xlu1 %995  ;;  %s3560_s30 = sld [smem:[#allocation32_spill]] }
  0xd4   :  { %v975_v38 = vsel %vm314_vm14, %v2053_v59, %v971_v16  ;;  %v978_v57 = vsel %vm314_vm14, %v971_v16, %v2053_v59  ;;  %v685_v16 = vmul.f32 %v683_v41, %v354_v45  ;;  %v2293_v59 = vmul.f32 %v735_v43, %v353_v20  ;;  %s3565_s6 = sld [smem:[#allocation33_spill]] }
  0xd5   :  { %v979_v63 = vsel %vm2174_vm15, %v978_v57, 0.0  ;;  %v2285_v39 = vsel %vm2181_vm0, %v975_v38, 0.0  ;;  %v2308_v38 = vmul.f32 %v812_v44, %v353_v20  ;;  %v2312_v41 = vmul.f32 %v812_v44, %v354_v45  ;;  %s3575_s10 = sld [smem:[#allocation36_spill]] }
  0xd6   :  { %3528 = vst [vmem:[#allocation84_spill] sm:$0xff] %v2285_v39  ;;  %v2320_v43 = vmul.f32 %v889_v47, %v354_v45  ;;  %v2324_v60 = vmul.f32 %v1037_v48, %v979_v63  ;;  %v2329_v21 = vmul.f32 %v1037_v48, %v2285_v39  ;;  %v2333_v44 = vmul.f32 %v1102_v49, %v979_v63 }
  0xd7   :  { %3533 = vst [vmem:[#allocation85_spill] sm:$0xff] %v2308_v38  ;;  %3534 = vst [vmem:[#allocation86_spill] sm:$0xff] %v2312_v41  ;;  %v310_v22 = vpop.permute.xlu0 %309  ;;  %v381_v53 = vpop.permute.xlu1 %380  ;;  %v2338_v20 = vmul.f32 %v1102_v49, %v2285_v39  ;;  %v2356_v49 = vmul.f32 %v1167_v52, %v979_v63  ;;  %v2361_v50 = vmul.f32 %v1167_v52, %v2285_v39  ;;  %v3577_v42 = vstv %s3549_s15  ;;  %s3603_s15 = sld [smem:[#allocation43_spill]] }
  0xd8   :  { %3536 = vst [vmem:[#allocation88_spill] sm:$0xff] %v2320_v43  ;;  %v315_v61 = vsel %vm314_vm14, %v2098_v5, %v310_v22  ;;  %v318_v45 = vsel %vm314_vm14, %v310_v22, %v2098_v5  ;;  %vm2391_vm14 = vcmp.eq.s32.totalorder %v3554_v54, 1  ;;  %v3557_v5 = vstv %s3537_s28  ;;  %s3573_s28 = sld [smem:[#allocation35_spill]] }
  0xd9   :  { %3544 = vst [vmem:[#allocation89_spill] sm:$0xff] %v2356_v49  ;;  %3545 = vst [vmem:[#allocation90_spill] sm:$0xff] %v2361_v50  ;;  %v1233_v13 = vmul.f32 %v3557_v5, %v979_v63  ;;  %v3559_v31 = vmov %v3557_v5  ;;  %v330_v3 = vsel %vm2174_vm15, %v318_v45, 0.0  ;;  %v331_v14 = vsel %vm2181_vm0, %v315_v61, 0.0 }
  0xda   :  { %v1234_v58 = vmul.f32 %v3559_v31, %v2285_v39  ;;  %v3561_v54 = vrot.slane %v2010_v9, %v1925_v30  ;;  %v3564_v5 = vstv %s3538_s8  ;;  %v3569_v45 = vstv %s3543_s9  ;;  %s3580_s8 = sld [smem:[#allocation37_spill]] }
  0xdb   :  { %v2413_v8 = vmul.f32 %v3564_v5, %v979_v63  ;;  %v3567_v31 = vmov %v3564_v5  ;;  %v2422_v19 = vmul.f32 %v3569_v45, %v979_v63  ;;  %v3571_v36 = vmov %v3569_v45  ;;  %v356_v61 = vpop.permute.xlu0 %355  ;;  %s3602_s9 = sld [smem:[#allocation41_spill]] }
  0xdc   :  { %vm2407_vm5 = vcmp.eq.s32.totalorder %v3561_v54, 1  ;;  %v2418_v26 = vmul.f32 %v3567_v31, %v2285_v39  ;;  %v2427_v9 = vmul.f32 %v3571_v36, %v2285_v39  ;;  %v404_v54 = vpop.permute.xlu1 %403  ;;  %v3574_v30 = vstv %s3546_s13 }
  0xdd   :  { %3566 = vst [vmem:[#allocation91_spill] sm:$0xff] %v2413_v8  ;;  %3570 = vst [vmem:[#allocation93_spill] sm:$0xff] %v2422_v19  ;;  %v2431_v5 = vmul.f32 %v3574_v30, %v979_v63  ;;  %v680_v8 = vmul.f32 %v3577_v42, %v330_v3  ;;  %v3578_v31 = vmov %v3577_v42  ;;  %v383_v45 = vsel %vm382_vm1, %v2143_v37, %v381_v53 }
  0xde   :  { %3568 = vst [vmem:[#allocation92_spill] sm:$0xff] %v2418_v26  ;;  %3572 = vst [vmem:[#allocation94_spill] sm:$0xff] %v2427_v9  ;;  %v681_v26 = vmul.f32 %v3578_v31, %v331_v14  ;;  %v3579_v19 = vstv %s3558_s14  ;;  %v3582_v2 = vstv %s3560_s30  ;;  %v387_v30 = vsel %vm382_vm1, %v381_v53, %v2143_v37  ;;  %s3614_s14 = sld [smem:[#allocation46_spill]] }
  0xdf   :  { %3576 = vst [vmem:[#allocation95_spill] sm:$0xff] %v2431_v5  ;;  %v2441_v36 = vmul.f32 %v3579_v19, %v330_v3  ;;  %v3581_v39 = vmov %v3579_v19  ;;  %v2449_v49 = vmul.f32 %v3582_v2, %v330_v3  ;;  %v3583_v42 = vmov %v3582_v2  ;;  %s3618_s30 = sld [smem:[#allocation47_spill]] }
  0xe0   :  { %v2445_v9 = vmul.f32 %v3581_v39, %v331_v14  ;;  %v2455_v63 = vmul.f32 %v3583_v42, %v331_v14  ;;  %v3584_v31 = vstv %s3565_s6  ;;  %v2461_v50 = vadd.f32 %v684_v35, %v680_v8  ;;  %v982_v42 = vpop.permute.xlu0 %981  ;;  %v427_v41 = vpop.permute.xlu1 %426  ;;  %s3598_s6 = sld [smem:[#allocation39_spill]] }
  0xe1   :  { %v2459_v5 = vmul.f32 %v3584_v31, %v330_v3  ;;  %v2463_v19 = vadd.f32 %v685_v16, %v681_v26  ;;  %v3587_v11 = vmov %v3584_v31  ;;  %v3588_v39 = vstv %s3573_s28  ;;  %s3623_s28 = sld [smem:[#allocation48_spill]] }
  0xe2   :  { %3585 = vst [vmem:[#allocation96_spill] sm:$0xff] %v2461_v50  ;;  %v2467_v43 = vmul.f32 %v3587_v11, %v331_v14  ;;  %v2471_v55 = vmul.f32 %v3588_v39, %v330_v3  ;;  %v3589_v2 = vmov %v3588_v39  ;;  %v3590_v53 = vstv %s3575_s10  ;;  %s3601_s10 = sld [smem:[#allocation40_spill]] }
  0xe3   :  { %3586 = vst [vmem:[#allocation97_spill] sm:$0xff] %v2463_v19  ;;  %v2475_v18 = vmul.f32 %v3589_v2, %v331_v14  ;;  %v2479_v37 = vmul.f32 %v3590_v53, %v330_v3  ;;  %v3592_v31 = vmov %v3590_v53  ;;  %v3594_v8 = vstv %s3580_s8  ;;  %s3633_s8 = sld [smem:[#allocation45_spill]] }
  0xe4   :  { %v2483_v38 = vmul.f32 %v3592_v31, %v331_v14  ;;  %v2487_v35 = vmul.f32 %v3594_v8, %v330_v3  ;;  %v3596_v16 = vmov %v3594_v8  ;;  %v364_v26 = vsel %vm360_vm2, %v356_v61, %v2145_v51 }
  0xe5   :  { %3591 = vst [vmem:[#allocation98_spill] sm:$0xff] %v2479_v37  ;;  %v2491_v11 = vmul.f32 %v3596_v16, %v331_v14  ;;  %v2497_v39 = vsel %vm2302_vm3, %v383_v45, 0.0  ;;  %v361_v2 = vsel %vm360_vm2, %v2145_v51, %v356_v61  ;;  %v406_v53 = vsel %vm405_vm4, %v2195_v6, %v404_v54 }
  0xe6   :  { %3593 = vst [vmem:[#allocation99_spill] sm:$0xff] %v2483_v38  ;;  %3595 = vst [vmem:[#allocation100_spill] sm:$0xff] %v2487_v35  ;;  %v410_v3 = vsel %vm405_vm4, %v404_v54, %v2195_v6  ;;  %v986_v14 = vsel %vm337_vm11, %v2225_v25, %v982_v42  ;;  %v989_v31 = vsel %vm337_vm11, %v982_v42, %v2225_v25  ;;  %vm3599_vm15 = vcmask 654336  }
  0xe7   :  { %3597 = vst [vmem:[#allocation101_spill] sm:$0xff] %v2491_v11  ;;  %v429_v45 = vsel %vm3599_vm15, %v2223_v0, %v427_v41  ;;  %vm3600_vm0 = vmmov %vm3599_vm15  ;;  %v2515_v61 = vsel %vm2343_vm6, %v387_v30, 0.0  ;;  %v2519_v6 = vsel %vm2350_vm7, %v364_v26, 0.0  ;;  %v2523_v25 = vsel %vm2118_vm12, %v989_v31, 0.0 }
  0xe8   :  { %v433_v51 = vsel %vm3600_vm0, %v427_v41, %v2223_v0  ;;  %v2527_v54 = vsel %vm2125_vm13, %v986_v14, 0.0  ;;  %v993_v0 = vpop.permute.xlu0 %992  ;;  %v1006_v41 = vpop.permute.xlu1 %1005  ;;  %v2531_v30 = vsel %vm2370_vm8, %v361_v2, 0.0  ;;  %v2535_v42 = vsel %vm2377_vm9, %v406_v53, 0.0  ;;  %vm3635_vm11 = vmmov %vm3600_vm0 }
  0xe9   :  { %v2539_v33 = vsel %vm2384_vm10, %v410_v3, 0.0  ;;  %v2543_v62 = vsel %vm2391_vm14, %v429_v45, 0.0  ;;  %v3604_v8 = vstv %s3598_s6  ;;  %v3605_v26 = vstv %s3470_s7  ;;  %s3612_s7 = sld [smem:[#allocation44_spill]]  ;;  %vm3636_vm12 = vmmov %vm3600_vm0 }
  0xea   :  { %v1042_v16 = vmul.f32 %v3604_v8, %v2523_v25  ;;  %v1237_v14 = vmul.f32 %v3605_v26, %v2523_v25  ;;  %v3606_v2 = vmov %v3605_v26  ;;  %v2556_v53 = vsel %vm2407_vm5, %v433_v51, 0.0  ;;  %s3640_s6 = sld [smem:[#allocation52_spill]] }
  0xeb   :  { %v1238_v31 = vmul.f32 %v3606_v2, %v2527_v54  ;;  %v3607_v3 = vmov %v3604_v8  ;;  %v3608_v50 = vstv %s3601_s10  ;;  %v3610_v8 = vstv %s3602_s9  ;;  %s3645_s10 = sld [smem:[#allocation53_spill]] }
  0xec   :  { %v1043_v19 = vmul.f32 %v3607_v3, %v2527_v54  ;;  %v1107_v45 = vmul.f32 %v3608_v50, %v2523_v25  ;;  %v3609_v11 = vmov %v3608_v50  ;;  %v2570_v26 = vmul.f32 %v3610_v8, %v2523_v25  ;;  %v1017_v27 = vpop.permute.xlu1 %1016  ;;  %s3655_s9 = sld [smem:[#allocation58_spill]] }
  0xed   :  { %v1108_v35 = vmul.f32 %v3609_v11, %v2527_v54  ;;  %v3611_v2 = vmov %v3610_v8  ;;  %v2577_v51 = vadd.f32 %v1237_v14, %v1233_v13  ;;  %v2579_v3 = vadd.f32 %v1238_v31, %v1234_v58  ;;  %v1004_v11 = vpop.permute.xlu0 %1003 }
  0xee   :  { %v2575_v38 = vmul.f32 %v3611_v2, %v2527_v54  ;;  %v3616_v50 = vstv %s3603_s15  ;;  %v997_v8 = vsel %vm360_vm2, %v2255_v7, %v993_v0  ;;  %v1000_v2 = vsel %vm360_vm2, %v993_v0, %v2255_v7 }
  0xef   :  { %3613 = vst [vmem:[#allocation102_spill] sm:$0xff] %v2577_v51  ;;  %3615 = vst [vmem:[#allocation103_spill] sm:$0xff] %v2579_v3  ;;  %v2584_v37 = vmul.f32 %v3616_v50, %v2523_v25  ;;  %v1007_v13 = vsel %vm382_vm1, %v1004_v11, %v1006_v41  ;;  %v1011_v58 = vsel %vm382_vm1, %v1006_v41, %v1004_v11  ;;  %v2594_v14 = vsel %vm2350_vm7, %v1000_v2, 0.0 }
  0xf0   :  { %v2598_v31 = vsel %vm2370_vm8, %v997_v8, 0.0  ;;  %v2602_v50 = vsel %vm2302_vm3, %v1007_v13, 0.0  ;;  %v2606_v3 = vsel %vm2343_vm6, %v1011_v58, 0.0  ;;  %v3619_v7 = vstv %s3603_s15  ;;  %s3659_s15 = sld [smem:[#allocation59_spill]] }
  0xf1   :  { %3617 = vst [vmem:[#allocation104_spill] sm:$0xff] %v2584_v37  ;;  %v2611_v0 = vmul.f32 %v3619_v7, %v2527_v54  ;;  %v3621_v48 = vstv %s3612_s7  ;;  %v1045_v1 = vadd.f32 %v1043_v19, %v2329_v21  ;;  %v3624_v11 = vstv %s3614_s14  ;;  %v1015_v8 = vpop.permute.xlu0 %1014  ;;  %s3666_s14 = sld [smem:[#allocation60_spill]] }
  0xf2   :  { %v2616_v41 = vmul.f32 %v3621_v48, %v2523_v25  ;;  %v1049_v57 = vmul.f32 %v3624_v11, %v2598_v31  ;;  %v3625_v47 = vstv %s3618_s30  ;;  %v1044_v13 = vadd.f32 %v1042_v16, %v2324_v60  ;;  %v1028_v16 = vpop.permute.xlu1 %1027  ;;  %s3675_s30 = sld [smem:[#allocation63_spill]] }
  0xf3   :  { %3620 = vst [vmem:[#allocation105_spill] sm:$0xff] %v2611_v0  ;;  %v1071_v2 = vmul.f32 %v3625_v47, %v2606_v3  ;;  %v3626_v58 = vmov %v3624_v11  ;;  %v3627_v48 = vmov %v3625_v47  ;;  %v1018_v21 = vsel %vm405_vm4, %v1015_v8, %v1017_v27 }
  0xf4   :  { %3622 = vst [vmem:[#allocation106_spill] sm:$0xff] %v2616_v41  ;;  %v1048_v7 = vmul.f32 %v3626_v58, %v2594_v14  ;;  %v1070_v51 = vmul.f32 %v3627_v48, %v2602_v50  ;;  %v1022_v19 = vsel %vm405_vm4, %v1017_v27, %v1015_v8  ;;  %v1051_v11 = vadd.f32 %v1049_v57, %v1045_v1 }
  0xf5   :  { %v1110_v41 = vadd.f32 %v1108_v35, %v2338_v20  ;;  %v2637_v47 = vsel %vm2377_vm9, %v1018_v21, 0.0  ;;  %v2641_v60 = vsel %vm2384_vm10, %v1022_v19, 0.0  ;;  %v3628_v48 = vstv %s3623_s28  ;;  %v1026_v8 = vpop.permute.xlu0 %1025 }
  0xf6   :  { %v1050_v58 = vadd.f32 %v1048_v7, %v1044_v13  ;;  %v1114_v0 = vmul.f32 %v3628_v48, %v2598_v31  ;;  %v3629_v37 = vstv %s3612_s7  ;;  %v3630_v20 = vcombine.high %v2035_v24, %v2035_v24  ;;  %s1742_s7 = smov 2  }
  0xf7   :  { %v2649_v27 = vmul.f32 %v3629_v37, %v2527_v54  ;;  %v3631_v35 = vstv %s3477_s22  ;;  %v3634_v37 = vstv %s3478_s19  ;;  %v1109_v19 = vadd.f32 %v1107_v45, %v2333_v44  ;;  %s3638_s22 = sld [smem:[#allocation54_spill]] }
  0xf8   :  { %v1067_v52 = vadd.f32 %v3630_v20, %v1051_v11  ;;  %v1077_v1 = vmul.f32 %v3631_v35, %v2641_v60  ;;  %v3632_v22 = vmov %v3631_v35  ;;  %v1066_v13 = vadd.f32 %v2035_v24, %v1050_v58 }
  0xf9   :  { %v1076_v57 = vmul.f32 %v3632_v22, %v2637_v47  ;;  %v1116_v7 = vadd.f32 %v1114_v0, %v1110_v41  ;;  %v1136_v21 = vmul.f32 %v3634_v37, %v2606_v3  ;;  %v1029_v11 = vsel %vm3635_vm11, %v1026_v8, %v1028_v16 }
  0xfa   :  { %v1033_v48 = vsel %vm3636_vm12, %v1028_v16, %v1026_v8  ;;  %v1073_v20 = vadd.f32 %v1071_v2, %v1067_v52  ;;  %v3637_v35 = vstv %s3623_s28  ;;  %v2672_v24 = vsel %vm2391_vm14, %v1029_v11, 0.0  ;;  %s3677_s28 = sld [smem:[#allocation64_spill]] }
  0xfb   :  { %v1113_v22 = vmul.f32 %v3637_v35, %v2594_v14  ;;  %v2676_v0 = vsel %vm2407_vm5, %v1033_v48, 0.0  ;;  %v1072_v44 = vadd.f32 %v1070_v51, %v1066_v13  ;;  %v3639_v45 = vcombine.high %v2043_v28, %v2043_v28 }
  0xfc   :  { %v1079_v2 = vadd.f32 %v1077_v1, %v1073_v20  ;;  %v3641_v16 = vstv %s1889_s29  ;;  %v3643_v8 = vstv %s3480_s25  ;;  %v3644_v29 = vstv %s3633_s8  ;;  %s3649_s29 = sld [smem:[#allocation57_spill]] }
  0xfd   :  { %v1132_v41 = vadd.f32 %v3639_v45, %v1116_v7  ;;  %v1083_v58 = vmul.f32 %v3641_v16, %v2676_v0  ;;  %v3642_v4 = vmov %v3641_v16  ;;  %v1142_v37 = vmul.f32 %v3643_v8, %v2641_v60  ;;  %s3652_s25 = sld [smem:[#allocation56_spill]] }
  0xfe   :  { %v1082_v52 = vmul.f32 %v3642_v4, %v2672_v24  ;;  %v2693_v11 = vmul.f32 %v3644_v29, %v2523_v25  ;;  %v1078_v51 = vadd.f32 %v1076_v57, %v1072_v44  ;;  %v1115_v13 = vadd.f32 %v1113_v22, %v1109_v19  ;;  %s3686_s8 = sld [smem:[#allocation68_spill]] }
  0xff   :  { %v3646_v1 = vstv %s3478_s19  ;;  %v1085_v48 = vadd.f32 %v1083_v58, %v1079_v2  ;;  %v1138_v20 = vadd.f32 %v1136_v21, %v1132_v41  ;;  %v3647_v35 = vstv %s3638_s22  ;;  %s1741_s19 = smov 3   ;;  %s3699_s22 = sld [smem:[#allocation71_spill]] }
 0x100   :  { %v1135_v7 = vmul.f32 %v3646_v1, %v2602_v50  ;;  %v1148_v45 = vmul.f32 %v3647_v35, %v2676_v0  ;;  %v3648_v16 = vmov %v3643_v8  ;;  %v1084_v8 = vadd.f32 %v1082_v52, %v1078_v51 }
 0x101   :  { %v1141_v4 = vmul.f32 %v3648_v16, %v2637_v47  ;;  %v1131_v25 = vadd.f32 %v2043_v28, %v1115_v13  ;;  %v456_v57 = vadd.f32 %v2253_v12, %v2445_v9  ;;  %v3650_v19 = vstv %s3640_s6  ;;  %1087 = vrot.lane.b32.xlu0 %v1085_v48, %s1741_s19  ;;  %s1743_s6 = smov 1  }
 0x102   :  { %v460_v22 = vmul.f32 %v3650_v19, %v2531_v30  ;;  %v3651_v21 = vmov %v3644_v29  ;;  %v1144_v41 = vadd.f32 %v1142_v37, %v1138_v20  ;;  %v3653_v2 = vmov %v3647_v35  ;;  %1091 = vrot.lane.b32.xlu1 %v1084_v8, %s1741_s19 }
 0x103   :  { %v2713_v44 = vmul.f32 %v3651_v21, %v2527_v54  ;;  %v1147_v58 = vmul.f32 %v3653_v2, %v2672_v24  ;;  %v3654_v28 = vstv %s3645_s10  ;;  %v1137_v12 = vadd.f32 %v1135_v7, %v1131_v25  ;;  %s3047_s10 = sld [smem:[#allocation4 + $0x42]] }
 0x104   :  { %v482_v52 = vmul.f32 %v3654_v28, %v2515_v61  ;;  %v462_v9 = vadd.f32 %v460_v22, %v456_v57  ;;  %v455_v54 = vadd.f32 %v2249_v56, %v2441_v36  ;;  %v3656_v29 = vmov %v3650_v19 }
 0x105   :  { %v459_v37 = vmul.f32 %v3656_v29, %v2519_v6  ;;  %v1150_v51 = vadd.f32 %v1148_v45, %v1144_v41  ;;  %v3657_v13 = vstv %s3486_s18  ;;  %v3658_v48 = vstv %s3649_s29  ;;  %s3673_s18 = sld [smem:[#allocation62_spill]] }
 0x106   :  { %v488_v1 = vmul.f32 %v3657_v13, %v2539_v33  ;;  %v494_v20 = vmul.f32 %v3658_v48, %v2556_v53  ;;  %v533_v7 = vadd.f32 %v2267_v34, %v2455_v63  ;;  %v1143_v35 = vadd.f32 %v1141_v4, %v1137_v12  ;;  %s3055_s29 = sld [smem:[#allocation4 + $0x2d]] }
 0x107   :  { %v3660_v16 = vcombine.high %v2059_v10, %v2059_v10  ;;  %v461_v36 = vadd.f32 %v459_v37, %v455_v54  ;;  %v3661_v45 = vstv %s3652_s25  ;;  %1152 = vrot.lane.b32.xlu0 %v1150_v51, %s1742_s7  ;;  %v3662_v25 = vmov %v3654_v28  ;;  %s3135_s25 = sld [smem:[#allocation4 + $0x50]] }
 0x108   :  { %v537_v8 = vmul.f32 %v3661_v45, %v2531_v30  ;;  %v481_v57 = vmul.f32 %v3662_v25, %v2497_v39  ;;  %v3663_v19 = vmov %v3657_v13  ;;  %v3664_v63 = vmov %v3658_v48 }
 0x109   :  { %v478_v56 = vadd.f32 %v3660_v16, %v462_v9  ;;  %v487_v34 = vmul.f32 %v3663_v19, %v2535_v42  ;;  %v493_v4 = vmul.f32 %v3664_v63, %v2543_v62  ;;  %v3665_v22 = vstv %s3655_s9  ;;  %s3141_s9 = sld [smem:[#allocation4 + $0x57]] }
 0x10a   :  { %v559_v21 = vmul.f32 %v3665_v22, %v2515_v61  ;;  %v1149_v41 = vadd.f32 %v1147_v58, %v1143_v35  ;;  %v477_v28 = vadd.f32 %v2059_v10, %v461_v36  ;;  %v539_v12 = vadd.f32 %v537_v8, %v533_v7 }
 0x10b   :  { %v484_v2 = vadd.f32 %v482_v52, %v478_v56  ;;  %v3667_v9 = vstv %s3659_s15  ;;  %v3668_v29 = vstv %s3490_s0  ;;  %v532_v51 = vadd.f32 %v2263_v46, %v2449_v49  ;;  %s3684_s0 = sld [smem:[#allocation67_spill]] }
 0x10c   :  { %v565_v54 = vmul.f32 %v3667_v9, %v2539_v33  ;;  %v571_v37 = vmul.f32 %v3668_v29, %v2556_v53  ;;  %v3669_v13 = vmov %v3661_v45  ;;  %1156 = vrot.lane.b32.xlu1 %v1149_v41, %s1742_s7  ;;  %v483_v52 = vadd.f32 %v481_v57, %v477_v28  ;;  %s3167_s15 = sld [smem:[#allocation4 + $0x5e]] }
 0x10d   :  { %v536_v48 = vmul.f32 %v3669_v13, %v2519_v6  ;;  %v490_v58 = vadd.f32 %v488_v1, %v484_v2  ;;  %v3670_v10 = vcombine.high %v2080_v15, %v2080_v15  ;;  %v3671_v35 = vmov %v3665_v22 }
 0x10e   :  { %v558_v16 = vmul.f32 %v3671_v35, %v2497_v39  ;;  %v3672_v36 = vmov %v3667_v9  ;;  %v610_v49 = vadd.f32 %v2279_v23, %v2467_v43  ;;  %v3674_v45 = vstv %s3666_s14 }
 0x10f   :  { %v555_v7 = vadd.f32 %v3670_v10, %v539_v12  ;;  %v538_v56 = vadd.f32 %v536_v48, %v532_v51  ;;  %v564_v46 = vmul.f32 %v3672_v36, %v2535_v42  ;;  %v614_v1 = vmul.f32 %v3674_v45, %v2531_v30 }
 0x110   :  { %v496_v8 = vadd.f32 %v494_v20, %v490_v58  ;;  %v489_v25 = vadd.f32 %v487_v34, %v483_v52  ;;  %v3676_v19 = vmov %v3668_v29  ;;  %v609_v2 = vadd.f32 %v2275_v32, %v2459_v5 }
 0x111   :  { %v561_v57 = vadd.f32 %v559_v21, %v555_v7  ;;  %v570_v63 = vmul.f32 %v3676_v19, %v2543_v62  ;;  %v554_v22 = vadd.f32 %v2080_v15, %v538_v56  ;;  %v616_v41 = vadd.f32 %v614_v1, %v610_v49  ;;  %v3691_v19 = vld [vmem:[#allocation76_spill] sm:$0xff] }
 0x112   :  { %v3678_v23 = vmov %v3674_v45  ;;  %498 = vrot.lane.b32.xlu0 %v496_v8, %s1741_s19  ;;  %v495_v28 = vadd.f32 %v493_v4, %v489_v25  ;;  %v3679_v34 = vstv %s1913_s23  ;;  %v3680_v12 = vstv %s3673_s18  ;;  %s3694_s23 = sld [smem:[#allocation70_spill]] }
 0x113   :  { %v613_v43 = vmul.f32 %v3678_v23, %v2519_v6  ;;  %v567_v20 = vadd.f32 %v565_v54, %v561_v57  ;;  %v636_v21 = vmul.f32 %v3679_v34, %v2515_v61  ;;  %v642_v15 = vmul.f32 %v3680_v12, %v2539_v33 }
 0x114   :  { %v560_v9 = vadd.f32 %v558_v16, %v554_v22  ;;  %v3681_v29 = vcombine.high %v2101_v17, %v2101_v17  ;;  %v3682_v5 = vstv %s3675_s30  ;;  %502 = vrot.lane.b32.xlu1 %v495_v28, %s1741_s19  ;;  %v3683_v54 = vmov %v3679_v34  ;;  %v3695_v28 = vld [vmem:[#allocation98_spill] sm:$0xff]  ;;  %s1591_s19 = sld [smem:[#allocation4 + $0x49]] }
 0x115   :  { %v648_v51 = vmul.f32 %v3682_v5, %v2556_v53  ;;  %v615_v13 = vadd.f32 %v613_v43, %v609_v2  ;;  %v573_v4 = vadd.f32 %v571_v37, %v567_v20  ;;  %v635_v48 = vmul.f32 %v3683_v54, %v2497_v39  ;;  %v3696_v20 = vld [vmem:[#allocation85_spill] sm:$0xff] }
 0x116   :  { %v632_v32 = vadd.f32 %v3681_v29, %v616_v41  ;;  %v738_v58 = vadd.f32 %v2293_v59, %v2471_v55  ;;  %v3685_v52 = vstv %s3677_s28  ;;  %v566_v7 = vadd.f32 %v564_v46, %v560_v9 }
 0x117   :  { %v742_v10 = vmul.f32 %v3685_v52, %v2519_v6  ;;  %v631_v16 = vadd.f32 %v2101_v17, %v615_v13  ;;  %v3687_v56 = vmov %v3680_v12  ;;  %575 = vrot.lane.b32.xlu0 %v573_v4, %s1742_s7  ;;  %v3688_v37 = vmov %v3682_v5 }
 0x118   :  { %v638_v35 = vadd.f32 %v636_v21, %v632_v32  ;;  %v641_v36 = vmul.f32 %v3687_v56, %v2535_v42  ;;  %v647_v49 = vmul.f32 %v3688_v37, %v2543_v62  ;;  %v739_v55 = vadd.f32 %v2297_v40, %v2475_v18  ;;  %v3705_v56 = vld [vmem:[#allocation86_spill] sm:$0xff] }
 0x119   :  { %v744_v45 = vadd.f32 %v742_v10, %v738_v58  ;;  %v3689_v59 = vmov %v3685_v52  ;;  %v572_v46 = vadd.f32 %v570_v63, %v566_v7  ;;  %v637_v8 = vadd.f32 %v635_v48, %v631_v16  ;;  %v3704_v16 = vld [vmem:[#allocation99_spill] sm:$0xff] }
 0x11a   :  { %v743_v1 = vmul.f32 %v3689_v59, %v2531_v30  ;;  %v644_v17 = vadd.f32 %v642_v15, %v638_v35  ;;  %v3690_v25 = vstv %s3684_s0  ;;  %v3692_v41 = vstv %s3686_s8 }
 0x11b   :  { %v764_v57 = vmul.f32 %v3690_v25, %v2497_v39  ;;  %v760_v22 = vadd.f32 %v3691_v19, %v744_v45  ;;  %v770_v2 = vmul.f32 %v3692_v41, %v2535_v42  ;;  %v3693_v23 = vstv %s3500_s2  ;;  %579 = vrot.lane.b32.xlu1 %v572_v46, %s1742_s7  ;;  %s3731_s2 = sld [smem:[#allocation42_spill]]  ;;  %s1747_s7 = smov [#allocation11]  }
 0x11c   :  { %v776_v18 = vmul.f32 %v3693_v23, %v2543_v62  ;;  %v745_v40 = vadd.f32 %v743_v1, %v739_v55  ;;  %v650_v63 = vadd.f32 %v648_v51, %v644_v17  ;;  %v643_v43 = vadd.f32 %v641_v36, %v637_v8  ;;  %v3710_v8 = vld [vmem:[#allocation100_spill] sm:$0xff]  ;;  %s1508_s14 = sshll.u32 %s1747_s7, 4  ;;  %s1509_s14 = int_to_ptr.vmem [resolvable:$true] %s1508_s14 }
 0x11d   :  { %v815_v34 = vadd.f32 %v3696_v20, %v3695_v28  ;;  %v3697_v21 = vstv %s1946_s24  ;;  %v766_v15 = vadd.f32 %v764_v57, %v760_v22  ;;  %v3698_v9 = vcombine.high %v3691_v19, %v3691_v19  ;;  %s1744_s24 = smov 127   ;;  %s1699_s18 = scalar_lea.vmem %s1509_s14, 64 }
 0x11e   :  { %v819_v12 = vmul.f32 %v3697_v21, %v2519_v6  ;;  %v3700_v32 = vmov %v3690_v25  ;;  %v3701_v51 = vmov %v3692_v41  ;;  %652 = vrot.lane.b32.xlu0 %v650_v63, %s1743_s6  ;;  %v649_v4 = vadd.f32 %v647_v49, %v643_v43  ;;  %v3707_v49 = vld [vmem:[#allocation77_spill] sm:$0xff]  ;;  %v3711_v25 = vld [vmem:[#allocation87_spill] sm:$0xff]  ;;  %p1700_p10 = scmp.ne.s32.totalorder %s1509_s14, %s1699_s18  ;;  %p1704_p11 = scmp.lt.s32.totalorder %s1509_s14, %s1509_s14 }
 0x11f   :  { %v761_v29 = vadd.f32 %v3698_v9, %v745_v40  ;;  %v765_v5 = vmul.f32 %v3700_v32, %v2515_v61  ;;  %v771_v13 = vmul.f32 %v3701_v51, %v2539_v33  ;;  %v3702_v54 = vmov %v3693_v23  ;;  %p1705_p12 = scmp.lt.s32.totalorder %s1699_s18, %s1699_s18 }
 0x120   :  { %v777_v48 = vmul.f32 %v3702_v54, %v2556_v53  ;;  %v821_v58 = vadd.f32 %v819_v12, %v815_v34  ;;  %v3703_v52 = vstv %s3694_s23  ;;  %v772_v7 = vadd.f32 %v770_v2, %v766_v15  ;;  %656 = vrot.lane.b32.xlu1 %v649_v4, %s1743_s6  ;;  %v3720_v4 = vld [vmem:[#allocation101_spill] sm:$0xff]  ;;  %v3721_v54 = vld [vmem:[#allocation88_spill] sm:$0xff] }
 0x121   :  { %v841_v10 = vmul.f32 %v3703_v52, %v2497_v39  ;;  %v767_v35 = vadd.f32 %v765_v5, %v761_v29  ;;  %v816_v36 = vadd.f32 %v3705_v56, %v3704_v16  ;;  %v3706_v37 = vmov %v3697_v21  ;;  %p1706_p13 = por %p1705_p12, %p1704_p11 }
 0x122   :  { %v820_v45 = vmul.f32 %v3706_v37, %v2531_v30  ;;  %v837_v55 = vadd.f32 %v3707_v49, %v821_v58  ;;  %v3708_v59 = vstv %s3699_s22  ;;  %v3709_v46 = vstv %s1982_s12  ;;  %s3719_s12 = sld [smem:[#allocation50_spill]] }
 0x123   :  { %v847_v1 = vmul.f32 %v3708_v59, %v2535_v42  ;;  %v853_v17 = vmul.f32 %v3709_v46, %v2543_v62  ;;  %v892_v57 = vadd.f32 %v3711_v25, %v3710_v8  ;;  %v778_v19 = vadd.f32 %v776_v18, %v772_v7  ;;  %v3723_v7 = vld [vmem:[#allocation78_spill] sm:$0xff]  ;;  %p1707_p0 = pnand %p1706_p13, %p1700_p10 }
 0x124   :  { %v773_v22 = vadd.f32 %v771_v13, %v767_v35  ;;  %v822_v41 = vadd.f32 %v820_v45, %v816_v36  ;;  %v3712_v2 = vstv %s3504_s16  ;;  %v843_v40 = vadd.f32 %v841_v10, %v837_v55  ;;  %v3726_v55 = vld [vmem:[#allocation90_spill] sm:$0xff]  ;;  %s1745_s16 = smov 126  }
 0x125   :  { %v896_v23 = vmul.f32 %v3712_v2, %v2519_v6  ;;  %v3713_v63 = vmov %v3703_v52  ;;  %v3714_v28 = vmov %v3708_v59  ;;  %v3715_v34 = vmov %v3709_v46  ;;  %782 = vrot.lane.b32.xlu0 %v778_v19, %s1744_s24 }
 0x126   :  { %v842_v43 = vmul.f32 %v3713_v63, %v2515_v61  ;;  %v848_v20 = vmul.f32 %v3714_v28, %v2539_v33  ;;  %v854_v21 = vmul.f32 %v3715_v34, %v2556_v53  ;;  %v779_v18 = vadd.f32 %v777_v48, %v773_v22 }
 0x127   :  { %v3716_v12 = vcombine.high %v3707_v49, %v3707_v49  ;;  %v898_v9 = vadd.f32 %v896_v23, %v892_v57  ;;  %v3717_v29 = vstv %s3505_s11  ;;  %v849_v5 = vadd.f32 %v847_v1, %v843_v40  ;;  %v3732_v23 = vld [vmem:[#allocation89_spill] sm:$0xff]  ;;  %s3738_s11 = sld [smem:[#allocation49_spill]] }
 0x128   :  { %v918_v32 = vmul.f32 %v3717_v29, %v2497_v39  ;;  %v3718_v51 = vstv %s3506_s20  ;;  %v893_v58 = vadd.f32 %v3721_v54, %v3720_v4  ;;  %v3722_v48 = vmov %v3712_v2  ;;  %784 = vrot.lane.b32.xlu1 %v779_v18, %s1744_s24  ;;  %s3763_s20 = sld [smem:[#allocation69_spill]] }
 0x129   :  { %v838_v15 = vadd.f32 %v3716_v12, %v822_v41  ;;  %v924_v13 = vmul.f32 %v3718_v51, %v2535_v42  ;;  %v897_v52 = vmul.f32 %v3722_v48, %v2531_v30  ;;  %v914_v35 = vadd.f32 %v3723_v7, %v898_v9  ;;  %v3742_v48 = vld [vmem:[#allocation104_spill] sm:$0xff] }
 0x12a   :  { %v3724_v16 = vstv %s3508_s26  ;;  %v3725_v36 = vmov %v3717_v29  ;;  %v855_v45 = vadd.f32 %v853_v17, %v849_v5  ;;  %v1175_v59 = vadd.f32 %v2575_v38, %v3726_v55  ;;  %v3736_v29 = vld [vmem:[#allocation79_spill] sm:$0xff]  ;;  %s3746_s26 = sld [smem:[#allocation51_spill]] }
 0x12b   :  { %v844_v10 = vadd.f32 %v842_v43, %v838_v15  ;;  %v930_v56 = vmul.f32 %v3724_v16, %v2543_v62  ;;  %v919_v37 = vmul.f32 %v3725_v36, %v2515_v61  ;;  %v899_v49 = vadd.f32 %v897_v52, %v893_v58  ;;  %v3741_v58 = vld [vmem:[#allocation91_spill] sm:$0xff] }
 0x12c   :  { %v3727_v1 = vstv %s2037_s17  ;;  %v920_v25 = vadd.f32 %v918_v32, %v914_v35  ;;  %v3728_v57 = vmov %v3718_v51  ;;  %v3729_v22 = vstv %s3719_s12  ;;  %859 = vrot.lane.b32.xlu0 %v855_v45, %s1745_s16  ;;  %s1746_s17 = smov 125  }
 0x12d   :  { %v1179_v46 = vmul.f32 %v3727_v1, %v2598_v31  ;;  %v850_v8 = vadd.f32 %v848_v20, %v844_v10  ;;  %v925_v19 = vmul.f32 %v3728_v57, %v2539_v33  ;;  %v1201_v41 = vmul.f32 %v3729_v22, %v2606_v3 }
 0x12e   :  { %v3730_v17 = vcombine.high %v3723_v7, %v3723_v7  ;;  %v1174_v40 = vadd.f32 %v2570_v26, %v3732_v23  ;;  %v3733_v63 = vmov %v3727_v1  ;;  %v926_v20 = vadd.f32 %v924_v13, %v920_v25  ;;  %v3748_v1 = vld [vmem:[#allocation105_spill] sm:$0xff] }
 0x12f   :  { %v1181_v2 = vadd.f32 %v1179_v46, %v1175_v59  ;;  %v1178_v43 = vmul.f32 %v3733_v63, %v2594_v14  ;;  %v856_v28 = vadd.f32 %v854_v21, %v850_v8  ;;  %v3734_v34 = vmov %v3724_v16  ;;  %v3747_v59 = vld [vmem:[#allocation92_spill] sm:$0xff] }
 0x130   :  { %v915_v38 = vadd.f32 %v3730_v17, %v899_v49  ;;  %v931_v18 = vmul.f32 %v3734_v34, %v2556_v53  ;;  %v3735_v12 = vstv %s2090_s3  ;;  %v3737_v32 = vcombine.high %v3736_v29, %v3736_v29  ;;  %s3761_s3 = sld [smem:[#allocation55_spill]] }
 0x131   :  { %v1207_v15 = vmul.f32 %v3735_v12, %v2641_v60  ;;  %v1180_v51 = vadd.f32 %v1178_v43, %v1174_v40  ;;  %v3739_v26 = vmov %v3729_v22  ;;  %861 = vrot.lane.b32.xlu1 %v856_v28, %s1745_s16  ;;  %v932_v21 = vadd.f32 %v930_v56, %v926_v20 }
 0x132   :  { %v921_v9 = vadd.f32 %v919_v37, %v915_v38  ;;  %v1197_v5 = vadd.f32 %v3737_v32, %v1181_v2  ;;  %v1200_v4 = vmul.f32 %v3739_v26, %v2602_v50  ;;  %v3740_v13 = vstv %s2096_s5  ;;  %v3751_v38 = vld [vmem:[#allocation80_spill] sm:$0xff]  ;;  %s2978_s5 = sld [smem:[#allocation4 + $0x61]] }
 0x133   :  { %v1213_v54 = vmul.f32 %v3740_v13, %v2676_v0  ;;  %v1291_v52 = vadd.f32 %v3742_v48, %v3741_v58  ;;  %v3743_v10 = vstv %s3731_s2  ;;  %v1196_v36 = vadd.f32 %v3736_v29, %v1180_v51  ;;  %936 = vrot.lane.b32.xlu0 %v932_v21, %s1746_s17 }
 0x134   :  { %v1295_v7 = vmul.f32 %v3743_v10, %v2594_v14  ;;  %v927_v35 = vadd.f32 %v925_v19, %v921_v9  ;;  %v1203_v16 = vadd.f32 %v1201_v41, %v1197_v5  ;;  %v3744_v37 = vmov %v3735_v12  ;;  %v3755_v12 = vld [vmem:[#allocation106_spill] sm:$0xff] }
 0x135   :  { %v1206_v45 = vmul.f32 %v3744_v37, %v2637_v47  ;;  %v3745_v49 = vstv %s3738_s11  ;;  %v1292_v46 = vadd.f32 %v3748_v1, %v3747_v59  ;;  %v3749_v8 = vmov %v3743_v10 }
 0x136   :  { %v1297_v56 = vadd.f32 %v1295_v7, %v1291_v52  ;;  %v1317_v55 = vmul.f32 %v3745_v49, %v2602_v50  ;;  %v1296_v25 = vmul.f32 %v3749_v8, %v2598_v31  ;;  %v933_v57 = vadd.f32 %v931_v18, %v927_v35  ;;  %v3754_v18 = vld [vmem:[#allocation93_spill] sm:$0xff] }
 0x137   :  { %v1209_v19 = vadd.f32 %v1207_v15, %v1203_v16  ;;  %v1202_v22 = vadd.f32 %v1200_v4, %v1196_v36  ;;  %v3750_v41 = vmov %v3740_v13  ;;  %v3752_v23 = vstv %s2106_s4  ;;  %v3764_v36 = vld [vmem:[#allocation94_spill] sm:$0xff]  ;;  %s3768_s4 = sld [smem:[#allocation61_spill]] }
 0x138   :  { %v1212_v17 = vmul.f32 %v3750_v41, %v2672_v24  ;;  %v1313_v2 = vadd.f32 %v3751_v38, %v1297_v56  ;;  %v1323_v40 = vmul.f32 %v3752_v23, %v2637_v47  ;;  %v1298_v63 = vadd.f32 %v1296_v25, %v1292_v46  ;;  %938 = vrot.lane.b32.xlu1 %v933_v57, %s1746_s17  ;;  %v3770_v25 = vld [vmem:[#allocation95_spill] sm:$0xff] }
 0x139   :  { %v3753_v43 = vmov %v3745_v49  ;;  %v1215_v20 = vadd.f32 %v1213_v54, %v1209_v19  ;;  %v1208_v34 = vadd.f32 %v1206_v45, %v1202_v22  ;;  %v1356_v15 = vadd.f32 %v3755_v12, %v3754_v18  ;;  %v3766_v49 = vld [vmem:[#allocation81_spill] sm:$0xff] }
 0x13a   :  { %v1318_v28 = vmul.f32 %v3753_v43, %v2606_v3  ;;  %v3756_v9 = vstv %s3746_s26  ;;  %v1319_v32 = vadd.f32 %v1317_v55, %v1313_v2  ;;  %v3757_v5 = vstv %s2134_s1  ;;  %s3030_s1 = sld [smem:[#allocation4 + $0x1f]] }
 0x13b   :  { %v1360_v29 = vmul.f32 %v3756_v9, %v2594_v14  ;;  %v1329_v51 = vmul.f32 %v3757_v5, %v2672_v24  ;;  %v3758_v26 = vcombine.high %v3751_v38, %v3751_v38  ;;  %v3759_v21 = vmov %v3752_v23  ;;  %1217 = vrot.lane.b32.xlu0 %v1215_v20, %s1743_s6  ;;  %v3772_v38 = vld [vmem:[#allocation84_spill] sm:$0xff] }
 0x13c   :  { %v1324_v13 = vmul.f32 %v3759_v21, %v2641_v60  ;;  %v1214_v54 = vadd.f32 %v1212_v17, %v1208_v34  ;;  %v3760_v58 = vmov %v3757_v5  ;;  %v3762_v10 = vstv %s2113_s27  ;;  %s3776_s27 = sld [smem:[#allocation72_spill]] }
 0x13d   :  { %v1314_v4 = vadd.f32 %v3758_v26, %v1298_v63  ;;  %v1330_v48 = vmul.f32 %v3760_v58, %v2676_v0  ;;  %v1362_v52 = vadd.f32 %v1360_v29, %v1356_v15  ;;  %v1382_v7 = vmul.f32 %v3762_v10, %v2602_v50 }
 0x13e   :  { %v1325_v35 = vadd.f32 %v1323_v40, %v1319_v32  ;;  %v1357_v37 = vadd.f32 %v2649_v27, %v3764_v36  ;;  %v3765_v45 = vmov %v3756_v9  ;;  %1221 = vrot.lane.b32.xlu1 %v1214_v54, %s1743_s6  ;;  %v3767_v59 = vstv %s2141_s21  ;;  %s3780_s21 = sld [smem:[#allocation38_spill]]  ;;  %v3782_v54 = vld [vmem:[#allocation82_spill] sm:$0xff] }
 0x13f   :  { %v1320_v16 = vadd.f32 %v1318_v28, %v1314_v4  ;;  %v1361_v56 = vmul.f32 %v3765_v45, %v2598_v31  ;;  %v1378_v55 = vadd.f32 %v3766_v49, %v1362_v52  ;;  %v1388_v1 = vmul.f32 %v3767_v59, %v2637_v47  ;;  %v3785_v45 = vld [vmem:[#allocation16_spill] sm:$0xff] }
 0x140   :  { %v3769_v46 = vmov %v3762_v10  ;;  %v1421_v57 = vadd.f32 %v2693_v11, %v3770_v25  ;;  %v1331_v19 = vadd.f32 %v1329_v51, %v1325_v35  ;;  %v3771_v41 = vstv %s3761_s3 }
 0x141   :  { %v1383_v8 = vmul.f32 %v3769_v46, %v2606_v3  ;;  %v1326_v27 = vadd.f32 %v1324_v13, %v1320_v16  ;;  %v1363_v22 = vadd.f32 %v1361_v56, %v1357_v37  ;;  %v1425_v17 = vmul.f32 %v3771_v41, %v2594_v14  ;;  %v3786_v56 = vld [vmem:[#allocation83_spill] sm:$0xff] }
 0x142   :  { %v3773_v2 = vstv %s3546_s13  ;;  %v1384_v40 = vadd.f32 %v1382_v7, %v1378_v55  ;;  %v3774_v63 = vstv %s3763_s20  ;;  %v3775_v28 = vmov %v3767_v59  ;;  %1335 = vrot.lane.b32.xlu0 %v1331_v19, %s1744_s24  ;;  %s3045_s13 = sld [smem:[#allocation4 + $0x26]] }
 0x143   :  { %v1416_v23 = vmul.f32 %v3773_v2, %v3772_v38  ;;  %v1394_v43 = vmul.f32 %v3774_v63, %v2672_v24  ;;  %v1389_v11 = vmul.f32 %v3775_v28, %v2641_v60  ;;  %v1332_v20 = vadd.f32 %v1330_v48, %v1326_v27 }
 0x144   :  { %v3777_v34 = vcombine.high %v3766_v49, %v3766_v49  ;;  %v1427_v12 = vadd.f32 %v1425_v17, %v1421_v57  ;;  %v3778_v15 = vstv %s3768_s4  ;;  %v1390_v29 = vadd.f32 %v1388_v1, %v1384_v40  ;;  %v3791_v40 = vld [vmem:[#allocation96_spill] sm:$0xff] }
 0x145   :  { %v1447_v9 = vmul.f32 %v3778_v15, %v2602_v50  ;;  %v1458_v32 = vstv %s2978_s5  ;;  %v1422_v5 = vadd.f32 %v2713_v44, %v1416_v23  ;;  %v3779_v51 = vmov %v3771_v41  ;;  %1337 = vrot.lane.b32.xlu1 %v1332_v20, %s1744_s24 }
 0x146   :  { %v1379_v18 = vadd.f32 %v3777_v34, %v1363_v22  ;;  %v1426_v26 = vmul.f32 %v3779_v51, %v2598_v31  ;;  %v3781_v21 = vmov %v3774_v63  ;;  %v1443_v58 = vadd.f32 %v3782_v54, %v1427_v12 }
 0x147   :  { %v1395_v13 = vmul.f32 %v3781_v21, %v2676_v0  ;;  %v3783_v48 = vstv %s3776_s27  ;;  %v1396_v44 = vadd.f32 %v1394_v43, %v1390_v29  ;;  %v3784_v7 = vmov %v3778_v15  ;;  %v3792_v43 = vld [vmem:[#allocation97_spill] sm:$0xff] }
 0x148   :  { %v1385_v4 = vadd.f32 %v1383_v8, %v1379_v18  ;;  %v1453_v52 = vmul.f32 %v3783_v48, %v2637_v47  ;;  %v1428_v10 = vadd.f32 %v1426_v26, %v1422_v5  ;;  %v1448_v35 = vmul.f32 %v3784_v7, %v2606_v3  ;;  %v283_v7 = vld [vmem:[#allocation8 + $0x7] ss:$8 sm:$0x3] }
 0x149   :  { %v1449_v36 = vadd.f32 %v1447_v9, %v1443_v58  ;;  %v1459_v37 = vmul.f32 %v1458_v32, %v2672_v24  ;;  %v704_v49 = vrot.slane %v3786_v56, %v3785_v45  ;;  %v3787_v55 = vstv %s3780_s21  ;;  %1400 = vrot.lane.b32.xlu0 %v1396_v44, %s1745_s16 }
 0x14a   :  { %v1391_v16 = vadd.f32 %v1389_v11, %v1385_v4  ;;  %v690_v59 = vmul.f32 %v3787_v55, %v2519_v6  ;;  %v3788_v1 = vcombine.high %v3782_v54, %v3782_v54  ;;  %v3789_v8 = vmov %v3783_v48  ;;  %v3793_v48 = vld [vmem:[#allocation102_spill] sm:$0xff] }
 0x14b   :  { %v1454_v25 = vmul.f32 %v3789_v8, %v2641_v60  ;;  %v3790_v57 = vmov %v3787_v55  ;;  %v1455_v22 = vadd.f32 %v1453_v52, %v1449_v36  ;;  %v1460_v17 = vmul.f32 %v1458_v32, %v2676_v0  ;;  %v292_v55 = vld [vmem:[#allocation8 + $0x13] ss:$8 sm:$0x3] }
 0x14c   :  { %v1444_v46 = vadd.f32 %v3788_v1, %v1428_v10  ;;  %v691_v19 = vmul.f32 %v3790_v57, %v2531_v30  ;;  %v1397_v27 = vadd.f32 %v1395_v13, %v1391_v16  ;;  %v705_v38 = vcombine.high %v704_v49, %v704_v49  ;;  %v286_v10 = vld [vmem:[#allocation8 + $0x10] ss:$8 sm:$0x3] }
 0x14d   :  { %v1461_v6 = vadd.f32 %v1459_v37, %v1455_v22  ;;  %v711_v2 = vstv %s3030_s1  ;;  %v692_v63 = vadd.f32 %v690_v59, %v3791_v40  ;;  %v717_v30 = vstv %s3045_s13 }
 0x14e   :  { %v1450_v41 = vadd.f32 %v1448_v35, %v1444_v46  ;;  %1402 = vrot.lane.b32.xlu1 %v1397_v27, %s1745_s16  ;;  %v693_v28 = vadd.f32 %v691_v19, %v3792_v43  ;;  %v712_v34 = vmul.f32 %v711_v2, %v2497_v39  ;;  %v1242_v18 = vstv %s3047_s10  ;;  %v3796_v46 = vld [vmem:[#allocation65_spill] sm:$0xff] }
 0x14f   :  { %1465 = vrot.lane.b32.xlu0 %v1461_v6, %s1746_s17  ;;  %v708_v20 = vadd.f32 %v704_v49, %v692_v63  ;;  %v713_v15 = vmul.f32 %v711_v2, %v2515_v61  ;;  %v723_v9 = vstv %s3055_s29  ;;  %v718_v32 = vmul.f32 %v717_v30, %v2535_v42  ;;  %v3794_v42 = vld [vmem:[#allocation103_spill] sm:$0xff] }
 0x150   :  { %v1456_v23 = vadd.f32 %v1454_v25, %v1450_v41  ;;  %v709_v12 = vadd.f32 %v705_v38, %v693_v28  ;;  %v719_v51 = vmul.f32 %v717_v30, %v2539_v33  ;;  %v1243_v26 = vmul.f32 %v1242_v18, %v2594_v14  ;;  %v3797_v25 = vld [vmem:[#allocation66_spill] sm:$0xff]  ;;  %v295_v41 = vld [vmem:[#allocation8 + $0x14] ss:$8 sm:$0x3] }
 0x151   :  { %v714_v29 = vadd.f32 %v712_v34, %v708_v20  ;;  %v1244_v4 = vmul.f32 %v1242_v18, %v2598_v31  ;;  %v724_v39 = vmul.f32 %v723_v9, %v2543_v62  ;;  %v725_v54 = vmul.f32 %v723_v9, %v2556_v53  ;;  %v289_v53 = vld [vmem:[#allocation8 + $0x11] ss:$8 sm:$0x3] }
 0x152   :  { %v1462_v11 = vadd.f32 %v1460_v17, %v1456_v23  ;;  %v715_v5 = vadd.f32 %v713_v15, %v709_v12  ;;  %v3093_v52 = vadd.f32 %v1243_v26, %v3793_v48  ;;  %vm287_vm13 = vcmp.ne.f32.partialorder %v286_v10, 0.0  ;;  %v1650_v17 = vld [vmem:[#allocation3] sm:$0xf] }
 0x153   :  { %v720_v21 = vadd.f32 %v718_v32, %v714_v29  ;;  %v3096_v44 = vadd.f32 %v1244_v4, %v3794_v42  ;;  %vm290_vm1 = vcmp.ne.f32.partialorder %v289_v53, 0.0  ;;  %vm284_vm2 = vcmp.ne.f32.partialorder %v283_v7, 0.0 }
 0x154   :  { %1467 = vrot.lane.b32.xlu1 %v1462_v11, %s1746_s17  ;;  %v721_v13 = vadd.f32 %v719_v51, %v715_v5  ;;  %v3795_v36 = vmov 0   ;;  %v1248_v59 = vstv %s1591_s19  ;;  %vm504_vm3 = vcmask 23552   ;;  %v298_v5 = vld [vmem:[#allocation8 + $0x15] ss:$8 sm:$0x3] }
 0x155   :  { %v3088_v61 = vadd.f32 %v724_v39, %v720_v21  ;;  %v586_v37 = vsel %vm287_vm13, 1, %v3795_v36  ;;  %v663_v49 = vsel %vm290_vm1, 1, %v3795_v36  ;;  %v509_v1 = vsel %vm284_vm2, 1, %v3795_v36 }
 0x156   :  { %v3090_v58 = vadd.f32 %v725_v54, %v721_v13  ;;  %v590_v8 = vrot.slane %v586_v37, %v3796_v46  ;;  %v594_v57 = vrot.slane %v586_v37, %v3797_v25  ;;  %v667_v27 = vrot.slane %v663_v49, %v3796_v46 }
 0x157   :  { %v671_v22 = vrot.slane %v663_v49, %v3797_v25  ;;  %vm293_vm4 = vcmp.ne.f32.partialorder %v292_v55, 0.0  ;;  %v1249_v6 = vmul.f32 %v1650_v17, %v1248_v59  ;;  %v513_v38 = vrot.slane %v509_v1, %v3796_v46 }
 0x158   :  { %v517_v2 = vrot.slane %v509_v1, %v3797_v25  ;;  %vm581_vm5 = vcmask 15360   ;;  %vm658_vm6 = vcmask 7168   ;;  %vm3115_vm7 = vcmp.eq.s32.totalorder %v590_v8, 1 }
 0x159   :  { %vm3119_vm8 = vcmp.eq.s32.totalorder %v594_v57, 1  ;;  %vm3125_vm9 = vcmp.eq.s32.totalorder %v667_v27, 1  ;;  %vm3129_vm10 = vcmp.eq.s32.totalorder %v671_v22, 1  ;;  %v792_v34 = vsel %vm293_vm4, 1, %v3795_v36 }
 0x15a   :  { %vm296_vm14 = vcmp.ne.f32.partialorder %v295_v41, 0.0  ;;  %v1257_v51 = vrot.slane %v1249_v6, %v3785_v45  ;;  %vm3148_vm15 = vcmp.eq.s32.totalorder %v513_v38, 1  ;;  %vm3152_vm0 = vcmp.eq.s32.totalorder %v517_v2, 1 }
 0x15b   :  { %v796_v39 = vrot.slane %v792_v34, %v3796_v46  ;;  %v869_v13 = vsel %vm296_vm14, 1, %v3795_v36  ;;  %v800_v7 = vrot.slane %v792_v34, %v3797_v25  ;;  %vm299_vm11 = vcmp.ne.f32.partialorder %v298_v5, 0.0 }
 0x15c   :  { %vm3400_vm12 = vcmask 1039360   ;;  %v877_v37 = vrot.slane %v869_v13, %v3797_v25  ;;  %vm3399_vm13 = vcmask 1031168   ;;  %v946_v59 = vsel %vm299_vm11, 1, %v3795_v36 }
 0x15d   :  { %v1258_v1 = vcombine.high %v1257_v51, %v1257_v51  ;;  %vm3172_vm1 = vcmp.eq.s32.totalorder %v796_v39, 1  ;;  %vm3176_vm2 = vcmp.eq.s32.totalorder %v800_v7, 1  ;;  %v1264_v36 = vstv %s3135_s25 }
 0x15e   :  { %vm3186_vm14 = vcmp.eq.s32.totalorder %v877_v37, 1  ;;  %v1270_v17 = vstv %s3141_s9  ;;  %vm940_vm11 = vcmask 1022976  }
 0x173   :  { %v3098_v33 = vpop.permute.xlu0 %1087 }
 0x174   :  { %v3100_v14 = vpop.permute.xlu1 %1091 }
 0x179   :  { %v3102_v31 = vpop.permute.xlu0 %1152 }
 0x17e   :  { %v3104_v62 = vpop.permute.xlu1 %1156 }
 0x184   :  { %v499_v35 = vpop.permute.xlu0 %498 }
 0x186   :  { %v503_v16 = vpop.permute.xlu1 %502 }
 0x187   :  { %v505_v18 = vsel %vm504_vm3, %v503_v16, %v499_v35  ;;  %v508_v12 = vsel %vm504_vm3, %v499_v35, %v503_v16  ;;  %v873_v16 = vrot.slane %v869_v13, %v3796_v46  ;;  %v1262_v13 = vadd.f32 %v1258_v1, %v3096_v44 }
 0x188   :  { %v520_v54 = vsel %vm3148_vm15, %v508_v12, 0.0  ;;  %v521_v48 = vsel %vm3152_vm0, %v505_v18, 0.0  ;;  %v1161_v44 = vsel %vm581_vm5, %v3102_v31, %v3104_v62 }
 0x189   :  { %v576_v56 = vpop.permute.xlu0 %575  ;;  %vm3182_vm4 = vcmp.eq.s32.totalorder %v873_v16, 1 }
 0x18d   :  { %v580_v19 = vpop.permute.xlu1 %579 }
 0x18e   :  { %v582_v43 = vsel %vm581_vm5, %v580_v19, %v576_v56  ;;  %v585_v28 = vsel %vm581_vm5, %v576_v56, %v580_v19 }
 0x18f   :  { %v597_v29 = vsel %vm3115_vm7, %v585_v28, 0.0  ;;  %v598_v32 = vsel %vm3119_vm8, %v582_v43, 0.0  ;;  %v954_v43 = vrot.slane %v946_v59, %v3797_v25 }
 0x190   :  { %v653_v23 = vpop.permute.xlu0 %652  ;;  %v599_v10 = vadd.f32 %v597_v29, %v520_v54  ;;  %v600_v53 = vadd.f32 %v598_v32, %v521_v48  ;;  %v1272_v29 = vmul.f32 %v1270_v17, %v2641_v60  ;;  %v1261_v60 = vadd.f32 %v1257_v51, %v3093_v52 }
 0x191   :  { %v1158_v52 = vsel %vm581_vm5, %v3104_v62, %v3102_v31  ;;  %v1162_v31 = vsel %vm3115_vm7, %v1161_v44, 0.0 }
 0x192   :  { %v657_v20 = vpop.permute.xlu1 %656  ;;  %v1163_v62 = vsel %vm3119_vm8, %v1158_v52, 0.0 }
 0x193   :  { %v659_v15 = vsel %vm658_vm6, %v657_v20, %v653_v23  ;;  %v662_v9 = vsel %vm658_vm6, %v653_v23, %v657_v20  ;;  %v950_v23 = vrot.slane %v946_v59, %v3796_v46 }
 0x194   :  { %v674_v45 = vsel %vm3125_vm9, %v662_v9, 0.0  ;;  %v675_v42 = vsel %vm3129_vm10, %v659_v15, 0.0  ;;  %v1276_v15 = vstv %s3167_s15  ;;  %v1271_v9 = vmul.f32 %v1270_v17, %v2637_v47 }
 0x195   :  { %v676_v56 = vadd.f32 %v674_v45, %v599_v10  ;;  %v677_v49 = vadd.f32 %v675_v42, %v600_v53  ;;  %v1096_v47 = vsel %vm504_vm3, %v3098_v33, %v3100_v14 }
 0x196   :  { %v1097_v16 = vsel %vm3148_vm15, %v1096_v47, 0.0 }
 0x197   :  { %v783_v21 = vpop.permute.xlu0 %782  ;;  %v728_v6 = vadd.f32 %v3088_v61, %v676_v56  ;;  %v729_v38 = vadd.f32 %v3090_v58, %v677_v49  ;;  %v1265_v61 = vmul.f32 %v1264_v36, %v2602_v50  ;;  %v1266_v58 = vmul.f32 %v1264_v36, %v2606_v3 }
 0x198   :  { %v1093_v3 = vsel %vm504_vm3, %v3100_v14, %v3098_v33  ;;  %v1277_v33 = vmul.f32 %v1276_v15, %v2672_v24  ;;  %v1278_v14 = vmul.f32 %v1276_v15, %v2676_v0  ;;  %vm3822_vm3 = vcmask 1039360  }
 0x199   :  { %v1098_v37 = vsel %vm3152_vm0, %v1093_v3, 0.0  ;;  %v1267_v24 = vadd.f32 %v1265_v61, %v1261_v60  ;;  %v1268_v49 = vadd.f32 %v1266_v58, %v1262_v13  ;;  %vm3823_vm5 = vmmov %vm3822_vm3 }
 0x19a   :  { %v785_v35 = vpop.permute.xlu1 %784 }
 0x19b   :  { %v787_v19 = vsel %vm3400_vm12, %v783_v21, %v785_v35  ;;  %v791_v27 = vsel %vm3400_vm12, %v785_v35, %v783_v21  ;;  %vm3215_vm12 = vcmp.eq.s32.totalorder %v954_v43, 1  ;;  %v1273_v4 = vadd.f32 %v1271_v9, %v1267_v24 }
 0x19c   :  { %v803_v28 = vsel %vm3172_vm1, %v787_v19, 0.0  ;;  %v804_v20 = vsel %vm3176_vm2, %v791_v27, 0.0  ;;  %v1274_v36 = vadd.f32 %v1272_v29, %v1268_v49 }
 0x19d   :  { %v805_v32 = vadd.f32 %v803_v28, %v728_v6  ;;  %v806_v5 = vadd.f32 %v804_v20, %v729_v38 }
 0x19e   :  { %v860_v55 = vpop.permute.xlu0 %859  ;;  %v1280_v43 = vadd.f32 %v1278_v14, %v1274_v36 }
 0x1a3   :  { %v862_v2 = vpop.permute.xlu1 %861 }
 0x1a4   :  { %v864_v34 = vsel %vm3399_vm13, %v860_v55, %v862_v2  ;;  %v868_v18 = vsel %vm3399_vm13, %v862_v2, %v860_v55  ;;  %vm3211_vm13 = vcmp.eq.s32.totalorder %v950_v23, 1  ;;  %v1279_v23 = vadd.f32 %v1277_v33, %v1273_v4 }
 0x1a5   :  { %v937_v12 = vpop.permute.xlu0 %936  ;;  %v880_v46 = vsel %vm3182_vm4, %v864_v34, 0.0  ;;  %v881_v25 = vsel %vm3186_vm14, %v868_v18, 0.0 }
 0x1a6   :  { %v882_v54 = vadd.f32 %v880_v46, %v805_v32  ;;  %v883_v48 = vadd.f32 %v881_v25, %v806_v5 }
 0x1aa   :  { %v939_v39 = vpop.permute.xlu1 %938 }
 0x1ab   :  { %v941_v45 = vsel %vm940_vm11, %v937_v12, %v939_v39  ;;  %v945_v42 = vsel %vm940_vm11, %v939_v39, %v937_v12 }
 0x1ac   :  { %v957_v10 = vsel %vm3211_vm13, %v941_v45, 0.0  ;;  %v958_v53 = vsel %vm3215_vm12, %v945_v42, 0.0 }
 0x1ad   :  { %v1218_v7 = vpop.permute.xlu0 %1217  ;;  %v959_v51 = vadd.f32 %v957_v10, %v882_v54  ;;  %v960_v35 = vadd.f32 %v958_v53, %v883_v48 }
 0x1af   :  { %v1099_v0 = vadd.f32 %v1097_v16, %v959_v51  ;;  %v1100_v55 = vadd.f32 %v1098_v37, %v960_v35 }
 0x1b0   :  { %v1222_v56 = vpop.permute.xlu1 %1221 }
 0x1b1   :  { %v1223_v59 = vsel %vm658_vm6, %v1222_v56, %v1218_v7  ;;  %v1226_v1 = vsel %vm658_vm6, %v1218_v7, %v1222_v56  ;;  %v1164_v26 = vadd.f32 %v1162_v31, %v1099_v0  ;;  %v1165_v19 = vadd.f32 %v1163_v62, %v1100_v55 }
 0x1b2   :  { %v1227_v17 = vsel %vm3125_vm9, %v1226_v1, 0.0  ;;  %v1228_v6 = vsel %vm3129_vm10, %v1223_v59, 0.0  ;;  %vm3824_vm6 = vcmask 1031168  }
 0x1b3   :  { %v1229_v38 = vadd.f32 %v1227_v17, %v1164_v26  ;;  %v1230_v2 = vadd.f32 %v1228_v6, %v1165_v19  ;;  %vm3825_vm7 = vmmov %vm3824_vm6 }
 0x1b4   :  { %v1336_v27 = vpop.permute.xlu0 %1335 }
 0x1b5   :  { %v1281_v28 = vadd.f32 %v1279_v23, %v1229_v38  ;;  %v1282_v20 = vadd.f32 %v1280_v43, %v1230_v2 }
 0x1b7   :  { %v1338_v40 = vpop.permute.xlu1 %1337 }
 0x1b8   :  { %v1339_v34 = vsel %vm3822_vm3, %v1336_v27, %v1338_v40  ;;  %v1343_v18 = vsel %vm3823_vm5, %v1338_v40, %v1336_v27 }
 0x1b9   :  { %v1344_v30 = vsel %vm3172_vm1, %v1339_v34, 0.0  ;;  %v1345_v11 = vsel %vm3176_vm2, %v1343_v18, 0.0 }
 0x1ba   :  { %v1346_v15 = vadd.f32 %v1344_v30, %v1281_v28  ;;  %v1347_v46 = vadd.f32 %v1345_v11, %v1282_v20 }
 0x1bb   :  { %v1401_v63 = vpop.permute.xlu0 %1400 }
 0x1c0   :  { %v1403_v12 = vpop.permute.xlu1 %1402 }
 0x1c1   :  { %v1404_v61 = vsel %vm3824_vm6, %v1401_v63, %v1403_v12  ;;  %v1408_v58 = vsel %vm3825_vm7, %v1403_v12, %v1401_v63  ;;  %v1466_v29 = vpop.permute.xlu0 %1465 }
 0x1c2   :  { %v1409_v25 = vsel %vm3182_vm4, %v1404_v61, 0.0  ;;  %v1410_v9 = vsel %vm3186_vm14, %v1408_v58, 0.0 }
 0x1c3   :  { %v1411_v5 = vadd.f32 %v1409_v25, %v1346_v15  ;;  %v1412_v8 = vadd.f32 %v1410_v9, %v1347_v46 }
 0x1c6   :  { %v1468_v32 = vpop.permute.xlu1 %1467 }
 0x1c7   :  { %v1469_v3 = vsel %vm940_vm11, %v1466_v29, %v1468_v32  ;;  %v1473_v57 = vsel %vm940_vm11, %v1468_v32, %v1466_v29 }
 0x1c8   :  { %v1474_v47 = vsel %vm3211_vm13, %v1469_v3, 0.0  ;;  %v1475_v39 = vsel %vm3215_vm12, %v1473_v57, 0.0 }
 0x1c9   :  { %v1476_v60 = vadd.f32 %v1474_v47, %v1411_v5  ;;  %v1477_v22 = vadd.f32 %v1475_v39, %v1412_v8 }
 0x1cb   :  { %v1616_v13 = vmul.f32 -1.442695, %v1476_v60  ;;  %v1617_v54 = vmul.f32 -1.442695, %v1477_v22 }
 0x1cd   :  { %1642 = vpow2.f32 %v1616_v13 }
 0x1ce   :  { %1644 = vpow2.f32 %v1617_v54 }
 0x1da   :  { %v1643_v41 = vpop.eup %1642 }
 0x1db   :  { %v1645_v48 = vpop.eup %1644  ;;  %v1484_v45 = vadd.f32 1.0, %v1643_v41 }
 0x1dc   :  { %v1485_v42 = vadd.f32 1.0, %v1645_v48 }
 0x1dd   :  { %1646 = vrcp.f32 %v1484_v45 }
 0x1de   :  { %1648 = vrcp.f32 %v1485_v42 }
 0x1ea   :  { %v1647_v10 = vpop.eup %1646 }
 0x1eb   :  { %v1649_v21 = vpop.eup %1648 }
 0x1ec   :  { %v1492_v53 = vcombine.low %v1647_v10, %v1649_v21 }
 0x1ee   :  { %1618 = vst.sshfl [vmem:[#allocation11] sm:$0x33 pattern:$0x76325410] %v1492_v53 }
 0x1ef   :  { %1710 = shalt.err (!%p1707_p0)
}
 0x1f0   :  { %s3826_s0 = sld [smem:[#allocation107_spill]] }
 0x1f6   :  { %1511 = dma.vmem_to_hbm [thread:$0]  %s1509_s14, 64, %s3826_s0, [#allocation6]  }
 0x1f7   :  { %1725 = dma.done.wait [#allocation6], 64  }
 0x1f8   :  { %1726 = vsyncadd [#allocation6], 4294967232 }
 0x1f9   :  { %1515 = vsyncpa [#allocation5], 1 }
 0x1fa   :  { %1516 = vsyncpa [#allocation10], 1 }
 0x1fb   :  { %1517 = vsyncpa [#allocation6], 1 }
 0x1fc   :  { %1518 = vsyncpa [#allocation7], 1 }

</bundles_post_ra>
